<compile_context>
chip_gen: v7x
topology: tpu7x:2x2x1
jax: 0.10.0
libtpu: 0.0.40
codegen_flags: <defaults>
</compile_context>

<pallas_src>
import functools

import jax
import jax.numpy as jnp
from jax import lax
from jax.experimental import pallas as pl
from jax.experimental.pallas import tpu as pltpu


def _round_up(x, m):
    return ((x + m - 1) // m) * m


def _pad_gate_matrix(w, in_pad, h, h_pad):
    """Pad a [in, 4H] gate matrix to [in_pad, 4*h_pad], per gate block.

    The four PyTorch gate blocks (i|f|g|o) are padded independently so gate k
    still occupies columns [k*h_pad, k*h_pad + h); padded rows/cols are zero,
    which keeps the padded hidden lanes exactly zero through the recurrence.
    """
    in_dim = w.shape[0]
    parts = []
    for g in range(4):
        wg = w[:, g * h:(g + 1) * h]
        parts.append(jnp.pad(wg, ((0, in_pad - in_dim), (0, h_pad - h))))
    return jnp.concatenate(parts, axis=1)


def _pad_gate_bias(b, h, h_pad):
    parts = [jnp.pad(b[g * h:(g + 1) * h], (0, h_pad - h)) for g in range(4)]
    return jnp.concatenate(parts)


def _default_vmem_limit_bytes():
    """~75% of physical VMEM: ~96 MiB on v5e/v6e (128 MiB), ~48 MiB on v7x."""
    cap = None
    try:
        cap = getattr(pltpu.get_tpu_info(), "vmem_capacity_bytes", None)
    except Exception:
        cap = None
    if not cap:
        cap = 64 * 1024 * 1024
    return int(min(cap * 3 // 4, 100 * 1024 * 1024))


def _spec(shape, index_map, single_buffer=False):
    if single_buffer:
        # Constant-index block: no point double-buffering it in VMEM.
        return pl.BlockSpec(shape, index_map, pipeline_mode=pl.Buffered(1))
    return pl.BlockSpec(shape, index_map)


def lstm_fc_kernel(x_ref, wih_ref, whh_ref, b_ref, h0_ref, c0_ref,
                   wfc_ref, bfc_ref,
                   logits_ref, hn_ref, cn_ref,
                   h_scr, c_scr, xp_scr, h_buf,
                   *, mask_len):
    """One (batch-block, time-chunk, vocab-block) grid step.

    x_ref:      [T_CHUNK, B_BLK, E]   time-major embedded inputs (mxu dtype)
    wih_ref:    [E, 4H]               input->gates weights (transposed)
    whh_ref:    [H, 4H]               hidden->gates weights (transposed)
    b_ref:      [1, 4H]               b_ih + b_hh (f32)
    h0_ref/c0_ref: [B_BLK, H]         initial state for this batch block (f32)
    wfc_ref:    [H, V_BLK], bfc_ref [1, V_BLK]   output projection tile
    logits_ref: [T_CHUNK, B_BLK, V_BLK]  time-major logits tile (lane-dense)
    hn_ref/cn_ref: [B_BLK, H]         final state
    scratch: persistent h/c state (f32), chunk input projection (f32),
             chunk hidden outputs (mxu dtype).
    """
    t_idx = pl.program_id(1)
    v_idx = pl.program_id(2)
    n_t = pl.num_programs(1)
    n_v = pl.num_programs(2)
    t_chunk, bsz, _ = x_ref.shape
    h_pad = hn_ref.shape[-1]

    # ---- recurrence + hoisted input projection run once per (b, t) chunk,
    #      on the first vocab tile only; later v tiles reuse h_buf.
    @pl.when(v_idx == 0)
    def _recurrence():
        @pl.when(t_idx == 0)
        def _():
            h_scr[...] = h0_ref[...]
            c_scr[...] = c0_ref[...]

        # One [T_CHUNK*B, E] x [E, 4H] MXU matmul per chunk, bias folded once.
        x2d = x_ref[...].reshape(t_chunk * bsz, x_ref.shape[-1])
        xp = jnp.dot(x2d, wih_ref[...], preferred_element_type=jnp.float32)
        xp = xp + b_ref[...]
        xp_scr[...] = xp.reshape(t_chunk, bsz, 4 * h_pad)

        # Serial recurrence: only h @ W_hh plus gate math remains per step.
        def step(t, carry):
            h_prev = h_scr[...]
            c_prev = c_scr[...]
            gates = xp_scr[t] + jnp.dot(h_prev.astype(whh_ref.dtype),
                                        whh_ref[...],
                                        preferred_element_type=jnp.float32)
            # PyTorch gate order: input, forget, cell(g), output. H padded to
            # 128 so every gate slice is lane-aligned.
            i = jax.nn.sigmoid(gates[:, 0:h_pad])
            f = jax.nn.sigmoid(gates[:, h_pad:2 * h_pad])
            g = jnp.tanh(gates[:, 2 * h_pad:3 * h_pad])
            o = jax.nn.sigmoid(gates[:, 3 * h_pad:4 * h_pad])
            c_new = f * c_prev + i * g
            h_new = o * jnp.tanh(c_new)
            if mask_len is not None:
                # Trailing padded time steps must not advance the state.
                valid = (t_idx * t_chunk + t) < mask_len
                c_new = jnp.where(valid, c_new, c_prev)
                h_new = jnp.where(valid, h_new, h_prev)
            c_scr[...] = c_new
            h_scr[...] = h_new
            h_buf[t] = h_new.astype(h_buf.dtype)
            return carry

        # Unrolled fori_loop keeps LLO scheduling visibility with bounded
        # vreg live ranges (partial unroll for long chunks).
        unroll = True if t_chunk <= 16 else 8
        lax.fori_loop(0, t_chunk, step, None, unroll=unroll)

    # ---- chunked output projection for the current vocab tile:
    #      one [T_CHUNK*B, H] x [H, V_BLK] MXU matmul, contiguous lane-dense
    #      store of the whole [T_CHUNK, B_BLK, V_BLK] slab (no scratch,
    #      no per-batch-row strided stores).
    h2d = h_buf[...].reshape(t_chunk * bsz, h_pad)
    lg = jnp.dot(h2d.astype(wfc_ref.dtype), wfc_ref[...],
                 preferred_element_type=jnp.float32) + bfc_ref[...]
    logits_ref[...] = lg.reshape(t_chunk, bsz, lg.shape[-1]).astype(
        logits_ref.dtype)

    # ---- final hidden state, written once per batch block.
    @pl.when(jnp.logical_and(t_idx == n_t - 1, v_idx == n_v - 1))
    def _():
        hn_ref[...] = h_scr[...]
        cn_ref[...] = c_scr[...]


def lstm_forward(x_ids, params, hidden=None, *, t_chunk=16, b_block=None,
                 v_block=None, mxu_dtype=jnp.bfloat16, logits_dtype=None):
    """Pallas-backed equivalent of LSTM.forward(x, hidden).

    x_ids: [B, T] int32 token ids.  Returns (logits [B, T, V],
    (h_n [1, B, H], c_n [1, B, H])) matching nn.LSTM(num_layers=1,
    batch_first=True) + nn.Linear.

    t_chunk:    time tile streamed through VMEM (rounded up to multiple of 8).
    b_block:    batch block size (multiple of 8). Default: whole padded batch
                (keep the per-step recurrent matmul tall; only split for
                megacore if each block still has >=128 rows).
    v_block:    vocab tile of the FC head (multiple of 128). Default: whole
                padded vocab; set to 2-4k for LM-scale vocab on v7x.
    mxu_dtype:  dtype of MXU operands (default bf16: native on v5e/v6e/v7x,
                halves weight/x VMEM+HBM traffic). Gate math, accumulation
                and the recurrent state stay float32.
    logits_dtype: dtype of the emitted logits (default: mxu_dtype).
    """
    B, T = x_ids.shape
    _, E = params["embedding"].shape
    H = params["w_hh"].shape[0]
    V = params["w_fc"].shape[1]
    f32 = jnp.float32
    if logits_dtype is None:
        logits_dtype = mxu_dtype

    # ---- TPU-friendly padded sizes: lane dims to 128, sublane dims to 8.
    h_pad = _round_up(H, 128)
    e_pad = _round_up(E, 128)
    b_pad = _round_up(B, 8)
    v_pad = _round_up(V, 128)
    tc = _round_up(min(t_chunk, T), 8)
    t_pad = _round_up(T, tc)
    mask_len = None if t_pad == T else T

    b_blk = b_pad if b_block is None else b_block
    assert b_blk % 8 == 0 and b_pad % b_blk == 0
    n_b = b_pad // b_blk

    v_blk = v_pad if v_block is None else _round_up(min(v_block, v_pad), 128)
    v_pad = _round_up(v_pad, v_blk)
    n_v = v_pad // v_blk
    n_t = t_pad // tc

    # ---- embedding gather (plain-JAX glue), produced time-major [T, B, E].
    # NOTE: jnp.take clamps out-of-range ids (PyTorch nn.Embedding raises).
    emb_tbl = jnp.pad(params["embedding"].astype(mxu_dtype),
                      ((0, 0), (0, e_pad - E)))
    x_tm = jnp.take(emb_tbl, x_ids.T, axis=0)                  # [T, B, e_pad]
    x_tm = jnp.pad(x_tm, ((0, t_pad - T), (0, b_pad - B), (0, 0)))

    # ---- parameters, padded per gate so padded lanes stay inert.
    w_ih = _pad_gate_matrix(params["w_ih"], e_pad, H, h_pad).astype(mxu_dtype)
    w_hh = _pad_gate_matrix(params["w_hh"], h_pad, H, h_pad).astype(mxu_dtype)
    bias = _pad_gate_bias((params["b_ih"] + params["b_hh"]).astype(f32),
                          H, h_pad).reshape(1, 4 * h_pad)
    w_fc = jnp.pad(params["w_fc"],
                   ((0, h_pad - H), (0, v_pad - V))).astype(mxu_dtype)
    b_fc = jnp.pad(params["b_fc"], (0, v_pad - V)).astype(f32).reshape(1, v_pad)

    if hidden is None:
        h0 = jnp.zeros((b_pad, h_pad), f32)
        c0 = jnp.zeros((b_pad, h_pad), f32)
    else:
        h0 = jnp.pad(hidden[0].reshape(B, H).astype(f32),
                     ((0, b_pad - B), (0, h_pad - H)))
        c0 = jnp.pad(hidden[1].reshape(B, H).astype(f32),
                     ((0, b_pad - B), (0, h_pad - H)))

    kernel = functools.partial(lstm_fc_kernel, mask_len=mask_len)

    grid_spec = pltpu.PrefetchScalarGridSpec(
        num_scalar_prefetch=0,
        grid=(n_b, n_t, n_v),
        in_specs=[
            _spec((tc, b_blk, e_pad), lambda b, t, v: (t, b, 0)),          # x
            _spec((e_pad, 4 * h_pad), lambda b, t, v: (0, 0), True),       # W_ih
            _spec((h_pad, 4 * h_pad), lambda b, t, v: (0, 0), True),       # W_hh
            _spec((1, 4 * h_pad), lambda b, t, v: (0, 0), True),           # bias
            _spec((b_blk, h_pad), lambda b, t, v: (b, 0), n_b == 1),       # h0
            _spec((b_blk, h_pad), lambda b, t, v: (b, 0), n_b == 1),       # c0
            _spec((h_pad, v_blk), lambda b, t, v: (0, v), n_v == 1),       # W_fc
            _spec((1, v_blk), lambda b, t, v: (0, v), n_v == 1),           # b_fc
        ],
        out_specs=[
            pl.BlockSpec((tc, b_blk, v_blk), lambda b, t, v: (t, b, v)),   # logits
            pl.BlockSpec((b_blk, h_pad), lambda b, t, v: (b, 0)),          # h_n
            pl.BlockSpec((b_blk, h_pad), lambda b, t, v: (b, 0)),          # c_n
        ],
        scratch_shapes=[
            pltpu.VMEM((b_blk, h_pad), f32),            # recurrent h (f32)
            pltpu.VMEM((b_blk, h_pad), f32),            # recurrent c (f32)
            pltpu.VMEM((tc, b_blk, 4 * h_pad), f32),    # chunk input projection
            pltpu.VMEM((tc, b_blk, h_pad), mxu_dtype),  # chunk hidden outputs
        ],
    )

    logits_tm, hn_p, cn_p = pl.pallas_call(
        kernel,
        out_shape=(
            jax.ShapeDtypeStruct((t_pad, b_pad, v_pad), logits_dtype),
            jax.ShapeDtypeStruct((b_pad, h_pad), f32),
            jax.ShapeDtypeStruct((b_pad, h_pad), f32),
        ),
        grid_spec=grid_spec,
        compiler_params=pltpu.CompilerParams(
            dimension_semantics=("parallel", "arbitrary", "arbitrary"),
            vmem_limit_bytes=_default_vmem_limit_bytes(),
        ),
    )(x_tm, w_ih, w_hh, bias, h0, c0, w_fc, b_fc)

    # Logits come out time-major; one cheap wrapper transpose to batch-first.
    logits = jnp.transpose(logits_tm[:T, :B, :V], (1, 0, 2))
    h_n = hn_p[:B, :H].reshape(1, B, H)
    c_n = cn_p[:B, :H].reshape(1, B, H)
    return logits, (h_n, c_n)


def lstm_forward_ref(x_ids, params, hidden=None):
    """Pure-JAX reference (mirrors PyTorch nn.LSTM math) for validation."""
    emb = jnp.take(params["embedding"], x_ids, axis=0)
    B, T, _ = emb.shape
    H = params["w_hh"].shape[0]
    if hidden is None:
        h = jnp.zeros((B, H), jnp.float32)
        c = jnp.zeros((B, H), jnp.float32)
    else:
        h = hidden[0].reshape(B, H)
        c = hidden[1].reshape(B, H)
    outs = []
    for t in range(T):
        gates = (emb[:, t] @ params["w_ih"] + h @ params["w_hh"]
                 + params["b_ih"] + params["b_hh"])
        i, f, g, o = jnp.split(gates, 4, axis=-1)
        i, f, o = jax.nn.sigmoid(i), jax.nn.sigmoid(f), jax.nn.sigmoid(o)
        g = jnp.tanh(g)
        c = f * c + i * g
        h = o * jnp.tanh(c)
        outs.append(h)
    out = jnp.stack(outs, axis=1)                                  # [B, T, H]
    logits = out @ params["w_fc"] + params["b_fc"]
    return logits, (h.reshape(1, B, H), c.reshape(1, B, H))


def init_params(key, vocab_size, embed_size, hidden_size):
    ks = jax.random.split(key, 7)
    bound = 1.0 / jnp.sqrt(hidden_size)
    return {
        # nn.Embedding(vocab_size, embed_size): N(0, 1)
        "embedding": jax.random.normal(ks[0], (vocab_size, embed_size),
                                       jnp.float32),
        # nn.LSTM weights stored transposed: [in, 4H] / [H, 4H]
        "w_ih": jax.random.uniform(ks[1], (embed_size, 4 * hidden_size),
                                   jnp.float32, -bound, bound),
        "w_hh": jax.random.uniform(ks[2], (hidden_size, 4 * hidden_size),
                                   jnp.float32, -bound, bound),
        "b_ih": jax.random.uniform(ks[3], (4 * hidden_size,),
                                   jnp.float32, -bound, bound),
        "b_hh": jax.random.uniform(ks[4], (4 * hidden_size,),
                                   jnp.float32, -bound, bound),
        # nn.Linear(hidden_size, vocab_size), stored transposed: [H, V]
        "w_fc": jax.random.uniform(ks[5], (hidden_size, vocab_size),
                                   jnp.float32, -bound, bound),
        "b_fc": jax.random.uniform(ks[6], (vocab_size,),
                                   jnp.float32, -bound, bound),
    }


if __name__ == "__main__":
    vocab_size, embed_size, hidden_size = 512, 16, 32
    batch, seq = 2, 20          # seq=20 exercises padded-time masking

    key = jax.random.PRNGKey(0)
    k_param, k_data, k_h, k_c = jax.random.split(key, 4)
    params = init_params(k_param, vocab_size, embed_size, hidden_size)
    x_ids = jax.random.randint(k_data, (batch, seq), 0, vocab_size, jnp.int32)

    logits_ref, (h_ref, c_ref) = lstm_forward_ref(x_ids, params, hidden=None)

    # 1) Default fast config: bf16 MXU operands + bf16 logits, t_chunk=16.
    logits, (h_n, c_n) = lstm_forward(x_ids, params, hidden=None)
    jax.block_until_ready(logits)
    jax.block_until_ready(h_n)
    jax.block_until_ready(c_n)
    assert logits.shape == (batch, seq, vocab_size)
    assert h_n.shape == (1, batch, hidden_size)
    assert c_n.shape == (1, batch, hidden_size)
    assert jnp.allclose(logits.astype(jnp.float32), logits_ref,
                        atol=5e-2, rtol=5e-2)
    assert jnp.allclose(h_n.astype(jnp.float32), h_ref, atol=5e-2, rtol=5e-2)
    assert jnp.allclose(c_n.astype(jnp.float32), c_ref, atol=5e-2, rtol=5e-2)

    # 2) f32 exact path: provided hidden state, multiple time chunks and a
    #    tiled vocab axis (n_v=2) to exercise the V-tiling code path.
    h0 = 0.1 * jax.random.normal(k_h, (1, batch, hidden_size), jnp.float32)
    c0 = 0.1 * jax.random.normal(k_c, (1, batch, hidden_size), jnp.float32)
    logits2, (h2, c2) = lstm_forward(
        x_ids, params, hidden=(h0, c0), t_chunk=8, v_block=256,
        mxu_dtype=jnp.float32, logits_dtype=jnp.float32)
    jax.block_until_ready(logits2)
    logits2_ref, (h2_ref, c2_ref) = lstm_forward_ref(x_ids, params,
                                                     hidden=(h0, c0))
    assert jnp.allclose(logits2, logits2_ref, atol=1e-4, rtol=1e-4)
    assert jnp.allclose(h2, h2_ref, atol=1e-4, rtol=1e-4)
    assert jnp.allclose(c2, c2_ref, atol=1e-4, rtol=1e-4)

    print("KERNEL_OK")
</pallas_src>

<mosaic_0001>
module attributes {stable_mosaic.version = 11 : i64} {
  func.func @lstm_fc_kernel(%arg0: i32, %arg1: i32, %arg2: i32, %arg3: memref<16x8x128xbf16, #tpu.memory_space<vmem>>, %arg4: memref<128x512xbf16, #tpu.memory_space<vmem>>, %arg5: memref<128x512xbf16, #tpu.memory_space<vmem>>, %arg6: memref<1x512xf32, #tpu.memory_space<vmem>>, %arg7: memref<8x128xf32, #tpu.memory_space<vmem>>, %arg8: memref<8x128xf32, #tpu.memory_space<vmem>>, %arg9: memref<128x512xbf16, #tpu.memory_space<vmem>>, %arg10: memref<1x512xf32, #tpu.memory_space<vmem>>, %arg11: memref<16x8x512xbf16, #tpu.memory_space<vmem>>, %arg12: memref<8x128xf32, #tpu.memory_space<vmem>>, %arg13: memref<8x128xf32, #tpu.memory_space<vmem>>, %arg14: memref<8x128xf32, #tpu.memory_space<vmem>>, %arg15: memref<8x128xf32, #tpu.memory_space<vmem>>, %arg16: memref<16x8x512xf32, #tpu.memory_space<vmem>>, %arg17: memref<16x8x128xbf16, #tpu.memory_space<vmem>>) attributes {dimension_semantics = [#tpu.dimension_semantics<parallel>, #tpu.dimension_semantics<arbitrary>, #tpu.dimension_semantics<arbitrary>], iteration_bounds = array<i64: 1, 2, 1>, scalar_prefetch = 0 : i64, scratch_operands = 4 : i64, tpu.core_type = #tpu.core_type<tc>, window_params = [{transform_indices = @transform_0, window_bounds = array<i64: 16, 8, 128>}, {pipeline_mode = #tpu.pipeline_mode<synchronous>, transform_indices = @transform_1, window_bounds = array<i64: 128, 512>}, {pipeline_mode = #tpu.pipeline_mode<synchronous>, transform_indices = @transform_2, window_bounds = array<i64: 128, 512>}, {pipeline_mode = #tpu.pipeline_mode<synchronous>, transform_indices = @transform_3, window_bounds = array<i64: 1, 512>}, {pipeline_mode = #tpu.pipeline_mode<synchronous>, transform_indices = @transform_4, window_bounds = array<i64: 8, 128>}, {pipeline_mode = #tpu.pipeline_mode<synchronous>, transform_indices = @transform_5, window_bounds = array<i64: 8, 128>}, {pipeline_mode = #tpu.pipeline_mode<synchronous>, transform_indices = @transform_6, window_bounds = array<i64: 128, 512>}, {pipeline_mode = #tpu.pipeline_mode<synchronous>, transform_indices = @transform_7, window_bounds = array<i64: 1, 512>}, {transform_indices = @transform_8, window_bounds = array<i64: 16, 8, 512>}, {transform_indices = @transform_9, window_bounds = array<i64: 8, 128>}, {transform_indices = @transform_10, window_bounds = array<i64: 8, 128>}]} {
    %c0_i32 = arith.constant 0 : i32
    %0 = arith.cmpi eq, %arg2, %c0_i32 : i32
    %1 = arith.extui %0 : i1 to i32
    %c0_i32_0 = arith.constant 0 : i32
    %2 = arith.cmpi ne, %1, %c0_i32_0 : i32
    scf.if %2 {
      %c0_i32_12 = arith.constant 0 : i32
      %18 = arith.cmpi eq, %arg1, %c0_i32_12 : i32
      %19 = arith.extui %18 : i1 to i32
      %c0_i32_13 = arith.constant 0 : i32
      %20 = arith.cmpi ne, %19, %c0_i32_13 : i32
      scf.if %20 {
        %c0_346 = arith.constant 0 : index
        %c0_347 = arith.constant 0 : index
        %766 = vector.load %arg7[%c0_346, %c0_347] : memref<8x128xf32, #tpu.memory_space<vmem>>, vector<8x128xf32>
        %c0_348 = arith.constant 0 : index
        %c0_349 = arith.constant 0 : index
        %767 = vector.load %arg14[%c0_348, %c0_349] : memref<8x128xf32, #tpu.memory_space<vmem>>, vector<8x128xf32>
        tpu.vector_store %arg14[%c0_348, %c0_349], %766 {strides = array<i32>} : memref<8x128xf32, #tpu.memory_space<vmem>>, vector<8x128xf32>,
        %c0_350 = arith.constant 0 : index
        %c0_351 = arith.constant 0 : index
        %768 = vector.load %arg8[%c0_350, %c0_351] : memref<8x128xf32, #tpu.memory_space<vmem>>, vector<8x128xf32>
        %c0_352 = arith.constant 0 : index
        %c0_353 = arith.constant 0 : index
        %769 = vector.load %arg15[%c0_352, %c0_353] : memref<8x128xf32, #tpu.memory_space<vmem>>, vector<8x128xf32>
        tpu.vector_store %arg15[%c0_352, %c0_353], %768 {strides = array<i32>} : memref<8x128xf32, #tpu.memory_space<vmem>>, vector<8x128xf32>,
      } else {
      }
      %c0_14 = arith.constant 0 : index
      %c0_15 = arith.constant 0 : index
      %c0_16 = arith.constant 0 : index
      %21 = vector.load %arg3[%c0_14, %c0_15, %c0_16] : memref<16x8x128xbf16, #tpu.memory_space<vmem>>, vector<16x8x128xbf16>
      %22 = vector.shape_cast %21 : vector<16x8x128xbf16> to vector<128x128xbf16>
      %c0_17 = arith.constant 0 : index
      %c0_18 = arith.constant 0 : index
      %23 = vector.load %arg4[%c0_17, %c0_18] : memref<128x512xbf16, #tpu.memory_space<vmem>>, vector<128x512xbf16>
      %cst_19 = arith.constant dense<0.000000e+00> : vector<128x512xf32>
      %24 = tpu.matmul %22, %23, %cst_19 {dimension_numbers = #tpu.dot_dimension_numbers<[1], [0], [0], [1], [0, 0, 1, 1], [], []>} : vector<128x128xbf16>, vector<128x512xbf16>, vector<128x512xf32> -> vector<128x512xf32>
      %c0_20 = arith.constant 0 : index
      %c0_21 = arith.constant 0 : index
      %25 = vector.load %arg6[%c0_20, %c0_21] : memref<1x512xf32, #tpu.memory_space<vmem>>, vector<1x512xf32>
      %26 = vector.broadcast %25 : vector<1x512xf32> to vector<128x512xf32>
      %27 = arith.addf %24, %26 : vector<128x512xf32>
      %28 = vector.shape_cast %27 : vector<128x512xf32> to vector<16x8x512xf32>
      %c0_22 = arith.constant 0 : index
      %c0_23 = arith.constant 0 : index
      %c0_24 = arith.constant 0 : index
      %29 = vector.load %arg16[%c0_22, %c0_23, %c0_24] : memref<16x8x512xf32, #tpu.memory_space<vmem>>, vector<16x8x512xf32>
      tpu.vector_store %arg16[%c0_22, %c0_23, %c0_24], %28 {strides = array<i32>} : memref<16x8x512xf32, #tpu.memory_space<vmem>>, vector<16x8x512xf32>,
      %c0_i32_25 = arith.constant 0 : i32
      %c0_26 = arith.constant 0 : index
      %c0_27 = arith.constant 0 : index
      %30 = vector.load %arg14[%c0_26, %c0_27] : memref<8x128xf32, #tpu.memory_space<vmem>>, vector<8x128xf32>
      %c0_28 = arith.constant 0 : index
      %c0_29 = arith.constant 0 : index
      %31 = vector.load %arg15[%c0_28, %c0_29] : memref<8x128xf32, #tpu.memory_space<vmem>>, vector<8x128xf32>
      %32 = arith.index_cast %c0_i32_25 : i32 to index
      %c0_30 = arith.constant 0 : index
      %c0_31 = arith.constant 0 : index
      %33 = vector.load %arg16[%32, %c0_30, %c0_31] : memref<16x8x512xf32, #tpu.memory_space<vmem>>, vector<1x8x512xf32>
      %34 = vector.shape_cast %33 : vector<1x8x512xf32> to vector<8x512xf32>
      %35 = arith.truncf %30 : vector<8x128xf32> to vector<8x128xbf16>
      %c0_32 = arith.constant 0 : index
      %c0_33 = arith.constant 0 : index
      %36 = vector.load %arg5[%c0_32, %c0_33] : memref<128x512xbf16, #tpu.memory_space<vmem>>, vector<128x512xbf16>
      %cst_34 = arith.constant dense<0.000000e+00> : vector<8x512xf32>
      %37 = tpu.matmul %35, %36, %cst_34 {dimension_numbers = #tpu.dot_dimension_numbers<[1], [0], [0], [1], [0, 0, 1, 1], [], []>} : vector<8x128xbf16>, vector<128x512xbf16>, vector<8x512xf32> -> vector<8x512xf32>
      %38 = arith.addf %34, %37 : vector<8x512xf32>
      %39 = vector.extract_strided_slice %38 {offsets = [0, 0], sizes = [8, 128], strides = [1, 1]} : vector<8x512xf32> to vector<8x128xf32>
      %40 = arith.negf %39 : vector<8x128xf32>
      %41 = math.exp %40 : vector<8x128xf32>
      %cst_35 = arith.constant 1.000000e+00 : f32
      %42 = vector.broadcast %cst_35 : f32 to vector<8x128xf32>
      %43 = arith.addf %42, %41 : vector<8x128xf32>
      %44 = arith.divf %42, %43 : vector<8x128xf32>
      %45 = vector.extract_strided_slice %38 {offsets = [0, 128], sizes = [8, 128], strides = [1, 1]} : vector<8x512xf32> to vector<8x128xf32>
      %46 = arith.negf %45 : vector<8x128xf32>
      %47 = math.exp %46 : vector<8x128xf32>
      %cst_36 = arith.constant 1.000000e+00 : f32
      %48 = vector.broadcast %cst_36 : f32 to vector<8x128xf32>
      %49 = arith.addf %48, %47 : vector<8x128xf32>
      %50 = arith.divf %48, %49 : vector<8x128xf32>
      %51 = vector.extract_strided_slice %38 {offsets = [0, 256], sizes = [8, 128], strides = [1, 1]} : vector<8x512xf32> to vector<8x128xf32>
      %52 = math.tanh %51 : vector<8x128xf32>
      %53 = vector.extract_strided_slice %38 {offsets = [0, 384], sizes = [8, 128], strides = [1, 1]} : vector<8x512xf32> to vector<8x128xf32>
      %54 = arith.negf %53 : vector<8x128xf32>
      %55 = math.exp %54 : vector<8x128xf32>
      %cst_37 = arith.constant 1.000000e+00 : f32
      %56 = vector.broadcast %cst_37 : f32 to vector<8x128xf32>
      %57 = arith.addf %56, %55 : vector<8x128xf32>
      %58 = arith.divf %56, %57 : vector<8x128xf32>
      %59 = arith.mulf %50, %31 : vector<8x128xf32>
      %60 = arith.mulf %44, %52 : vector<8x128xf32>
      %61 = arith.addf %59, %60 : vector<8x128xf32>
      %62 = math.tanh %61 : vector<8x128xf32>
      %63 = arith.mulf %58, %62 : vector<8x128xf32>
      %c16_i32 = arith.constant 16 : i32
      %64 = arith.muli %arg1, %c16_i32 : i32
      %65 = arith.addi %64, %c0_i32_25 : i32
      %c20_i32 = arith.constant 20 : i32
      %66 = arith.cmpi slt, %65, %c20_i32 : i32
      %67 = arith.select %66, %61, %31 : vector<8x128xf32>
      %68 = arith.select %66, %63, %30 : vector<8x128xf32>
      %c0_38 = arith.constant 0 : index
      %c0_39 = arith.constant 0 : index
      %69 = vector.load %arg15[%c0_38, %c0_39] : memref<8x128xf32, #tpu.memory_space<vmem>>, vector<8x128xf32>
      tpu.vector_store %arg15[%c0_38, %c0_39], %67 {strides = array<i32>} : memref<8x128xf32, #tpu.memory_space<vmem>>, vector<8x128xf32>,
      %c0_40 = arith.constant 0 : index
      %c0_41 = arith.constant 0 : index
      %70 = vector.load %arg14[%c0_40, %c0_41] : memref<8x128xf32, #tpu.memory_space<vmem>>, vector<8x128xf32>
      tpu.vector_store %arg14[%c0_40, %c0_41], %68 {strides = array<i32>} : memref<8x128xf32, #tpu.memory_space<vmem>>, vector<8x128xf32>,
      %71 = arith.truncf %68 : vector<8x128xf32> to vector<8x128xbf16>
      %72 = arith.index_cast %c0_i32_25 : i32 to index
      %c0_42 = arith.constant 0 : index
      %c0_43 = arith.constant 0 : index
      %73 = vector.load %arg17[%72, %c0_42, %c0_43] : memref<16x8x128xbf16, #tpu.memory_space<vmem>>, vector<1x8x128xbf16>
      %74 = vector.shape_cast %73 : vector<1x8x128xbf16> to vector<8x128xbf16>
      %75 = vector.shape_cast %71 : vector<8x128xbf16> to vector<1x8x128xbf16>
      tpu.vector_store %arg17[%72, %c0_42, %c0_43], %75 {strides = array<i32>} : memref<16x8x128xbf16, #tpu.memory_space<vmem>>, vector<1x8x128xbf16>,
      %c1_i32_44 = arith.constant 1 : i32
      %c0_45 = arith.constant 0 : index
      %c0_46 = arith.constant 0 : index
      %76 = vector.load %arg14[%c0_45, %c0_46] : memref<8x128xf32, #tpu.memory_space<vmem>>, vector<8x128xf32>
      %c0_47 = arith.constant 0 : index
      %c0_48 = arith.constant 0 : index
      %77 = vector.load %arg15[%c0_47, %c0_48] : memref<8x128xf32, #tpu.memory_space<vmem>>, vector<8x128xf32>
      %78 = arith.index_cast %c1_i32_44 : i32 to index
      %c0_49 = arith.constant 0 : index
      %c0_50 = arith.constant 0 : index
      %79 = vector.load %arg16[%78, %c0_49, %c0_50] : memref<16x8x512xf32, #tpu.memory_space<vmem>>, vector<1x8x512xf32>
      %80 = vector.shape_cast %79 : vector<1x8x512xf32> to vector<8x512xf32>
      %81 = arith.truncf %76 : vector<8x128xf32> to vector<8x128xbf16>
      %c0_51 = arith.constant 0 : index
      %c0_52 = arith.constant 0 : index
      %82 = vector.load %arg5[%c0_51, %c0_52] : memref<128x512xbf16, #tpu.memory_space<vmem>>, vector<128x512xbf16>
      %cst_53 = arith.constant dense<0.000000e+00> : vector<8x512xf32>
      %83 = tpu.matmul %81, %82, %cst_53 {dimension_numbers = #tpu.dot_dimension_numbers<[1], [0], [0], [1], [0, 0, 1, 1], [], []>} : vector<8x128xbf16>, vector<128x512xbf16>, vector<8x512xf32> -> vector<8x512xf32>
      %84 = arith.addf %80, %83 : vector<8x512xf32>
      %85 = vector.extract_strided_slice %84 {offsets = [0, 0], sizes = [8, 128], strides = [1, 1]} : vector<8x512xf32> to vector<8x128xf32>
      %86 = arith.negf %85 : vector<8x128xf32>
      %87 = math.exp %86 : vector<8x128xf32>
      %cst_54 = arith.constant 1.000000e+00 : f32
      %88 = vector.broadcast %cst_54 : f32 to vector<8x128xf32>
      %89 = arith.addf %88, %87 : vector<8x128xf32>
      %90 = arith.divf %88, %89 : vector<8x128xf32>
      %91 = vector.extract_strided_slice %84 {offsets = [0, 128], sizes = [8, 128], strides = [1, 1]} : vector<8x512xf32> to vector<8x128xf32>
      %92 = arith.negf %91 : vector<8x128xf32>
      %93 = math.exp %92 : vector<8x128xf32>
      %cst_55 = arith.constant 1.000000e+00 : f32
      %94 = vector.broadcast %cst_55 : f32 to vector<8x128xf32>
      %95 = arith.addf %94, %93 : vector<8x128xf32>
      %96 = arith.divf %94, %95 : vector<8x128xf32>
      %97 = vector.extract_strided_slice %84 {offsets = [0, 256], sizes = [8, 128], strides = [1, 1]} : vector<8x512xf32> to vector<8x128xf32>
      %98 = math.tanh %97 : vector<8x128xf32>
      %99 = vector.extract_strided_slice %84 {offsets = [0, 384], sizes = [8, 128], strides = [1, 1]} : vector<8x512xf32> to vector<8x128xf32>
      %100 = arith.negf %99 : vector<8x128xf32>
      %101 = math.exp %100 : vector<8x128xf32>
      %cst_56 = arith.constant 1.000000e+00 : f32
      %102 = vector.broadcast %cst_56 : f32 to vector<8x128xf32>
      %103 = arith.addf %102, %101 : vector<8x128xf32>
      %104 = arith.divf %102, %103 : vector<8x128xf32>
      %105 = arith.mulf %96, %77 : vector<8x128xf32>
      %106 = arith.mulf %90, %98 : vector<8x128xf32>
      %107 = arith.addf %105, %106 : vector<8x128xf32>
      %108 = math.tanh %107 : vector<8x128xf32>
      %109 = arith.mulf %104, %108 : vector<8x128xf32>
      %c16_i32_57 = arith.constant 16 : i32
      %110 = arith.muli %arg1, %c16_i32_57 : i32
      %111 = arith.addi %110, %c1_i32_44 : i32
      %c20_i32_58 = arith.constant 20 : i32
      %112 = arith.cmpi slt, %111, %c20_i32_58 : i32
      %113 = arith.select %112, %107, %77 : vector<8x128xf32>
      %114 = arith.select %112, %109, %76 : vector<8x128xf32>
      %c0_59 = arith.constant 0 : index
      %c0_60 = arith.constant 0 : index
      %115 = vector.load %arg15[%c0_59, %c0_60] : memref<8x128xf32, #tpu.memory_space<vmem>>, vector<8x128xf32>
      tpu.vector_store %arg15[%c0_59, %c0_60], %113 {strides = array<i32>} : memref<8x128xf32, #tpu.memory_space<vmem>>, vector<8x128xf32>,
      %c0_61 = arith.constant 0 : index
      %c0_62 = arith.constant 0 : index
      %116 = vector.load %arg14[%c0_61, %c0_62] : memref<8x128xf32, #tpu.memory_space<vmem>>, vector<8x128xf32>
      tpu.vector_store %arg14[%c0_61, %c0_62], %114 {strides = array<i32>} : memref<8x128xf32, #tpu.memory_space<vmem>>, vector<8x128xf32>,
      %117 = arith.truncf %114 : vector<8x128xf32> to vector<8x128xbf16>
      %118 = arith.index_cast %c1_i32_44 : i32 to index
      %c0_63 = arith.constant 0 : index
      %c0_64 = arith.constant 0 : index
      %119 = vector.load %arg17[%118, %c0_63, %c0_64] : memref<16x8x128xbf16, #tpu.memory_space<vmem>>, vector<1x8x128xbf16>
      %120 = vector.shape_cast %119 : vector<1x8x128xbf16> to vector<8x128xbf16>
      %121 = vector.shape_cast %117 : vector<8x128xbf16> to vector<1x8x128xbf16>
      tpu.vector_store %arg17[%118, %c0_63, %c0_64], %121 {strides = array<i32>} : memref<16x8x128xbf16, #tpu.memory_space<vmem>>, vector<1x8x128xbf16>,
      %c2_i32 = arith.constant 2 : i32
      %c0_65 = arith.constant 0 : index
      %c0_66 = arith.constant 0 : index
      %122 = vector.load %arg14[%c0_65, %c0_66] : memref<8x128xf32, #tpu.memory_space<vmem>>, vector<8x128xf32>
      %c0_67 = arith.constant 0 : index
      %c0_68 = arith.constant 0 : index
      %123 = vector.load %arg15[%c0_67, %c0_68] : memref<8x128xf32, #tpu.memory_space<vmem>>, vector<8x128xf32>
      %124 = arith.index_cast %c2_i32 : i32 to index
      %c0_69 = arith.constant 0 : index
      %c0_70 = arith.constant 0 : index
      %125 = vector.load %arg16[%124, %c0_69, %c0_70] : memref<16x8x512xf32, #tpu.memory_space<vmem>>, vector<1x8x512xf32>
      %126 = vector.shape_cast %125 : vector<1x8x512xf32> to vector<8x512xf32>
      %127 = arith.truncf %122 : vector<8x128xf32> to vector<8x128xbf16>
      %c0_71 = arith.constant 0 : index
      %c0_72 = arith.constant 0 : index
      %128 = vector.load %arg5[%c0_71, %c0_72] : memref<128x512xbf16, #tpu.memory_space<vmem>>, vector<128x512xbf16>
      %cst_73 = arith.constant dense<0.000000e+00> : vector<8x512xf32>
      %129 = tpu.matmul %127, %128, %cst_73 {dimension_numbers = #tpu.dot_dimension_numbers<[1], [0], [0], [1], [0, 0, 1, 1], [], []>} : vector<8x128xbf16>, vector<128x512xbf16>, vector<8x512xf32> -> vector<8x512xf32>
      %130 = arith.addf %126, %129 : vector<8x512xf32>
      %131 = vector.extract_strided_slice %130 {offsets = [0, 0], sizes = [8, 128], strides = [1, 1]} : vector<8x512xf32> to vector<8x128xf32>
      %132 = arith.negf %131 : vector<8x128xf32>
      %133 = math.exp %132 : vector<8x128xf32>
      %cst_74 = arith.constant 1.000000e+00 : f32
      %134 = vector.broadcast %cst_74 : f32 to vector<8x128xf32>
      %135 = arith.addf %134, %133 : vector<8x128xf32>
      %136 = arith.divf %134, %135 : vector<8x128xf32>
      %137 = vector.extract_strided_slice %130 {offsets = [0, 128], sizes = [8, 128], strides = [1, 1]} : vector<8x512xf32> to vector<8x128xf32>
      %138 = arith.negf %137 : vector<8x128xf32>
      %139 = math.exp %138 : vector<8x128xf32>
      %cst_75 = arith.constant 1.000000e+00 : f32
      %140 = vector.broadcast %cst_75 : f32 to vector<8x128xf32>
      %141 = arith.addf %140, %139 : vector<8x128xf32>
      %142 = arith.divf %140, %141 : vector<8x128xf32>
      %143 = vector.extract_strided_slice %130 {offsets = [0, 256], sizes = [8, 128], strides = [1, 1]} : vector<8x512xf32> to vector<8x128xf32>
      %144 = math.tanh %143 : vector<8x128xf32>
      %145 = vector.extract_strided_slice %130 {offsets = [0, 384], sizes = [8, 128], strides = [1, 1]} : vector<8x512xf32> to vector<8x128xf32>
      %146 = arith.negf %145 : vector<8x128xf32>
      %147 = math.exp %146 : vector<8x128xf32>
      %cst_76 = arith.constant 1.000000e+00 : f32
      %148 = vector.broadcast %cst_76 : f32 to vector<8x128xf32>
      %149 = arith.addf %148, %147 : vector<8x128xf32>
      %150 = arith.divf %148, %149 : vector<8x128xf32>
      %151 = arith.mulf %142, %123 : vector<8x128xf32>
      %152 = arith.mulf %136, %144 : vector<8x128xf32>
      %153 = arith.addf %151, %152 : vector<8x128xf32>
      %154 = math.tanh %153 : vector<8x128xf32>
      %155 = arith.mulf %150, %154 : vector<8x128xf32>
      %c16_i32_77 = arith.constant 16 : i32
      %156 = arith.muli %arg1, %c16_i32_77 : i32
      %157 = arith.addi %156, %c2_i32 : i32
      %c20_i32_78 = arith.constant 20 : i32
      %158 = arith.cmpi slt, %157, %c20_i32_78 : i32
      %159 = arith.select %158, %153, %123 : vector<8x128xf32>
      %160 = arith.select %158, %155, %122 : vector<8x128xf32>
      %c0_79 = arith.constant 0 : index
      %c0_80 = arith.constant 0 : index
      %161 = vector.load %arg15[%c0_79, %c0_80] : memref<8x128xf32, #tpu.memory_space<vmem>>, vector<8x128xf32>
      tpu.vector_store %arg15[%c0_79, %c0_80], %159 {strides = array<i32>} : memref<8x128xf32, #tpu.memory_space<vmem>>, vector<8x128xf32>,
      %c0_81 = arith.constant 0 : index
      %c0_82 = arith.constant 0 : index
      %162 = vector.load %arg14[%c0_81, %c0_82] : memref<8x128xf32, #tpu.memory_space<vmem>>, vector<8x128xf32>
      tpu.vector_store %arg14[%c0_81, %c0_82], %160 {strides = array<i32>} : memref<8x128xf32, #tpu.memory_space<vmem>>, vector<8x128xf32>,
      %163 = arith.truncf %160 : vector<8x128xf32> to vector<8x128xbf16>
      %164 = arith.index_cast %c2_i32 : i32 to index
      %c0_83 = arith.constant 0 : index
      %c0_84 = arith.constant 0 : index
      %165 = vector.load %arg17[%164, %c0_83, %c0_84] : memref<16x8x128xbf16, #tpu.memory_space<vmem>>, vector<1x8x128xbf16>
      %166 = vector.shape_cast %165 : vector<1x8x128xbf16> to vector<8x128xbf16>
      %167 = vector.shape_cast %163 : vector<8x128xbf16> to vector<1x8x128xbf16>
      tpu.vector_store %arg17[%164, %c0_83, %c0_84], %167 {strides = array<i32>} : memref<16x8x128xbf16, #tpu.memory_space<vmem>>, vector<1x8x128xbf16>,
      %c3_i32 = arith.constant 3 : i32
      %c0_85 = arith.constant 0 : index
      %c0_86 = arith.constant 0 : index
      %168 = vector.load %arg14[%c0_85, %c0_86] : memref<8x128xf32, #tpu.memory_space<vmem>>, vector<8x128xf32>
      %c0_87 = arith.constant 0 : index
      %c0_88 = arith.constant 0 : index
      %169 = vector.load %arg15[%c0_87, %c0_88] : memref<8x128xf32, #tpu.memory_space<vmem>>, vector<8x128xf32>
      %170 = arith.index_cast %c3_i32 : i32 to index
      %c0_89 = arith.constant 0 : index
      %c0_90 = arith.constant 0 : index
      %171 = vector.load %arg16[%170, %c0_89, %c0_90] : memref<16x8x512xf32, #tpu.memory_space<vmem>>, vector<1x8x512xf32>
      %172 = vector.shape_cast %171 : vector<1x8x512xf32> to vector<8x512xf32>
      %173 = arith.truncf %168 : vector<8x128xf32> to vector<8x128xbf16>
      %c0_91 = arith.constant 0 : index
      %c0_92 = arith.constant 0 : index
      %174 = vector.load %arg5[%c0_91, %c0_92] : memref<128x512xbf16, #tpu.memory_space<vmem>>, vector<128x512xbf16>
      %cst_93 = arith.constant dense<0.000000e+00> : vector<8x512xf32>
      %175 = tpu.matmul %173, %174, %cst_93 {dimension_numbers = #tpu.dot_dimension_numbers<[1], [0], [0], [1], [0, 0, 1, 1], [], []>} : vector<8x128xbf16>, vector<128x512xbf16>, vector<8x512xf32> -> vector<8x512xf32>
      %176 = arith.addf %172, %175 : vector<8x512xf32>
      %177 = vector.extract_strided_slice %176 {offsets = [0, 0], sizes = [8, 128], strides = [1, 1]} : vector<8x512xf32> to vector<8x128xf32>
      %178 = arith.negf %177 : vector<8x128xf32>
      %179 = math.exp %178 : vector<8x128xf32>
      %cst_94 = arith.constant 1.000000e+00 : f32
      %180 = vector.broadcast %cst_94 : f32 to vector<8x128xf32>
      %181 = arith.addf %180, %179 : vector<8x128xf32>
      %182 = arith.divf %180, %181 : vector<8x128xf32>
      %183 = vector.extract_strided_slice %176 {offsets = [0, 128], sizes = [8, 128], strides = [1, 1]} : vector<8x512xf32> to vector<8x128xf32>
      %184 = arith.negf %183 : vector<8x128xf32>
      %185 = math.exp %184 : vector<8x128xf32>
      %cst_95 = arith.constant 1.000000e+00 : f32
      %186 = vector.broadcast %cst_95 : f32 to vector<8x128xf32>
      %187 = arith.addf %186, %185 : vector<8x128xf32>
      %188 = arith.divf %186, %187 : vector<8x128xf32>
      %189 = vector.extract_strided_slice %176 {offsets = [0, 256], sizes = [8, 128], strides = [1, 1]} : vector<8x512xf32> to vector<8x128xf32>
      %190 = math.tanh %189 : vector<8x128xf32>
      %191 = vector.extract_strided_slice %176 {offsets = [0, 384], sizes = [8, 128], strides = [1, 1]} : vector<8x512xf32> to vector<8x128xf32>
      %192 = arith.negf %191 : vector<8x128xf32>
      %193 = math.exp %192 : vector<8x128xf32>
      %cst_96 = arith.constant 1.000000e+00 : f32
      %194 = vector.broadcast %cst_96 : f32 to vector<8x128xf32>
      %195 = arith.addf %194, %193 : vector<8x128xf32>
      %196 = arith.divf %194, %195 : vector<8x128xf32>
      %197 = arith.mulf %188, %169 : vector<8x128xf32>
      %198 = arith.mulf %182, %190 : vector<8x128xf32>
      %199 = arith.addf %197, %198 : vector<8x128xf32>
      %200 = math.tanh %199 : vector<8x128xf32>
      %201 = arith.mulf %196, %200 : vector<8x128xf32>
      %c16_i32_97 = arith.constant 16 : i32
      %202 = arith.muli %arg1, %c16_i32_97 : i32
      %203 = arith.addi %202, %c3_i32 : i32
      %c20_i32_98 = arith.constant 20 : i32
      %204 = arith.cmpi slt, %203, %c20_i32_98 : i32
      %205 = arith.select %204, %199, %169 : vector<8x128xf32>
      %206 = arith.select %204, %201, %168 : vector<8x128xf32>
      %c0_99 = arith.constant 0 : index
      %c0_100 = arith.constant 0 : index
      %207 = vector.load %arg15[%c0_99, %c0_100] : memref<8x128xf32, #tpu.memory_space<vmem>>, vector<8x128xf32>
      tpu.vector_store %arg15[%c0_99, %c0_100], %205 {strides = array<i32>} : memref<8x128xf32, #tpu.memory_space<vmem>>, vector<8x128xf32>,
      %c0_101 = arith.constant 0 : index
      %c0_102 = arith.constant 0 : index
      %208 = vector.load %arg14[%c0_101, %c0_102] : memref<8x128xf32, #tpu.memory_space<vmem>>, vector<8x128xf32>
      tpu.vector_store %arg14[%c0_101, %c0_102], %206 {strides = array<i32>} : memref<8x128xf32, #tpu.memory_space<vmem>>, vector<8x128xf32>,
      %209 = arith.truncf %206 : vector<8x128xf32> to vector<8x128xbf16>
      %210 = arith.index_cast %c3_i32 : i32 to index
      %c0_103 = arith.constant 0 : index
      %c0_104 = arith.constant 0 : index
      %211 = vector.load %arg17[%210, %c0_103, %c0_104] : memref<16x8x128xbf16, #tpu.memory_space<vmem>>, vector<1x8x128xbf16>
      %212 = vector.shape_cast %211 : vector<1x8x128xbf16> to vector<8x128xbf16>
      %213 = vector.shape_cast %209 : vector<8x128xbf16> to vector<1x8x128xbf16>
      tpu.vector_store %arg17[%210, %c0_103, %c0_104], %213 {strides = array<i32>} : memref<16x8x128xbf16, #tpu.memory_space<vmem>>, vector<1x8x128xbf16>,
      %c4_i32 = arith.constant 4 : i32
      %c0_105 = arith.constant 0 : index
      %c0_106 = arith.constant 0 : index
      %214 = vector.load %arg14[%c0_105, %c0_106] : memref<8x128xf32, #tpu.memory_space<vmem>>, vector<8x128xf32>
      %c0_107 = arith.constant 0 : index
      %c0_108 = arith.constant 0 : index
      %215 = vector.load %arg15[%c0_107, %c0_108] : memref<8x128xf32, #tpu.memory_space<vmem>>, vector<8x128xf32>
      %216 = arith.index_cast %c4_i32 : i32 to index
      %c0_109 = arith.constant 0 : index
      %c0_110 = arith.constant 0 : index
      %217 = vector.load %arg16[%216, %c0_109, %c0_110] : memref<16x8x512xf32, #tpu.memory_space<vmem>>, vector<1x8x512xf32>
      %218 = vector.shape_cast %217 : vector<1x8x512xf32> to vector<8x512xf32>
      %219 = arith.truncf %214 : vector<8x128xf32> to vector<8x128xbf16>
      %c0_111 = arith.constant 0 : index
      %c0_112 = arith.constant 0 : index
      %220 = vector.load %arg5[%c0_111, %c0_112] : memref<128x512xbf16, #tpu.memory_space<vmem>>, vector<128x512xbf16>
      %cst_113 = arith.constant dense<0.000000e+00> : vector<8x512xf32>
      %221 = tpu.matmul %219, %220, %cst_113 {dimension_numbers = #tpu.dot_dimension_numbers<[1], [0], [0], [1], [0, 0, 1, 1], [], []>} : vector<8x128xbf16>, vector<128x512xbf16>, vector<8x512xf32> -> vector<8x512xf32>
      %222 = arith.addf %218, %221 : vector<8x512xf32>
      %223 = vector.extract_strided_slice %222 {offsets = [0, 0], sizes = [8, 128], strides = [1, 1]} : vector<8x512xf32> to vector<8x128xf32>
      %224 = arith.negf %223 : vector<8x128xf32>
      %225 = math.exp %224 : vector<8x128xf32>
      %cst_114 = arith.constant 1.000000e+00 : f32
      %226 = vector.broadcast %cst_114 : f32 to vector<8x128xf32>
      %227 = arith.addf %226, %225 : vector<8x128xf32>
      %228 = arith.divf %226, %227 : vector<8x128xf32>
      %229 = vector.extract_strided_slice %222 {offsets = [0, 128], sizes = [8, 128], strides = [1, 1]} : vector<8x512xf32> to vector<8x128xf32>
      %230 = arith.negf %229 : vector<8x128xf32>
      %231 = math.exp %230 : vector<8x128xf32>
      %cst_115 = arith.constant 1.000000e+00 : f32
      %232 = vector.broadcast %cst_115 : f32 to vector<8x128xf32>
      %233 = arith.addf %232, %231 : vector<8x128xf32>
      %234 = arith.divf %232, %233 : vector<8x128xf32>
      %235 = vector.extract_strided_slice %222 {offsets = [0, 256], sizes = [8, 128], strides = [1, 1]} : vector<8x512xf32> to vector<8x128xf32>
      %236 = math.tanh %235 : vector<8x128xf32>
      %237 = vector.extract_strided_slice %222 {offsets = [0, 384], sizes = [8, 128], strides = [1, 1]} : vector<8x512xf32> to vector<8x128xf32>
      %238 = arith.negf %237 : vector<8x128xf32>
      %239 = math.exp %238 : vector<8x128xf32>
      %cst_116 = arith.constant 1.000000e+00 : f32
      %240 = vector.broadcast %cst_116 : f32 to vector<8x128xf32>
      %241 = arith.addf %240, %239 : vector<8x128xf32>
      %242 = arith.divf %240, %241 : vector<8x128xf32>
      %243 = arith.mulf %234, %215 : vector<8x128xf32>
      %244 = arith.mulf %228, %236 : vector<8x128xf32>
      %245 = arith.addf %243, %244 : vector<8x128xf32>
      %246 = math.tanh %245 : vector<8x128xf32>
      %247 = arith.mulf %242, %246 : vector<8x128xf32>
      %c16_i32_117 = arith.constant 16 : i32
      %248 = arith.muli %arg1, %c16_i32_117 : i32
      %249 = arith.addi %248, %c4_i32 : i32
      %c20_i32_118 = arith.constant 20 : i32
      %250 = arith.cmpi slt, %249, %c20_i32_118 : i32
      %251 = arith.select %250, %245, %215 : vector<8x128xf32>
      %252 = arith.select %250, %247, %214 : vector<8x128xf32>
      %c0_119 = arith.constant 0 : index
      %c0_120 = arith.constant 0 : index
      %253 = vector.load %arg15[%c0_119, %c0_120] : memref<8x128xf32, #tpu.memory_space<vmem>>, vector<8x128xf32>
      tpu.vector_store %arg15[%c0_119, %c0_120], %251 {strides = array<i32>} : memref<8x128xf32, #tpu.memory_space<vmem>>, vector<8x128xf32>,
      %c0_121 = arith.constant 0 : index
      %c0_122 = arith.constant 0 : index
      %254 = vector.load %arg14[%c0_121, %c0_122] : memref<8x128xf32, #tpu.memory_space<vmem>>, vector<8x128xf32>
      tpu.vector_store %arg14[%c0_121, %c0_122], %252 {strides = array<i32>} : memref<8x128xf32, #tpu.memory_space<vmem>>, vector<8x128xf32>,
      %255 = arith.truncf %252 : vector<8x128xf32> to vector<8x128xbf16>
      %256 = arith.index_cast %c4_i32 : i32 to index
      %c0_123 = arith.constant 0 : index
      %c0_124 = arith.constant 0 : index
      %257 = vector.load %arg17[%256, %c0_123, %c0_124] : memref<16x8x128xbf16, #tpu.memory_space<vmem>>, vector<1x8x128xbf16>
      %258 = vector.shape_cast %257 : vector<1x8x128xbf16> to vector<8x128xbf16>
      %259 = vector.shape_cast %255 : vector<8x128xbf16> to vector<1x8x128xbf16>
      tpu.vector_store %arg17[%256, %c0_123, %c0_124], %259 {strides = array<i32>} : memref<16x8x128xbf16, #tpu.memory_space<vmem>>, vector<1x8x128xbf16>,
      %c5_i32 = arith.constant 5 : i32
      %c0_125 = arith.constant 0 : index
      %c0_126 = arith.constant 0 : index
      %260 = vector.load %arg14[%c0_125, %c0_126] : memref<8x128xf32, #tpu.memory_space<vmem>>, vector<8x128xf32>
      %c0_127 = arith.constant 0 : index
      %c0_128 = arith.constant 0 : index
      %261 = vector.load %arg15[%c0_127, %c0_128] : memref<8x128xf32, #tpu.memory_space<vmem>>, vector<8x128xf32>
      %262 = arith.index_cast %c5_i32 : i32 to index
      %c0_129 = arith.constant 0 : index
      %c0_130 = arith.constant 0 : index
      %263 = vector.load %arg16[%262, %c0_129, %c0_130] : memref<16x8x512xf32, #tpu.memory_space<vmem>>, vector<1x8x512xf32>
      %264 = vector.shape_cast %263 : vector<1x8x512xf32> to vector<8x512xf32>
      %265 = arith.truncf %260 : vector<8x128xf32> to vector<8x128xbf16>
      %c0_131 = arith.constant 0 : index
      %c0_132 = arith.constant 0 : index
      %266 = vector.load %arg5[%c0_131, %c0_132] : memref<128x512xbf16, #tpu.memory_space<vmem>>, vector<128x512xbf16>
      %cst_133 = arith.constant dense<0.000000e+00> : vector<8x512xf32>
      %267 = tpu.matmul %265, %266, %cst_133 {dimension_numbers = #tpu.dot_dimension_numbers<[1], [0], [0], [1], [0, 0, 1, 1], [], []>} : vector<8x128xbf16>, vector<128x512xbf16>, vector<8x512xf32> -> vector<8x512xf32>
      %268 = arith.addf %264, %267 : vector<8x512xf32>
      %269 = vector.extract_strided_slice %268 {offsets = [0, 0], sizes = [8, 128], strides = [1, 1]} : vector<8x512xf32> to vector<8x128xf32>
      %270 = arith.negf %269 : vector<8x128xf32>
      %271 = math.exp %270 : vector<8x128xf32>
      %cst_134 = arith.constant 1.000000e+00 : f32
      %272 = vector.broadcast %cst_134 : f32 to vector<8x128xf32>
      %273 = arith.addf %272, %271 : vector<8x128xf32>
      %274 = arith.divf %272, %273 : vector<8x128xf32>
      %275 = vector.extract_strided_slice %268 {offsets = [0, 128], sizes = [8, 128], strides = [1, 1]} : vector<8x512xf32> to vector<8x128xf32>
      %276 = arith.negf %275 : vector<8x128xf32>
      %277 = math.exp %276 : vector<8x128xf32>
      %cst_135 = arith.constant 1.000000e+00 : f32
      %278 = vector.broadcast %cst_135 : f32 to vector<8x128xf32>
      %279 = arith.addf %278, %277 : vector<8x128xf32>
      %280 = arith.divf %278, %279 : vector<8x128xf32>
      %281 = vector.extract_strided_slice %268 {offsets = [0, 256], sizes = [8, 128], strides = [1, 1]} : vector<8x512xf32> to vector<8x128xf32>
      %282 = math.tanh %281 : vector<8x128xf32>
      %283 = vector.extract_strided_slice %268 {offsets = [0, 384], sizes = [8, 128], strides = [1, 1]} : vector<8x512xf32> to vector<8x128xf32>
      %284 = arith.negf %283 : vector<8x128xf32>
      %285 = math.exp %284 : vector<8x128xf32>
      %cst_136 = arith.constant 1.000000e+00 : f32
      %286 = vector.broadcast %cst_136 : f32 to vector<8x128xf32>
      %287 = arith.addf %286, %285 : vector<8x128xf32>
      %288 = arith.divf %286, %287 : vector<8x128xf32>
      %289 = arith.mulf %280, %261 : vector<8x128xf32>
      %290 = arith.mulf %274, %282 : vector<8x128xf32>
      %291 = arith.addf %289, %290 : vector<8x128xf32>
      %292 = math.tanh %291 : vector<8x128xf32>
      %293 = arith.mulf %288, %292 : vector<8x128xf32>
      %c16_i32_137 = arith.constant 16 : i32
      %294 = arith.muli %arg1, %c16_i32_137 : i32
      %295 = arith.addi %294, %c5_i32 : i32
      %c20_i32_138 = arith.constant 20 : i32
      %296 = arith.cmpi slt, %295, %c20_i32_138 : i32
      %297 = arith.select %296, %291, %261 : vector<8x128xf32>
      %298 = arith.select %296, %293, %260 : vector<8x128xf32>
      %c0_139 = arith.constant 0 : index
      %c0_140 = arith.constant 0 : index
      %299 = vector.load %arg15[%c0_139, %c0_140] : memref<8x128xf32, #tpu.memory_space<vmem>>, vector<8x128xf32>
      tpu.vector_store %arg15[%c0_139, %c0_140], %297 {strides = array<i32>} : memref<8x128xf32, #tpu.memory_space<vmem>>, vector<8x128xf32>,
      %c0_141 = arith.constant 0 : index
      %c0_142 = arith.constant 0 : index
      %300 = vector.load %arg14[%c0_141, %c0_142] : memref<8x128xf32, #tpu.memory_space<vmem>>, vector<8x128xf32>
      tpu.vector_store %arg14[%c0_141, %c0_142], %298 {strides = array<i32>} : memref<8x128xf32, #tpu.memory_space<vmem>>, vector<8x128xf32>,
      %301 = arith.truncf %298 : vector<8x128xf32> to vector<8x128xbf16>
      %302 = arith.index_cast %c5_i32 : i32 to index
      %c0_143 = arith.constant 0 : index
      %c0_144 = arith.constant 0 : index
      %303 = vector.load %arg17[%302, %c0_143, %c0_144] : memref<16x8x128xbf16, #tpu.memory_space<vmem>>, vector<1x8x128xbf16>
      %304 = vector.shape_cast %303 : vector<1x8x128xbf16> to vector<8x128xbf16>
      %305 = vector.shape_cast %301 : vector<8x128xbf16> to vector<1x8x128xbf16>
      tpu.vector_store %arg17[%302, %c0_143, %c0_144], %305 {strides = array<i32>} : memref<16x8x128xbf16, #tpu.memory_space<vmem>>, vector<1x8x128xbf16>,
      %c6_i32 = arith.constant 6 : i32
      %c0_145 = arith.constant 0 : index
      %c0_146 = arith.constant 0 : index
      %306 = vector.load %arg14[%c0_145, %c0_146] : memref<8x128xf32, #tpu.memory_space<vmem>>, vector<8x128xf32>
      %c0_147 = arith.constant 0 : index
      %c0_148 = arith.constant 0 : index
      %307 = vector.load %arg15[%c0_147, %c0_148] : memref<8x128xf32, #tpu.memory_space<vmem>>, vector<8x128xf32>
      %308 = arith.index_cast %c6_i32 : i32 to index
      %c0_149 = arith.constant 0 : index
      %c0_150 = arith.constant 0 : index
      %309 = vector.load %arg16[%308, %c0_149, %c0_150] : memref<16x8x512xf32, #tpu.memory_space<vmem>>, vector<1x8x512xf32>
      %310 = vector.shape_cast %309 : vector<1x8x512xf32> to vector<8x512xf32>
      %311 = arith.truncf %306 : vector<8x128xf32> to vector<8x128xbf16>
      %c0_151 = arith.constant 0 : index
      %c0_152 = arith.constant 0 : index
      %312 = vector.load %arg5[%c0_151, %c0_152] : memref<128x512xbf16, #tpu.memory_space<vmem>>, vector<128x512xbf16>
      %cst_153 = arith.constant dense<0.000000e+00> : vector<8x512xf32>
      %313 = tpu.matmul %311, %312, %cst_153 {dimension_numbers = #tpu.dot_dimension_numbers<[1], [0], [0], [1], [0, 0, 1, 1], [], []>} : vector<8x128xbf16>, vector<128x512xbf16>, vector<8x512xf32> -> vector<8x512xf32>
      %314 = arith.addf %310, %313 : vector<8x512xf32>
      %315 = vector.extract_strided_slice %314 {offsets = [0, 0], sizes = [8, 128], strides = [1, 1]} : vector<8x512xf32> to vector<8x128xf32>
      %316 = arith.negf %315 : vector<8x128xf32>
      %317 = math.exp %316 : vector<8x128xf32>
      %cst_154 = arith.constant 1.000000e+00 : f32
      %318 = vector.broadcast %cst_154 : f32 to vector<8x128xf32>
      %319 = arith.addf %318, %317 : vector<8x128xf32>
      %320 = arith.divf %318, %319 : vector<8x128xf32>
      %321 = vector.extract_strided_slice %314 {offsets = [0, 128], sizes = [8, 128], strides = [1, 1]} : vector<8x512xf32> to vector<8x128xf32>
      %322 = arith.negf %321 : vector<8x128xf32>
      %323 = math.exp %322 : vector<8x128xf32>
      %cst_155 = arith.constant 1.000000e+00 : f32
      %324 = vector.broadcast %cst_155 : f32 to vector<8x128xf32>
      %325 = arith.addf %324, %323 : vector<8x128xf32>
      %326 = arith.divf %324, %325 : vector<8x128xf32>
      %327 = vector.extract_strided_slice %314 {offsets = [0, 256], sizes = [8, 128], strides = [1, 1]} : vector<8x512xf32> to vector<8x128xf32>
      %328 = math.tanh %327 : vector<8x128xf32>
      %329 = vector.extract_strided_slice %314 {offsets = [0, 384], sizes = [8, 128], strides = [1, 1]} : vector<8x512xf32> to vector<8x128xf32>
      %330 = arith.negf %329 : vector<8x128xf32>
      %331 = math.exp %330 : vector<8x128xf32>
      %cst_156 = arith.constant 1.000000e+00 : f32
      %332 = vector.broadcast %cst_156 : f32 to vector<8x128xf32>
      %333 = arith.addf %332, %331 : vector<8x128xf32>
      %334 = arith.divf %332, %333 : vector<8x128xf32>
      %335 = arith.mulf %326, %307 : vector<8x128xf32>
      %336 = arith.mulf %320, %328 : vector<8x128xf32>
      %337 = arith.addf %335, %336 : vector<8x128xf32>
      %338 = math.tanh %337 : vector<8x128xf32>
      %339 = arith.mulf %334, %338 : vector<8x128xf32>
      %c16_i32_157 = arith.constant 16 : i32
      %340 = arith.muli %arg1, %c16_i32_157 : i32
      %341 = arith.addi %340, %c6_i32 : i32
      %c20_i32_158 = arith.constant 20 : i32
      %342 = arith.cmpi slt, %341, %c20_i32_158 : i32
      %343 = arith.select %342, %337, %307 : vector<8x128xf32>
      %344 = arith.select %342, %339, %306 : vector<8x128xf32>
      %c0_159 = arith.constant 0 : index
      %c0_160 = arith.constant 0 : index
      %345 = vector.load %arg15[%c0_159, %c0_160] : memref<8x128xf32, #tpu.memory_space<vmem>>, vector<8x128xf32>
      tpu.vector_store %arg15[%c0_159, %c0_160], %343 {strides = array<i32>} : memref<8x128xf32, #tpu.memory_space<vmem>>, vector<8x128xf32>,
      %c0_161 = arith.constant 0 : index
      %c0_162 = arith.constant 0 : index
      %346 = vector.load %arg14[%c0_161, %c0_162] : memref<8x128xf32, #tpu.memory_space<vmem>>, vector<8x128xf32>
      tpu.vector_store %arg14[%c0_161, %c0_162], %344 {strides = array<i32>} : memref<8x128xf32, #tpu.memory_space<vmem>>, vector<8x128xf32>,
      %347 = arith.truncf %344 : vector<8x128xf32> to vector<8x128xbf16>
      %348 = arith.index_cast %c6_i32 : i32 to index
      %c0_163 = arith.constant 0 : index
      %c0_164 = arith.constant 0 : index
      %349 = vector.load %arg17[%348, %c0_163, %c0_164] : memref<16x8x128xbf16, #tpu.memory_space<vmem>>, vector<1x8x128xbf16>
      %350 = vector.shape_cast %349 : vector<1x8x128xbf16> to vector<8x128xbf16>
      %351 = vector.shape_cast %347 : vector<8x128xbf16> to vector<1x8x128xbf16>
      tpu.vector_store %arg17[%348, %c0_163, %c0_164], %351 {strides = array<i32>} : memref<16x8x128xbf16, #tpu.memory_space<vmem>>, vector<1x8x128xbf16>,
      %c7_i32 = arith.constant 7 : i32
      %c0_165 = arith.constant 0 : index
      %c0_166 = arith.constant 0 : index
      %352 = vector.load %arg14[%c0_165, %c0_166] : memref<8x128xf32, #tpu.memory_space<vmem>>, vector<8x128xf32>
      %c0_167 = arith.constant 0 : index
      %c0_168 = arith.constant 0 : index
      %353 = vector.load %arg15[%c0_167, %c0_168] : memref<8x128xf32, #tpu.memory_space<vmem>>, vector<8x128xf32>
      %354 = arith.index_cast %c7_i32 : i32 to index
      %c0_169 = arith.constant 0 : index
      %c0_170 = arith.constant 0 : index
      %355 = vector.load %arg16[%354, %c0_169, %c0_170] : memref<16x8x512xf32, #tpu.memory_space<vmem>>, vector<1x8x512xf32>
      %356 = vector.shape_cast %355 : vector<1x8x512xf32> to vector<8x512xf32>
      %357 = arith.truncf %352 : vector<8x128xf32> to vector<8x128xbf16>
      %c0_171 = arith.constant 0 : index
      %c0_172 = arith.constant 0 : index
      %358 = vector.load %arg5[%c0_171, %c0_172] : memref<128x512xbf16, #tpu.memory_space<vmem>>, vector<128x512xbf16>
      %cst_173 = arith.constant dense<0.000000e+00> : vector<8x512xf32>
      %359 = tpu.matmul %357, %358, %cst_173 {dimension_numbers = #tpu.dot_dimension_numbers<[1], [0], [0], [1], [0, 0, 1, 1], [], []>} : vector<8x128xbf16>, vector<128x512xbf16>, vector<8x512xf32> -> vector<8x512xf32>
      %360 = arith.addf %356, %359 : vector<8x512xf32>
      %361 = vector.extract_strided_slice %360 {offsets = [0, 0], sizes = [8, 128], strides = [1, 1]} : vector<8x512xf32> to vector<8x128xf32>
      %362 = arith.negf %361 : vector<8x128xf32>
      %363 = math.exp %362 : vector<8x128xf32>
      %cst_174 = arith.constant 1.000000e+00 : f32
      %364 = vector.broadcast %cst_174 : f32 to vector<8x128xf32>
      %365 = arith.addf %364, %363 : vector<8x128xf32>
      %366 = arith.divf %364, %365 : vector<8x128xf32>
      %367 = vector.extract_strided_slice %360 {offsets = [0, 128], sizes = [8, 128], strides = [1, 1]} : vector<8x512xf32> to vector<8x128xf32>
      %368 = arith.negf %367 : vector<8x128xf32>
      %369 = math.exp %368 : vector<8x128xf32>
      %cst_175 = arith.constant 1.000000e+00 : f32
      %370 = vector.broadcast %cst_175 : f32 to vector<8x128xf32>
      %371 = arith.addf %370, %369 : vector<8x128xf32>
      %372 = arith.divf %370, %371 : vector<8x128xf32>
      %373 = vector.extract_strided_slice %360 {offsets = [0, 256], sizes = [8, 128], strides = [1, 1]} : vector<8x512xf32> to vector<8x128xf32>
      %374 = math.tanh %373 : vector<8x128xf32>
      %375 = vector.extract_strided_slice %360 {offsets = [0, 384], sizes = [8, 128], strides = [1, 1]} : vector<8x512xf32> to vector<8x128xf32>
      %376 = arith.negf %375 : vector<8x128xf32>
      %377 = math.exp %376 : vector<8x128xf32>
      %cst_176 = arith.constant 1.000000e+00 : f32
      %378 = vector.broadcast %cst_176 : f32 to vector<8x128xf32>
      %379 = arith.addf %378, %377 : vector<8x128xf32>
      %380 = arith.divf %378, %379 : vector<8x128xf32>
      %381 = arith.mulf %372, %353 : vector<8x128xf32>
      %382 = arith.mulf %366, %374 : vector<8x128xf32>
      %383 = arith.addf %381, %382 : vector<8x128xf32>
      %384 = math.tanh %383 : vector<8x128xf32>
      %385 = arith.mulf %380, %384 : vector<8x128xf32>
      %c16_i32_177 = arith.constant 16 : i32
      %386 = arith.muli %arg1, %c16_i32_177 : i32
      %387 = arith.addi %386, %c7_i32 : i32
      %c20_i32_178 = arith.constant 20 : i32
      %388 = arith.cmpi slt, %387, %c20_i32_178 : i32
      %389 = arith.select %388, %383, %353 : vector<8x128xf32>
      %390 = arith.select %388, %385, %352 : vector<8x128xf32>
      %c0_179 = arith.constant 0 : index
      %c0_180 = arith.constant 0 : index
      %391 = vector.load %arg15[%c0_179, %c0_180] : memref<8x128xf32, #tpu.memory_space<vmem>>, vector<8x128xf32>
      tpu.vector_store %arg15[%c0_179, %c0_180], %389 {strides = array<i32>} : memref<8x128xf32, #tpu.memory_space<vmem>>, vector<8x128xf32>,
      %c0_181 = arith.constant 0 : index
      %c0_182 = arith.constant 0 : index
      %392 = vector.load %arg14[%c0_181, %c0_182] : memref<8x128xf32, #tpu.memory_space<vmem>>, vector<8x128xf32>
      tpu.vector_store %arg14[%c0_181, %c0_182], %390 {strides = array<i32>} : memref<8x128xf32, #tpu.memory_space<vmem>>, vector<8x128xf32>,
      %393 = arith.truncf %390 : vector<8x128xf32> to vector<8x128xbf16>
      %394 = arith.index_cast %c7_i32 : i32 to index
      %c0_183 = arith.constant 0 : index
      %c0_184 = arith.constant 0 : index
      %395 = vector.load %arg17[%394, %c0_183, %c0_184] : memref<16x8x128xbf16, #tpu.memory_space<vmem>>, vector<1x8x128xbf16>
      %396 = vector.shape_cast %395 : vector<1x8x128xbf16> to vector<8x128xbf16>
      %397 = vector.shape_cast %393 : vector<8x128xbf16> to vector<1x8x128xbf16>
      tpu.vector_store %arg17[%394, %c0_183, %c0_184], %397 {strides = array<i32>} : memref<16x8x128xbf16, #tpu.memory_space<vmem>>, vector<1x8x128xbf16>,
      %c8_i32 = arith.constant 8 : i32
      %c0_185 = arith.constant 0 : index
      %c0_186 = arith.constant 0 : index
      %398 = vector.load %arg14[%c0_185, %c0_186] : memref<8x128xf32, #tpu.memory_space<vmem>>, vector<8x128xf32>
      %c0_187 = arith.constant 0 : index
      %c0_188 = arith.constant 0 : index
      %399 = vector.load %arg15[%c0_187, %c0_188] : memref<8x128xf32, #tpu.memory_space<vmem>>, vector<8x128xf32>
      %400 = arith.index_cast %c8_i32 : i32 to index
      %c0_189 = arith.constant 0 : index
      %c0_190 = arith.constant 0 : index
      %401 = vector.load %arg16[%400, %c0_189, %c0_190] : memref<16x8x512xf32, #tpu.memory_space<vmem>>, vector<1x8x512xf32>
      %402 = vector.shape_cast %401 : vector<1x8x512xf32> to vector<8x512xf32>
      %403 = arith.truncf %398 : vector<8x128xf32> to vector<8x128xbf16>
      %c0_191 = arith.constant 0 : index
      %c0_192 = arith.constant 0 : index
      %404 = vector.load %arg5[%c0_191, %c0_192] : memref<128x512xbf16, #tpu.memory_space<vmem>>, vector<128x512xbf16>
      %cst_193 = arith.constant dense<0.000000e+00> : vector<8x512xf32>
      %405 = tpu.matmul %403, %404, %cst_193 {dimension_numbers = #tpu.dot_dimension_numbers<[1], [0], [0], [1], [0, 0, 1, 1], [], []>} : vector<8x128xbf16>, vector<128x512xbf16>, vector<8x512xf32> -> vector<8x512xf32>
      %406 = arith.addf %402, %405 : vector<8x512xf32>
      %407 = vector.extract_strided_slice %406 {offsets = [0, 0], sizes = [8, 128], strides = [1, 1]} : vector<8x512xf32> to vector<8x128xf32>
      %408 = arith.negf %407 : vector<8x128xf32>
      %409 = math.exp %408 : vector<8x128xf32>
      %cst_194 = arith.constant 1.000000e+00 : f32
      %410 = vector.broadcast %cst_194 : f32 to vector<8x128xf32>
      %411 = arith.addf %410, %409 : vector<8x128xf32>
      %412 = arith.divf %410, %411 : vector<8x128xf32>
      %413 = vector.extract_strided_slice %406 {offsets = [0, 128], sizes = [8, 128], strides = [1, 1]} : vector<8x512xf32> to vector<8x128xf32>
      %414 = arith.negf %413 : vector<8x128xf32>
      %415 = math.exp %414 : vector<8x128xf32>
      %cst_195 = arith.constant 1.000000e+00 : f32
      %416 = vector.broadcast %cst_195 : f32 to vector<8x128xf32>
      %417 = arith.addf %416, %415 : vector<8x128xf32>
      %418 = arith.divf %416, %417 : vector<8x128xf32>
      %419 = vector.extract_strided_slice %406 {offsets = [0, 256], sizes = [8, 128], strides = [1, 1]} : vector<8x512xf32> to vector<8x128xf32>
      %420 = math.tanh %419 : vector<8x128xf32>
      %421 = vector.extract_strided_slice %406 {offsets = [0, 384], sizes = [8, 128], strides = [1, 1]} : vector<8x512xf32> to vector<8x128xf32>
      %422 = arith.negf %421 : vector<8x128xf32>
      %423 = math.exp %422 : vector<8x128xf32>
      %cst_196 = arith.constant 1.000000e+00 : f32
      %424 = vector.broadcast %cst_196 : f32 to vector<8x128xf32>
      %425 = arith.addf %424, %423 : vector<8x128xf32>
      %426 = arith.divf %424, %425 : vector<8x128xf32>
      %427 = arith.mulf %418, %399 : vector<8x128xf32>
      %428 = arith.mulf %412, %420 : vector<8x128xf32>
      %429 = arith.addf %427, %428 : vector<8x128xf32>
      %430 = math.tanh %429 : vector<8x128xf32>
      %431 = arith.mulf %426, %430 : vector<8x128xf32>
      %c16_i32_197 = arith.constant 16 : i32
      %432 = arith.muli %arg1, %c16_i32_197 : i32
      %433 = arith.addi %432, %c8_i32 : i32
      %c20_i32_198 = arith.constant 20 : i32
      %434 = arith.cmpi slt, %433, %c20_i32_198 : i32
      %435 = arith.select %434, %429, %399 : vector<8x128xf32>
      %436 = arith.select %434, %431, %398 : vector<8x128xf32>
      %c0_199 = arith.constant 0 : index
      %c0_200 = arith.constant 0 : index
      %437 = vector.load %arg15[%c0_199, %c0_200] : memref<8x128xf32, #tpu.memory_space<vmem>>, vector<8x128xf32>
      tpu.vector_store %arg15[%c0_199, %c0_200], %435 {strides = array<i32>} : memref<8x128xf32, #tpu.memory_space<vmem>>, vector<8x128xf32>,
      %c0_201 = arith.constant 0 : index
      %c0_202 = arith.constant 0 : index
      %438 = vector.load %arg14[%c0_201, %c0_202] : memref<8x128xf32, #tpu.memory_space<vmem>>, vector<8x128xf32>
      tpu.vector_store %arg14[%c0_201, %c0_202], %436 {strides = array<i32>} : memref<8x128xf32, #tpu.memory_space<vmem>>, vector<8x128xf32>,
      %439 = arith.truncf %436 : vector<8x128xf32> to vector<8x128xbf16>
      %440 = arith.index_cast %c8_i32 : i32 to index
      %c0_203 = arith.constant 0 : index
      %c0_204 = arith.constant 0 : index
      %441 = vector.load %arg17[%440, %c0_203, %c0_204] : memref<16x8x128xbf16, #tpu.memory_space<vmem>>, vector<1x8x128xbf16>
      %442 = vector.shape_cast %441 : vector<1x8x128xbf16> to vector<8x128xbf16>
      %443 = vector.shape_cast %439 : vector<8x128xbf16> to vector<1x8x128xbf16>
      tpu.vector_store %arg17[%440, %c0_203, %c0_204], %443 {strides = array<i32>} : memref<16x8x128xbf16, #tpu.memory_space<vmem>>, vector<1x8x128xbf16>,
      %c9_i32 = arith.constant 9 : i32
      %c0_205 = arith.constant 0 : index
      %c0_206 = arith.constant 0 : index
      %444 = vector.load %arg14[%c0_205, %c0_206] : memref<8x128xf32, #tpu.memory_space<vmem>>, vector<8x128xf32>
      %c0_207 = arith.constant 0 : index
      %c0_208 = arith.constant 0 : index
      %445 = vector.load %arg15[%c0_207, %c0_208] : memref<8x128xf32, #tpu.memory_space<vmem>>, vector<8x128xf32>
      %446 = arith.index_cast %c9_i32 : i32 to index
      %c0_209 = arith.constant 0 : index
      %c0_210 = arith.constant 0 : index
      %447 = vector.load %arg16[%446, %c0_209, %c0_210] : memref<16x8x512xf32, #tpu.memory_space<vmem>>, vector<1x8x512xf32>
      %448 = vector.shape_cast %447 : vector<1x8x512xf32> to vector<8x512xf32>
      %449 = arith.truncf %444 : vector<8x128xf32> to vector<8x128xbf16>
      %c0_211 = arith.constant 0 : index
      %c0_212 = arith.constant 0 : index
      %450 = vector.load %arg5[%c0_211, %c0_212] : memref<128x512xbf16, #tpu.memory_space<vmem>>, vector<128x512xbf16>
      %cst_213 = arith.constant dense<0.000000e+00> : vector<8x512xf32>
      %451 = tpu.matmul %449, %450, %cst_213 {dimension_numbers = #tpu.dot_dimension_numbers<[1], [0], [0], [1], [0, 0, 1, 1], [], []>} : vector<8x128xbf16>, vector<128x512xbf16>, vector<8x512xf32> -> vector<8x512xf32>
      %452 = arith.addf %448, %451 : vector<8x512xf32>
      %453 = vector.extract_strided_slice %452 {offsets = [0, 0], sizes = [8, 128], strides = [1, 1]} : vector<8x512xf32> to vector<8x128xf32>
      %454 = arith.negf %453 : vector<8x128xf32>
      %455 = math.exp %454 : vector<8x128xf32>
      %cst_214 = arith.constant 1.000000e+00 : f32
      %456 = vector.broadcast %cst_214 : f32 to vector<8x128xf32>
      %457 = arith.addf %456, %455 : vector<8x128xf32>
      %458 = arith.divf %456, %457 : vector<8x128xf32>
      %459 = vector.extract_strided_slice %452 {offsets = [0, 128], sizes = [8, 128], strides = [1, 1]} : vector<8x512xf32> to vector<8x128xf32>
      %460 = arith.negf %459 : vector<8x128xf32>
      %461 = math.exp %460 : vector<8x128xf32>
      %cst_215 = arith.constant 1.000000e+00 : f32
      %462 = vector.broadcast %cst_215 : f32 to vector<8x128xf32>
      %463 = arith.addf %462, %461 : vector<8x128xf32>
      %464 = arith.divf %462, %463 : vector<8x128xf32>
      %465 = vector.extract_strided_slice %452 {offsets = [0, 256], sizes = [8, 128], strides = [1, 1]} : vector<8x512xf32> to vector<8x128xf32>
      %466 = math.tanh %465 : vector<8x128xf32>
      %467 = vector.extract_strided_slice %452 {offsets = [0, 384], sizes = [8, 128], strides = [1, 1]} : vector<8x512xf32> to vector<8x128xf32>
      %468 = arith.negf %467 : vector<8x128xf32>
      %469 = math.exp %468 : vector<8x128xf32>
      %cst_216 = arith.constant 1.000000e+00 : f32
      %470 = vector.broadcast %cst_216 : f32 to vector<8x128xf32>
      %471 = arith.addf %470, %469 : vector<8x128xf32>
      %472 = arith.divf %470, %471 : vector<8x128xf32>
      %473 = arith.mulf %464, %445 : vector<8x128xf32>
      %474 = arith.mulf %458, %466 : vector<8x128xf32>
      %475 = arith.addf %473, %474 : vector<8x128xf32>
      %476 = math.tanh %475 : vector<8x128xf32>
      %477 = arith.mulf %472, %476 : vector<8x128xf32>
      %c16_i32_217 = arith.constant 16 : i32
      %478 = arith.muli %arg1, %c16_i32_217 : i32
      %479 = arith.addi %478, %c9_i32 : i32
      %c20_i32_218 = arith.constant 20 : i32
      %480 = arith.cmpi slt, %479, %c20_i32_218 : i32
      %481 = arith.select %480, %475, %445 : vector<8x128xf32>
      %482 = arith.select %480, %477, %444 : vector<8x128xf32>
      %c0_219 = arith.constant 0 : index
      %c0_220 = arith.constant 0 : index
      %483 = vector.load %arg15[%c0_219, %c0_220] : memref<8x128xf32, #tpu.memory_space<vmem>>, vector<8x128xf32>
      tpu.vector_store %arg15[%c0_219, %c0_220], %481 {strides = array<i32>} : memref<8x128xf32, #tpu.memory_space<vmem>>, vector<8x128xf32>,
      %c0_221 = arith.constant 0 : index
      %c0_222 = arith.constant 0 : index
      %484 = vector.load %arg14[%c0_221, %c0_222] : memref<8x128xf32, #tpu.memory_space<vmem>>, vector<8x128xf32>
      tpu.vector_store %arg14[%c0_221, %c0_222], %482 {strides = array<i32>} : memref<8x128xf32, #tpu.memory_space<vmem>>, vector<8x128xf32>,
      %485 = arith.truncf %482 : vector<8x128xf32> to vector<8x128xbf16>
      %486 = arith.index_cast %c9_i32 : i32 to index
      %c0_223 = arith.constant 0 : index
      %c0_224 = arith.constant 0 : index
      %487 = vector.load %arg17[%486, %c0_223, %c0_224] : memref<16x8x128xbf16, #tpu.memory_space<vmem>>, vector<1x8x128xbf16>
      %488 = vector.shape_cast %487 : vector<1x8x128xbf16> to vector<8x128xbf16>
      %489 = vector.shape_cast %485 : vector<8x128xbf16> to vector<1x8x128xbf16>
      tpu.vector_store %arg17[%486, %c0_223, %c0_224], %489 {strides = array<i32>} : memref<16x8x128xbf16, #tpu.memory_space<vmem>>, vector<1x8x128xbf16>,
      %c10_i32 = arith.constant 10 : i32
      %c0_225 = arith.constant 0 : index
      %c0_226 = arith.constant 0 : index
      %490 = vector.load %arg14[%c0_225, %c0_226] : memref<8x128xf32, #tpu.memory_space<vmem>>, vector<8x128xf32>
      %c0_227 = arith.constant 0 : index
      %c0_228 = arith.constant 0 : index
      %491 = vector.load %arg15[%c0_227, %c0_228] : memref<8x128xf32, #tpu.memory_space<vmem>>, vector<8x128xf32>
      %492 = arith.index_cast %c10_i32 : i32 to index
      %c0_229 = arith.constant 0 : index
      %c0_230 = arith.constant 0 : index
      %493 = vector.load %arg16[%492, %c0_229, %c0_230] : memref<16x8x512xf32, #tpu.memory_space<vmem>>, vector<1x8x512xf32>
      %494 = vector.shape_cast %493 : vector<1x8x512xf32> to vector<8x512xf32>
      %495 = arith.truncf %490 : vector<8x128xf32> to vector<8x128xbf16>
      %c0_231 = arith.constant 0 : index
      %c0_232 = arith.constant 0 : index
      %496 = vector.load %arg5[%c0_231, %c0_232] : memref<128x512xbf16, #tpu.memory_space<vmem>>, vector<128x512xbf16>
      %cst_233 = arith.constant dense<0.000000e+00> : vector<8x512xf32>
      %497 = tpu.matmul %495, %496, %cst_233 {dimension_numbers = #tpu.dot_dimension_numbers<[1], [0], [0], [1], [0, 0, 1, 1], [], []>} : vector<8x128xbf16>, vector<128x512xbf16>, vector<8x512xf32> -> vector<8x512xf32>
      %498 = arith.addf %494, %497 : vector<8x512xf32>
      %499 = vector.extract_strided_slice %498 {offsets = [0, 0], sizes = [8, 128], strides = [1, 1]} : vector<8x512xf32> to vector<8x128xf32>
      %500 = arith.negf %499 : vector<8x128xf32>
      %501 = math.exp %500 : vector<8x128xf32>
      %cst_234 = arith.constant 1.000000e+00 : f32
      %502 = vector.broadcast %cst_234 : f32 to vector<8x128xf32>
      %503 = arith.addf %502, %501 : vector<8x128xf32>
      %504 = arith.divf %502, %503 : vector<8x128xf32>
      %505 = vector.extract_strided_slice %498 {offsets = [0, 128], sizes = [8, 128], strides = [1, 1]} : vector<8x512xf32> to vector<8x128xf32>
      %506 = arith.negf %505 : vector<8x128xf32>
      %507 = math.exp %506 : vector<8x128xf32>
      %cst_235 = arith.constant 1.000000e+00 : f32
      %508 = vector.broadcast %cst_235 : f32 to vector<8x128xf32>
      %509 = arith.addf %508, %507 : vector<8x128xf32>
      %510 = arith.divf %508, %509 : vector<8x128xf32>
      %511 = vector.extract_strided_slice %498 {offsets = [0, 256], sizes = [8, 128], strides = [1, 1]} : vector<8x512xf32> to vector<8x128xf32>
      %512 = math.tanh %511 : vector<8x128xf32>
      %513 = vector.extract_strided_slice %498 {offsets = [0, 384], sizes = [8, 128], strides = [1, 1]} : vector<8x512xf32> to vector<8x128xf32>
      %514 = arith.negf %513 : vector<8x128xf32>
      %515 = math.exp %514 : vector<8x128xf32>
      %cst_236 = arith.constant 1.000000e+00 : f32
      %516 = vector.broadcast %cst_236 : f32 to vector<8x128xf32>
      %517 = arith.addf %516, %515 : vector<8x128xf32>
      %518 = arith.divf %516, %517 : vector<8x128xf32>
      %519 = arith.mulf %510, %491 : vector<8x128xf32>
      %520 = arith.mulf %504, %512 : vector<8x128xf32>
      %521 = arith.addf %519, %520 : vector<8x128xf32>
      %522 = math.tanh %521 : vector<8x128xf32>
      %523 = arith.mulf %518, %522 : vector<8x128xf32>
      %c16_i32_237 = arith.constant 16 : i32
      %524 = arith.muli %arg1, %c16_i32_237 : i32
      %525 = arith.addi %524, %c10_i32 : i32
      %c20_i32_238 = arith.constant 20 : i32
      %526 = arith.cmpi slt, %525, %c20_i32_238 : i32
      %527 = arith.select %526, %521, %491 : vector<8x128xf32>
      %528 = arith.select %526, %523, %490 : vector<8x128xf32>
      %c0_239 = arith.constant 0 : index
      %c0_240 = arith.constant 0 : index
      %529 = vector.load %arg15[%c0_239, %c0_240] : memref<8x128xf32, #tpu.memory_space<vmem>>, vector<8x128xf32>
      tpu.vector_store %arg15[%c0_239, %c0_240], %527 {strides = array<i32>} : memref<8x128xf32, #tpu.memory_space<vmem>>, vector<8x128xf32>,
      %c0_241 = arith.constant 0 : index
      %c0_242 = arith.constant 0 : index
      %530 = vector.load %arg14[%c0_241, %c0_242] : memref<8x128xf32, #tpu.memory_space<vmem>>, vector<8x128xf32>
      tpu.vector_store %arg14[%c0_241, %c0_242], %528 {strides = array<i32>} : memref<8x128xf32, #tpu.memory_space<vmem>>, vector<8x128xf32>,
      %531 = arith.truncf %528 : vector<8x128xf32> to vector<8x128xbf16>
      %532 = arith.index_cast %c10_i32 : i32 to index
      %c0_243 = arith.constant 0 : index
      %c0_244 = arith.constant 0 : index
      %533 = vector.load %arg17[%532, %c0_243, %c0_244] : memref<16x8x128xbf16, #tpu.memory_space<vmem>>, vector<1x8x128xbf16>
      %534 = vector.shape_cast %533 : vector<1x8x128xbf16> to vector<8x128xbf16>
      %535 = vector.shape_cast %531 : vector<8x128xbf16> to vector<1x8x128xbf16>
      tpu.vector_store %arg17[%532, %c0_243, %c0_244], %535 {strides = array<i32>} : memref<16x8x128xbf16, #tpu.memory_space<vmem>>, vector<1x8x128xbf16>,
      %c11_i32 = arith.constant 11 : i32
      %c0_245 = arith.constant 0 : index
      %c0_246 = arith.constant 0 : index
      %536 = vector.load %arg14[%c0_245, %c0_246] : memref<8x128xf32, #tpu.memory_space<vmem>>, vector<8x128xf32>
      %c0_247 = arith.constant 0 : index
      %c0_248 = arith.constant 0 : index
      %537 = vector.load %arg15[%c0_247, %c0_248] : memref<8x128xf32, #tpu.memory_space<vmem>>, vector<8x128xf32>
      %538 = arith.index_cast %c11_i32 : i32 to index
      %c0_249 = arith.constant 0 : index
      %c0_250 = arith.constant 0 : index
      %539 = vector.load %arg16[%538, %c0_249, %c0_250] : memref<16x8x512xf32, #tpu.memory_space<vmem>>, vector<1x8x512xf32>
      %540 = vector.shape_cast %539 : vector<1x8x512xf32> to vector<8x512xf32>
      %541 = arith.truncf %536 : vector<8x128xf32> to vector<8x128xbf16>
      %c0_251 = arith.constant 0 : index
      %c0_252 = arith.constant 0 : index
      %542 = vector.load %arg5[%c0_251, %c0_252] : memref<128x512xbf16, #tpu.memory_space<vmem>>, vector<128x512xbf16>
      %cst_253 = arith.constant dense<0.000000e+00> : vector<8x512xf32>
      %543 = tpu.matmul %541, %542, %cst_253 {dimension_numbers = #tpu.dot_dimension_numbers<[1], [0], [0], [1], [0, 0, 1, 1], [], []>} : vector<8x128xbf16>, vector<128x512xbf16>, vector<8x512xf32> -> vector<8x512xf32>
      %544 = arith.addf %540, %543 : vector<8x512xf32>
      %545 = vector.extract_strided_slice %544 {offsets = [0, 0], sizes = [8, 128], strides = [1, 1]} : vector<8x512xf32> to vector<8x128xf32>
      %546 = arith.negf %545 : vector<8x128xf32>
      %547 = math.exp %546 : vector<8x128xf32>
      %cst_254 = arith.constant 1.000000e+00 : f32
      %548 = vector.broadcast %cst_254 : f32 to vector<8x128xf32>
      %549 = arith.addf %548, %547 : vector<8x128xf32>
      %550 = arith.divf %548, %549 : vector<8x128xf32>
      %551 = vector.extract_strided_slice %544 {offsets = [0, 128], sizes = [8, 128], strides = [1, 1]} : vector<8x512xf32> to vector<8x128xf32>
      %552 = arith.negf %551 : vector<8x128xf32>
      %553 = math.exp %552 : vector<8x128xf32>
      %cst_255 = arith.constant 1.000000e+00 : f32
      %554 = vector.broadcast %cst_255 : f32 to vector<8x128xf32>
      %555 = arith.addf %554, %553 : vector<8x128xf32>
      %556 = arith.divf %554, %555 : vector<8x128xf32>
      %557 = vector.extract_strided_slice %544 {offsets = [0, 256], sizes = [8, 128], strides = [1, 1]} : vector<8x512xf32> to vector<8x128xf32>
      %558 = math.tanh %557 : vector<8x128xf32>
      %559 = vector.extract_strided_slice %544 {offsets = [0, 384], sizes = [8, 128], strides = [1, 1]} : vector<8x512xf32> to vector<8x128xf32>
      %560 = arith.negf %559 : vector<8x128xf32>
      %561 = math.exp %560 : vector<8x128xf32>
      %cst_256 = arith.constant 1.000000e+00 : f32
      %562 = vector.broadcast %cst_256 : f32 to vector<8x128xf32>
      %563 = arith.addf %562, %561 : vector<8x128xf32>
      %564 = arith.divf %562, %563 : vector<8x128xf32>
      %565 = arith.mulf %556, %537 : vector<8x128xf32>
      %566 = arith.mulf %550, %558 : vector<8x128xf32>
      %567 = arith.addf %565, %566 : vector<8x128xf32>
      %568 = math.tanh %567 : vector<8x128xf32>
      %569 = arith.mulf %564, %568 : vector<8x128xf32>
      %c16_i32_257 = arith.constant 16 : i32
      %570 = arith.muli %arg1, %c16_i32_257 : i32
      %571 = arith.addi %570, %c11_i32 : i32
      %c20_i32_258 = arith.constant 20 : i32
      %572 = arith.cmpi slt, %571, %c20_i32_258 : i32
      %573 = arith.select %572, %567, %537 : vector<8x128xf32>
      %574 = arith.select %572, %569, %536 : vector<8x128xf32>
      %c0_259 = arith.constant 0 : index
      %c0_260 = arith.constant 0 : index
      %575 = vector.load %arg15[%c0_259, %c0_260] : memref<8x128xf32, #tpu.memory_space<vmem>>, vector<8x128xf32>
      tpu.vector_store %arg15[%c0_259, %c0_260], %573 {strides = array<i32>} : memref<8x128xf32, #tpu.memory_space<vmem>>, vector<8x128xf32>,
      %c0_261 = arith.constant 0 : index
      %c0_262 = arith.constant 0 : index
      %576 = vector.load %arg14[%c0_261, %c0_262] : memref<8x128xf32, #tpu.memory_space<vmem>>, vector<8x128xf32>
      tpu.vector_store %arg14[%c0_261, %c0_262], %574 {strides = array<i32>} : memref<8x128xf32, #tpu.memory_space<vmem>>, vector<8x128xf32>,
      %577 = arith.truncf %574 : vector<8x128xf32> to vector<8x128xbf16>
      %578 = arith.index_cast %c11_i32 : i32 to index
      %c0_263 = arith.constant 0 : index
      %c0_264 = arith.constant 0 : index
      %579 = vector.load %arg17[%578, %c0_263, %c0_264] : memref<16x8x128xbf16, #tpu.memory_space<vmem>>, vector<1x8x128xbf16>
      %580 = vector.shape_cast %579 : vector<1x8x128xbf16> to vector<8x128xbf16>
      %581 = vector.shape_cast %577 : vector<8x128xbf16> to vector<1x8x128xbf16>
      tpu.vector_store %arg17[%578, %c0_263, %c0_264], %581 {strides = array<i32>} : memref<16x8x128xbf16, #tpu.memory_space<vmem>>, vector<1x8x128xbf16>,
      %c12_i32 = arith.constant 12 : i32
      %c0_265 = arith.constant 0 : index
      %c0_266 = arith.constant 0 : index
      %582 = vector.load %arg14[%c0_265, %c0_266] : memref<8x128xf32, #tpu.memory_space<vmem>>, vector<8x128xf32>
      %c0_267 = arith.constant 0 : index
      %c0_268 = arith.constant 0 : index
      %583 = vector.load %arg15[%c0_267, %c0_268] : memref<8x128xf32, #tpu.memory_space<vmem>>, vector<8x128xf32>
      %584 = arith.index_cast %c12_i32 : i32 to index
      %c0_269 = arith.constant 0 : index
      %c0_270 = arith.constant 0 : index
      %585 = vector.load %arg16[%584, %c0_269, %c0_270] : memref<16x8x512xf32, #tpu.memory_space<vmem>>, vector<1x8x512xf32>
      %586 = vector.shape_cast %585 : vector<1x8x512xf32> to vector<8x512xf32>
      %587 = arith.truncf %582 : vector<8x128xf32> to vector<8x128xbf16>
      %c0_271 = arith.constant 0 : index
      %c0_272 = arith.constant 0 : index
      %588 = vector.load %arg5[%c0_271, %c0_272] : memref<128x512xbf16, #tpu.memory_space<vmem>>, vector<128x512xbf16>
      %cst_273 = arith.constant dense<0.000000e+00> : vector<8x512xf32>
      %589 = tpu.matmul %587, %588, %cst_273 {dimension_numbers = #tpu.dot_dimension_numbers<[1], [0], [0], [1], [0, 0, 1, 1], [], []>} : vector<8x128xbf16>, vector<128x512xbf16>, vector<8x512xf32> -> vector<8x512xf32>
      %590 = arith.addf %586, %589 : vector<8x512xf32>
      %591 = vector.extract_strided_slice %590 {offsets = [0, 0], sizes = [8, 128], strides = [1, 1]} : vector<8x512xf32> to vector<8x128xf32>
      %592 = arith.negf %591 : vector<8x128xf32>
      %593 = math.exp %592 : vector<8x128xf32>
      %cst_274 = arith.constant 1.000000e+00 : f32
      %594 = vector.broadcast %cst_274 : f32 to vector<8x128xf32>
      %595 = arith.addf %594, %593 : vector<8x128xf32>
      %596 = arith.divf %594, %595 : vector<8x128xf32>
      %597 = vector.extract_strided_slice %590 {offsets = [0, 128], sizes = [8, 128], strides = [1, 1]} : vector<8x512xf32> to vector<8x128xf32>
      %598 = arith.negf %597 : vector<8x128xf32>
      %599 = math.exp %598 : vector<8x128xf32>
      %cst_275 = arith.constant 1.000000e+00 : f32
      %600 = vector.broadcast %cst_275 : f32 to vector<8x128xf32>
      %601 = arith.addf %600, %599 : vector<8x128xf32>
      %602 = arith.divf %600, %601 : vector<8x128xf32>
      %603 = vector.extract_strided_slice %590 {offsets = [0, 256], sizes = [8, 128], strides = [1, 1]} : vector<8x512xf32> to vector<8x128xf32>
      %604 = math.tanh %603 : vector<8x128xf32>
      %605 = vector.extract_strided_slice %590 {offsets = [0, 384], sizes = [8, 128], strides = [1, 1]} : vector<8x512xf32> to vector<8x128xf32>
      %606 = arith.negf %605 : vector<8x128xf32>
      %607 = math.exp %606 : vector<8x128xf32>
      %cst_276 = arith.constant 1.000000e+00 : f32
      %608 = vector.broadcast %cst_276 : f32 to vector<8x128xf32>
      %609 = arith.addf %608, %607 : vector<8x128xf32>
      %610 = arith.divf %608, %609 : vector<8x128xf32>
      %611 = arith.mulf %602, %583 : vector<8x128xf32>
      %612 = arith.mulf %596, %604 : vector<8x128xf32>
      %613 = arith.addf %611, %612 : vector<8x128xf32>
      %614 = math.tanh %613 : vector<8x128xf32>
      %615 = arith.mulf %610, %614 : vector<8x128xf32>
      %c16_i32_277 = arith.constant 16 : i32
      %616 = arith.muli %arg1, %c16_i32_277 : i32
      %617 = arith.addi %616, %c12_i32 : i32
      %c20_i32_278 = arith.constant 20 : i32
      %618 = arith.cmpi slt, %617, %c20_i32_278 : i32
      %619 = arith.select %618, %613, %583 : vector<8x128xf32>
      %620 = arith.select %618, %615, %582 : vector<8x128xf32>
      %c0_279 = arith.constant 0 : index
      %c0_280 = arith.constant 0 : index
      %621 = vector.load %arg15[%c0_279, %c0_280] : memref<8x128xf32, #tpu.memory_space<vmem>>, vector<8x128xf32>
      tpu.vector_store %arg15[%c0_279, %c0_280], %619 {strides = array<i32>} : memref<8x128xf32, #tpu.memory_space<vmem>>, vector<8x128xf32>,
      %c0_281 = arith.constant 0 : index
      %c0_282 = arith.constant 0 : index
      %622 = vector.load %arg14[%c0_281, %c0_282] : memref<8x128xf32, #tpu.memory_space<vmem>>, vector<8x128xf32>
      tpu.vector_store %arg14[%c0_281, %c0_282], %620 {strides = array<i32>} : memref<8x128xf32, #tpu.memory_space<vmem>>, vector<8x128xf32>,
      %623 = arith.truncf %620 : vector<8x128xf32> to vector<8x128xbf16>
      %624 = arith.index_cast %c12_i32 : i32 to index
      %c0_283 = arith.constant 0 : index
      %c0_284 = arith.constant 0 : index
      %625 = vector.load %arg17[%624, %c0_283, %c0_284] : memref<16x8x128xbf16, #tpu.memory_space<vmem>>, vector<1x8x128xbf16>
      %626 = vector.shape_cast %625 : vector<1x8x128xbf16> to vector<8x128xbf16>
      %627 = vector.shape_cast %623 : vector<8x128xbf16> to vector<1x8x128xbf16>
      tpu.vector_store %arg17[%624, %c0_283, %c0_284], %627 {strides = array<i32>} : memref<16x8x128xbf16, #tpu.memory_space<vmem>>, vector<1x8x128xbf16>,
      %c13_i32 = arith.constant 13 : i32
      %c0_285 = arith.constant 0 : index
      %c0_286 = arith.constant 0 : index
      %628 = vector.load %arg14[%c0_285, %c0_286] : memref<8x128xf32, #tpu.memory_space<vmem>>, vector<8x128xf32>
      %c0_287 = arith.constant 0 : index
      %c0_288 = arith.constant 0 : index
      %629 = vector.load %arg15[%c0_287, %c0_288] : memref<8x128xf32, #tpu.memory_space<vmem>>, vector<8x128xf32>
      %630 = arith.index_cast %c13_i32 : i32 to index
      %c0_289 = arith.constant 0 : index
      %c0_290 = arith.constant 0 : index
      %631 = vector.load %arg16[%630, %c0_289, %c0_290] : memref<16x8x512xf32, #tpu.memory_space<vmem>>, vector<1x8x512xf32>
      %632 = vector.shape_cast %631 : vector<1x8x512xf32> to vector<8x512xf32>
      %633 = arith.truncf %628 : vector<8x128xf32> to vector<8x128xbf16>
      %c0_291 = arith.constant 0 : index
      %c0_292 = arith.constant 0 : index
      %634 = vector.load %arg5[%c0_291, %c0_292] : memref<128x512xbf16, #tpu.memory_space<vmem>>, vector<128x512xbf16>
      %cst_293 = arith.constant dense<0.000000e+00> : vector<8x512xf32>
      %635 = tpu.matmul %633, %634, %cst_293 {dimension_numbers = #tpu.dot_dimension_numbers<[1], [0], [0], [1], [0, 0, 1, 1], [], []>} : vector<8x128xbf16>, vector<128x512xbf16>, vector<8x512xf32> -> vector<8x512xf32>
      %636 = arith.addf %632, %635 : vector<8x512xf32>
      %637 = vector.extract_strided_slice %636 {offsets = [0, 0], sizes = [8, 128], strides = [1, 1]} : vector<8x512xf32> to vector<8x128xf32>
      %638 = arith.negf %637 : vector<8x128xf32>
      %639 = math.exp %638 : vector<8x128xf32>
      %cst_294 = arith.constant 1.000000e+00 : f32
      %640 = vector.broadcast %cst_294 : f32 to vector<8x128xf32>
      %641 = arith.addf %640, %639 : vector<8x128xf32>
      %642 = arith.divf %640, %641 : vector<8x128xf32>
      %643 = vector.extract_strided_slice %636 {offsets = [0, 128], sizes = [8, 128], strides = [1, 1]} : vector<8x512xf32> to vector<8x128xf32>
      %644 = arith.negf %643 : vector<8x128xf32>
      %645 = math.exp %644 : vector<8x128xf32>
      %cst_295 = arith.constant 1.000000e+00 : f32
      %646 = vector.broadcast %cst_295 : f32 to vector<8x128xf32>
      %647 = arith.addf %646, %645 : vector<8x128xf32>
      %648 = arith.divf %646, %647 : vector<8x128xf32>
      %649 = vector.extract_strided_slice %636 {offsets = [0, 256], sizes = [8, 128], strides = [1, 1]} : vector<8x512xf32> to vector<8x128xf32>
      %650 = math.tanh %649 : vector<8x128xf32>
      %651 = vector.extract_strided_slice %636 {offsets = [0, 384], sizes = [8, 128], strides = [1, 1]} : vector<8x512xf32> to vector<8x128xf32>
      %652 = arith.negf %651 : vector<8x128xf32>
      %653 = math.exp %652 : vector<8x128xf32>
      %cst_296 = arith.constant 1.000000e+00 : f32
      %654 = vector.broadcast %cst_296 : f32 to vector<8x128xf32>
      %655 = arith.addf %654, %653 : vector<8x128xf32>
      %656 = arith.divf %654, %655 : vector<8x128xf32>
      %657 = arith.mulf %648, %629 : vector<8x128xf32>
      %658 = arith.mulf %642, %650 : vector<8x128xf32>
      %659 = arith.addf %657, %658 : vector<8x128xf32>
      %660 = math.tanh %659 : vector<8x128xf32>
      %661 = arith.mulf %656, %660 : vector<8x128xf32>
      %c16_i32_297 = arith.constant 16 : i32
      %662 = arith.muli %arg1, %c16_i32_297 : i32
      %663 = arith.addi %662, %c13_i32 : i32
      %c20_i32_298 = arith.constant 20 : i32
      %664 = arith.cmpi slt, %663, %c20_i32_298 : i32
      %665 = arith.select %664, %659, %629 : vector<8x128xf32>
      %666 = arith.select %664, %661, %628 : vector<8x128xf32>
      %c0_299 = arith.constant 0 : index
      %c0_300 = arith.constant 0 : index
      %667 = vector.load %arg15[%c0_299, %c0_300] : memref<8x128xf32, #tpu.memory_space<vmem>>, vector<8x128xf32>
      tpu.vector_store %arg15[%c0_299, %c0_300], %665 {strides = array<i32>} : memref<8x128xf32, #tpu.memory_space<vmem>>, vector<8x128xf32>,
      %c0_301 = arith.constant 0 : index
      %c0_302 = arith.constant 0 : index
      %668 = vector.load %arg14[%c0_301, %c0_302] : memref<8x128xf32, #tpu.memory_space<vmem>>, vector<8x128xf32>
      tpu.vector_store %arg14[%c0_301, %c0_302], %666 {strides = array<i32>} : memref<8x128xf32, #tpu.memory_space<vmem>>, vector<8x128xf32>,
      %669 = arith.truncf %666 : vector<8x128xf32> to vector<8x128xbf16>
      %670 = arith.index_cast %c13_i32 : i32 to index
      %c0_303 = arith.constant 0 : index
      %c0_304 = arith.constant 0 : index
      %671 = vector.load %arg17[%670, %c0_303, %c0_304] : memref<16x8x128xbf16, #tpu.memory_space<vmem>>, vector<1x8x128xbf16>
      %672 = vector.shape_cast %671 : vector<1x8x128xbf16> to vector<8x128xbf16>
      %673 = vector.shape_cast %669 : vector<8x128xbf16> to vector<1x8x128xbf16>
      tpu.vector_store %arg17[%670, %c0_303, %c0_304], %673 {strides = array<i32>} : memref<16x8x128xbf16, #tpu.memory_space<vmem>>, vector<1x8x128xbf16>,
      %c14_i32 = arith.constant 14 : i32
      %c0_305 = arith.constant 0 : index
      %c0_306 = arith.constant 0 : index
      %674 = vector.load %arg14[%c0_305, %c0_306] : memref<8x128xf32, #tpu.memory_space<vmem>>, vector<8x128xf32>
      %c0_307 = arith.constant 0 : index
      %c0_308 = arith.constant 0 : index
      %675 = vector.load %arg15[%c0_307, %c0_308] : memref<8x128xf32, #tpu.memory_space<vmem>>, vector<8x128xf32>
      %676 = arith.index_cast %c14_i32 : i32 to index
      %c0_309 = arith.constant 0 : index
      %c0_310 = arith.constant 0 : index
      %677 = vector.load %arg16[%676, %c0_309, %c0_310] : memref<16x8x512xf32, #tpu.memory_space<vmem>>, vector<1x8x512xf32>
      %678 = vector.shape_cast %677 : vector<1x8x512xf32> to vector<8x512xf32>
      %679 = arith.truncf %674 : vector<8x128xf32> to vector<8x128xbf16>
      %c0_311 = arith.constant 0 : index
      %c0_312 = arith.constant 0 : index
      %680 = vector.load %arg5[%c0_311, %c0_312] : memref<128x512xbf16, #tpu.memory_space<vmem>>, vector<128x512xbf16>
      %cst_313 = arith.constant dense<0.000000e+00> : vector<8x512xf32>
      %681 = tpu.matmul %679, %680, %cst_313 {dimension_numbers = #tpu.dot_dimension_numbers<[1], [0], [0], [1], [0, 0, 1, 1], [], []>} : vector<8x128xbf16>, vector<128x512xbf16>, vector<8x512xf32> -> vector<8x512xf32>
      %682 = arith.addf %678, %681 : vector<8x512xf32>
      %683 = vector.extract_strided_slice %682 {offsets = [0, 0], sizes = [8, 128], strides = [1, 1]} : vector<8x512xf32> to vector<8x128xf32>
      %684 = arith.negf %683 : vector<8x128xf32>
      %685 = math.exp %684 : vector<8x128xf32>
      %cst_314 = arith.constant 1.000000e+00 : f32
      %686 = vector.broadcast %cst_314 : f32 to vector<8x128xf32>
      %687 = arith.addf %686, %685 : vector<8x128xf32>
      %688 = arith.divf %686, %687 : vector<8x128xf32>
      %689 = vector.extract_strided_slice %682 {offsets = [0, 128], sizes = [8, 128], strides = [1, 1]} : vector<8x512xf32> to vector<8x128xf32>
      %690 = arith.negf %689 : vector<8x128xf32>
      %691 = math.exp %690 : vector<8x128xf32>
      %cst_315 = arith.constant 1.000000e+00 : f32
      %692 = vector.broadcast %cst_315 : f32 to vector<8x128xf32>
      %693 = arith.addf %692, %691 : vector<8x128xf32>
      %694 = arith.divf %692, %693 : vector<8x128xf32>
      %695 = vector.extract_strided_slice %682 {offsets = [0, 256], sizes = [8, 128], strides = [1, 1]} : vector<8x512xf32> to vector<8x128xf32>
      %696 = math.tanh %695 : vector<8x128xf32>
      %697 = vector.extract_strided_slice %682 {offsets = [0, 384], sizes = [8, 128], strides = [1, 1]} : vector<8x512xf32> to vector<8x128xf32>
      %698 = arith.negf %697 : vector<8x128xf32>
      %699 = math.exp %698 : vector<8x128xf32>
      %cst_316 = arith.constant 1.000000e+00 : f32
      %700 = vector.broadcast %cst_316 : f32 to vector<8x128xf32>
      %701 = arith.addf %700, %699 : vector<8x128xf32>
      %702 = arith.divf %700, %701 : vector<8x128xf32>
      %703 = arith.mulf %694, %675 : vector<8x128xf32>
      %704 = arith.mulf %688, %696 : vector<8x128xf32>
      %705 = arith.addf %703, %704 : vector<8x128xf32>
      %706 = math.tanh %705 : vector<8x128xf32>
      %707 = arith.mulf %702, %706 : vector<8x128xf32>
      %c16_i32_317 = arith.constant 16 : i32
      %708 = arith.muli %arg1, %c16_i32_317 : i32
      %709 = arith.addi %708, %c14_i32 : i32
      %c20_i32_318 = arith.constant 20 : i32
      %710 = arith.cmpi slt, %709, %c20_i32_318 : i32
      %711 = arith.select %710, %705, %675 : vector<8x128xf32>
      %712 = arith.select %710, %707, %674 : vector<8x128xf32>
      %c0_319 = arith.constant 0 : index
      %c0_320 = arith.constant 0 : index
      %713 = vector.load %arg15[%c0_319, %c0_320] : memref<8x128xf32, #tpu.memory_space<vmem>>, vector<8x128xf32>
      tpu.vector_store %arg15[%c0_319, %c0_320], %711 {strides = array<i32>} : memref<8x128xf32, #tpu.memory_space<vmem>>, vector<8x128xf32>,
      %c0_321 = arith.constant 0 : index
      %c0_322 = arith.constant 0 : index
      %714 = vector.load %arg14[%c0_321, %c0_322] : memref<8x128xf32, #tpu.memory_space<vmem>>, vector<8x128xf32>
      tpu.vector_store %arg14[%c0_321, %c0_322], %712 {strides = array<i32>} : memref<8x128xf32, #tpu.memory_space<vmem>>, vector<8x128xf32>,
      %715 = arith.truncf %712 : vector<8x128xf32> to vector<8x128xbf16>
      %716 = arith.index_cast %c14_i32 : i32 to index
      %c0_323 = arith.constant 0 : index
      %c0_324 = arith.constant 0 : index
      %717 = vector.load %arg17[%716, %c0_323, %c0_324] : memref<16x8x128xbf16, #tpu.memory_space<vmem>>, vector<1x8x128xbf16>
      %718 = vector.shape_cast %717 : vector<1x8x128xbf16> to vector<8x128xbf16>
      %719 = vector.shape_cast %715 : vector<8x128xbf16> to vector<1x8x128xbf16>
      tpu.vector_store %arg17[%716, %c0_323, %c0_324], %719 {strides = array<i32>} : memref<16x8x128xbf16, #tpu.memory_space<vmem>>, vector<1x8x128xbf16>,
      %c15_i32 = arith.constant 15 : i32
      %c0_325 = arith.constant 0 : index
      %c0_326 = arith.constant 0 : index
      %720 = vector.load %arg14[%c0_325, %c0_326] : memref<8x128xf32, #tpu.memory_space<vmem>>, vector<8x128xf32>
      %c0_327 = arith.constant 0 : index
      %c0_328 = arith.constant 0 : index
      %721 = vector.load %arg15[%c0_327, %c0_328] : memref<8x128xf32, #tpu.memory_space<vmem>>, vector<8x128xf32>
      %722 = arith.index_cast %c15_i32 : i32 to index
      %c0_329 = arith.constant 0 : index
      %c0_330 = arith.constant 0 : index
      %723 = vector.load %arg16[%722, %c0_329, %c0_330] : memref<16x8x512xf32, #tpu.memory_space<vmem>>, vector<1x8x512xf32>
      %724 = vector.shape_cast %723 : vector<1x8x512xf32> to vector<8x512xf32>
      %725 = arith.truncf %720 : vector<8x128xf32> to vector<8x128xbf16>
      %c0_331 = arith.constant 0 : index
      %c0_332 = arith.constant 0 : index
      %726 = vector.load %arg5[%c0_331, %c0_332] : memref<128x512xbf16, #tpu.memory_space<vmem>>, vector<128x512xbf16>
      %cst_333 = arith.constant dense<0.000000e+00> : vector<8x512xf32>
      %727 = tpu.matmul %725, %726, %cst_333 {dimension_numbers = #tpu.dot_dimension_numbers<[1], [0], [0], [1], [0, 0, 1, 1], [], []>} : vector<8x128xbf16>, vector<128x512xbf16>, vector<8x512xf32> -> vector<8x512xf32>
      %728 = arith.addf %724, %727 : vector<8x512xf32>
      %729 = vector.extract_strided_slice %728 {offsets = [0, 0], sizes = [8, 128], strides = [1, 1]} : vector<8x512xf32> to vector<8x128xf32>
      %730 = arith.negf %729 : vector<8x128xf32>
      %731 = math.exp %730 : vector<8x128xf32>
      %cst_334 = arith.constant 1.000000e+00 : f32
      %732 = vector.broadcast %cst_334 : f32 to vector<8x128xf32>
      %733 = arith.addf %732, %731 : vector<8x128xf32>
      %734 = arith.divf %732, %733 : vector<8x128xf32>
      %735 = vector.extract_strided_slice %728 {offsets = [0, 128], sizes = [8, 128], strides = [1, 1]} : vector<8x512xf32> to vector<8x128xf32>
      %736 = arith.negf %735 : vector<8x128xf32>
      %737 = math.exp %736 : vector<8x128xf32>
      %cst_335 = arith.constant 1.000000e+00 : f32
      %738 = vector.broadcast %cst_335 : f32 to vector<8x128xf32>
      %739 = arith.addf %738, %737 : vector<8x128xf32>
      %740 = arith.divf %738, %739 : vector<8x128xf32>
      %741 = vector.extract_strided_slice %728 {offsets = [0, 256], sizes = [8, 128], strides = [1, 1]} : vector<8x512xf32> to vector<8x128xf32>
      %742 = math.tanh %741 : vector<8x128xf32>
      %743 = vector.extract_strided_slice %728 {offsets = [0, 384], sizes = [8, 128], strides = [1, 1]} : vector<8x512xf32> to vector<8x128xf32>
      %744 = arith.negf %743 : vector<8x128xf32>
      %745 = math.exp %744 : vector<8x128xf32>
      %cst_336 = arith.constant 1.000000e+00 : f32
      %746 = vector.broadcast %cst_336 : f32 to vector<8x128xf32>
      %747 = arith.addf %746, %745 : vector<8x128xf32>
      %748 = arith.divf %746, %747 : vector<8x128xf32>
      %749 = arith.mulf %740, %721 : vector<8x128xf32>
      %750 = arith.mulf %734, %742 : vector<8x128xf32>
      %751 = arith.addf %749, %750 : vector<8x128xf32>
      %752 = math.tanh %751 : vector<8x128xf32>
      %753 = arith.mulf %748, %752 : vector<8x128xf32>
      %c16_i32_337 = arith.constant 16 : i32
      %754 = arith.muli %arg1, %c16_i32_337 : i32
      %755 = arith.addi %754, %c15_i32 : i32
      %c20_i32_338 = arith.constant 20 : i32
      %756 = arith.cmpi slt, %755, %c20_i32_338 : i32
      %757 = arith.select %756, %751, %721 : vector<8x128xf32>
      %758 = arith.select %756, %753, %720 : vector<8x128xf32>
      %c0_339 = arith.constant 0 : index
      %c0_340 = arith.constant 0 : index
      %759 = vector.load %arg15[%c0_339, %c0_340] : memref<8x128xf32, #tpu.memory_space<vmem>>, vector<8x128xf32>
      tpu.vector_store %arg15[%c0_339, %c0_340], %757 {strides = array<i32>} : memref<8x128xf32, #tpu.memory_space<vmem>>, vector<8x128xf32>,
      %c0_341 = arith.constant 0 : index
      %c0_342 = arith.constant 0 : index
      %760 = vector.load %arg14[%c0_341, %c0_342] : memref<8x128xf32, #tpu.memory_space<vmem>>, vector<8x128xf32>
      tpu.vector_store %arg14[%c0_341, %c0_342], %758 {strides = array<i32>} : memref<8x128xf32, #tpu.memory_space<vmem>>, vector<8x128xf32>,
      %761 = arith.truncf %758 : vector<8x128xf32> to vector<8x128xbf16>
      %762 = arith.index_cast %c15_i32 : i32 to index
      %c0_343 = arith.constant 0 : index
      %c0_344 = arith.constant 0 : index
      %763 = vector.load %arg17[%762, %c0_343, %c0_344] : memref<16x8x128xbf16, #tpu.memory_space<vmem>>, vector<1x8x128xbf16>
      %764 = vector.shape_cast %763 : vector<1x8x128xbf16> to vector<8x128xbf16>
      %765 = vector.shape_cast %761 : vector<8x128xbf16> to vector<1x8x128xbf16>
      tpu.vector_store %arg17[%762, %c0_343, %c0_344], %765 {strides = array<i32>} : memref<16x8x128xbf16, #tpu.memory_space<vmem>>, vector<1x8x128xbf16>,
      %c16_i32_345 = arith.constant 16 : i32
    } else {
    }
    %c0 = arith.constant 0 : index
    %c0_1 = arith.constant 0 : index
    %c0_2 = arith.constant 0 : index
    %3 = vector.load %arg17[%c0, %c0_1, %c0_2] : memref<16x8x128xbf16, #tpu.memory_space<vmem>>, vector<16x8x128xbf16>
    %4 = vector.shape_cast %3 : vector<16x8x128xbf16> to vector<128x128xbf16>
    %c0_3 = arith.constant 0 : index
    %c0_4 = arith.constant 0 : index
    %5 = vector.load %arg9[%c0_3, %c0_4] : memref<128x512xbf16, #tpu.memory_space<vmem>>, vector<128x512xbf16>
    %cst = arith.constant dense<0.000000e+00> : vector<128x512xf32>
    %6 = tpu.matmul %4, %5, %cst {dimension_numbers = #tpu.dot_dimension_numbers<[1], [0], [0], [1], [0, 0, 1, 1], [], []>} : vector<128x128xbf16>, vector<128x512xbf16>, vector<128x512xf32> -> vector<128x512xf32>
    %c0_5 = arith.constant 0 : index
    %c0_6 = arith.constant 0 : index
    %7 = vector.load %arg10[%c0_5, %c0_6] : memref<1x512xf32, #tpu.memory_space<vmem>>, vector<1x512xf32>
    %8 = vector.broadcast %7 : vector<1x512xf32> to vector<128x512xf32>
    %9 = arith.addf %6, %8 : vector<128x512xf32>
    %10 = vector.shape_cast %9 : vector<128x512xf32> to vector<16x8x512xf32>
    %11 = arith.truncf %10 : vector<16x8x512xf32> to vector<16x8x512xbf16>
    %c0_7 = arith.constant 0 : index
    %c0_8 = arith.constant 0 : index
    %c0_9 = arith.constant 0 : index
    %12 = vector.load %arg11[%c0_7, %c0_8, %c0_9] : memref<16x8x512xbf16, #tpu.memory_space<vmem>>, vector<16x8x512xbf16>
    tpu.vector_store %arg11[%c0_7, %c0_8, %c0_9], %11 {strides = array<i32>} : memref<16x8x512xbf16, #tpu.memory_space<vmem>>, vector<16x8x512xbf16>,
    %c1_i32 = arith.constant 1 : i32
    %13 = arith.cmpi eq, %arg1, %c1_i32 : i32
    %c0_i32_10 = arith.constant 0 : i32
    %14 = arith.cmpi eq, %arg2, %c0_i32_10 : i32
    %15 = arith.andi %13, %14 : i1
    %16 = arith.extui %15 : i1 to i32
    %c0_i32_11 = arith.constant 0 : i32
    %17 = arith.cmpi ne, %16, %c0_i32_11 : i32
    scf.if %17 {
      %c0_12 = arith.constant 0 : index
      %c0_13 = arith.constant 0 : index
      %18 = vector.load %arg14[%c0_12, %c0_13] : memref<8x128xf32, #tpu.memory_space<vmem>>, vector<8x128xf32>
      %c0_14 = arith.constant 0 : index
      %c0_15 = arith.constant 0 : index
      %19 = vector.load %arg12[%c0_14, %c0_15] : memref<8x128xf32, #tpu.memory_space<vmem>>, vector<8x128xf32>
      tpu.vector_store %arg12[%c0_14, %c0_15], %18 {strides = array<i32>} : memref<8x128xf32, #tpu.memory_space<vmem>>, vector<8x128xf32>,
      %c0_16 = arith.constant 0 : index
      %c0_17 = arith.constant 0 : index
      %20 = vector.load %arg15[%c0_16, %c0_17] : memref<8x128xf32, #tpu.memory_space<vmem>>, vector<8x128xf32>
      %c0_18 = arith.constant 0 : index
      %c0_19 = arith.constant 0 : index
      %21 = vector.load %arg13[%c0_18, %c0_19] : memref<8x128xf32, #tpu.memory_space<vmem>>, vector<8x128xf32>
      tpu.vector_store %arg13[%c0_18, %c0_19], %20 {strides = array<i32>} : memref<8x128xf32, #tpu.memory_space<vmem>>, vector<8x128xf32>,
    } else {
    }
    return
  }
  func.func @transform_0(%arg0: i32, %arg1: i32, %arg2: i32) -> (i32, i32, i32) {
    %c0_i32 = arith.constant 0 : i32
    %c0_i32_0 = arith.constant 0 : i32
    return %arg1, %arg0, %c0_i32 : i32, i32, i32
  }
  func.func @transform_1(%arg0: i32, %arg1: i32, %arg2: i32) -> (i32, i32) {
    %c0_i32 = arith.constant 0 : i32
    %c0_i32_0 = arith.constant 0 : i32
    %c0_i32_1 = arith.constant 0 : i32
    return %c0_i32, %c0_i32_0 : i32, i32
  }
  func.func @transform_2(%arg0: i32, %arg1: i32, %arg2: i32) -> (i32, i32) {
    %c0_i32 = arith.constant 0 : i32
    %c0_i32_0 = arith.constant 0 : i32
    %c0_i32_1 = arith.constant 0 : i32
    return %c0_i32, %c0_i32_0 : i32, i32
  }
  func.func @transform_3(%arg0: i32, %arg1: i32, %arg2: i32) -> (i32, i32) {
    %c0_i32 = arith.constant 0 : i32
    %c0_i32_0 = arith.constant 0 : i32
    %c0_i32_1 = arith.constant 0 : i32
    return %c0_i32, %c0_i32_0 : i32, i32
  }
  func.func @transform_4(%arg0: i32, %arg1: i32, %arg2: i32) -> (i32, i32) {
    %c0_i32 = arith.constant 0 : i32
    %c0_i32_0 = arith.constant 0 : i32
    return %arg0, %c0_i32 : i32, i32
  }
  func.func @transform_5(%arg0: i32, %arg1: i32, %arg2: i32) -> (i32, i32) {
    %c0_i32 = arith.constant 0 : i32
    %c0_i32_0 = arith.constant 0 : i32
    return %arg0, %c0_i32 : i32, i32
  }
  func.func @transform_6(%arg0: i32, %arg1: i32, %arg2: i32) -> (i32, i32) {
    %c0_i32 = arith.constant 0 : i32
    %c0_i32_0 = arith.constant 0 : i32
    return %c0_i32, %arg2 : i32, i32
  }
  func.func @transform_7(%arg0: i32, %arg1: i32, %arg2: i32) -> (i32, i32) {
    %c0_i32 = arith.constant 0 : i32
    %c0_i32_0 = arith.constant 0 : i32
    return %c0_i32, %arg2 : i32, i32
  }
  func.func @transform_8(%arg0: i32, %arg1: i32, %arg2: i32) -> (i32, i32, i32) {
    %c0_i32 = arith.constant 0 : i32
    return %arg1, %arg0, %arg2 : i32, i32, i32
  }
  func.func @transform_9(%arg0: i32, %arg1: i32, %arg2: i32) -> (i32, i32) {
    %c0_i32 = arith.constant 0 : i32
    %c0_i32_0 = arith.constant 0 : i32
    return %arg0, %c0_i32 : i32, i32
  }
  func.func @transform_10(%arg0: i32, %arg1: i32, %arg2: i32) -> (i32, i32) {
    %c0_i32 = arith.constant 0 : i32
    %c0_i32_0 = arith.constant 0 : i32
    return %arg0, %c0_i32 : i32, i32
  }
}

</mosaic_0001>

<bundles_post_ra>
// kernel: tpu_custom_call.1
= control target key start
LH: loop header
LB: loop body
LE: loop exit
PB: predicated region body
PF: predicated region fallthrough
CT: control target
= control target key end

     0   :  { %s10870_s0 = inlined_call_operand.hbm [shape: bf16[32,8,128], index: 0, kind: input, shape index: {}]   ;;  %s10871_s1 = inlined_call_operand.hbm [shape: bf16[128,512], index: 1, kind: input, shape index: {}]   ;;  %s10872_s2 = inlined_call_operand.hbm [shape: bf16[128,512], index: 2, kind: input, shape index: {}]   ;;  %s10873_s3 = inlined_call_operand.hbm [shape: f32[1,512], index: 3, kind: input, shape index: {}]   ;;  %s10874_s4 = inlined_call_operand.vmem [shape: f32[8,128], index: 4, kind: input, shape index: {}]   ;;  %s10875_s5 = inlined_call_operand.vmem [shape: f32[8,128], index: 5, kind: input, shape index: {}]   ;;  %s10876_s6 = inlined_call_operand.hbm [shape: bf16[128,512], index: 6, kind: input, shape index: {}]   ;;  %s10877_s7 = inlined_call_operand.vmem [shape: f32[1,512], index: 7, kind: input, shape index: {}]   ;;  %s10878_s8 = inlined_call_operand.hbm [shape: bf16[32,8,512], index: 8, kind: output, shape index: {0}]   ;;  %s10879_s9 = inlined_call_operand.hbm [shape: f32[8,128], index: 9, kind: output, shape index: {1}]   ;;  %s10880_s10 = inlined_call_operand.hbm [shape: f32[8,128], index: 10, kind: output, shape index: {2}]  }
   0x1   :  { %10899 = sst [smem:[#allocation73_spill]] %s10875_s5 }
   0x2   :  { %10900 = sst [smem:[#allocation74_spill]] %s10877_s7 }
   0x3   :  { %10901 = sst [smem:[#allocation75_spill]] %s10878_s8 }
   0x4   :  { %10902 = sst [smem:[#allocation76_spill]] %s10879_s9 }
   0x5   :  { %10903 = sst [smem:[#allocation77_spill]] %s10880_s10 }
   0x6   :  { %16 = vsyncpa [#allocation7], 0 }
   0x7   :  { %18 = vsyncpa [#allocation7 + $0x1], 0 }
   0x8   :  { %19 = vsyncpa [#allocation10], 0 }
   0x9   :  { %20 = vsyncpa [#allocation13], 0 }
   0xa   :  { %21 = vsyncpa [#allocation8], 0 }
   0xb   :  { %23 = vsyncpa [#allocation8 + $0x1], 0 }
   0xc   :  { %24 = vsyncpa [#allocation17], 0  ;;  %s9143_s13 = smov 0   ;;  %s9145_s14 = smov 0  }
   0xd   :  { %s9147_s15 = smov 0   ;;  %s9149_s16 = smov 0  }
   0xe   :  { %s9151_s17 = smov 0   ;;  %s9153_s18 = smov 0  }
   0xf LB: > { %10904 = sst [smem:[#allocation24_spill]] %s9051_s13  ;;  %s7306_s19 = sadd.s32 4294967295, %s9071_s18   ;;  %s9071_s18 = sphi %s9153_s18, %s30_s18   ;;  %s9067_s17 = sphi %s9151_s17, %s11033_s17   ;;  %s9063_s16 = sphi %s9149_s16, %s11032_s16   ;;  %s9059_s15 = sphi %s9147_s15, %s11031_s15   ;;  %s9055_s14 = sphi %s9145_s14, %s11030_s14   ;;  %s9051_s13 = sphi %s9143_s13, %s11029_s13  }
  0x10   : > { %s7307_s20 = sadd.s32 4294967294, %s9071_s18   ;;  %p71_p0 = scmp.ne.s32.totalorder %s9055_s14, %s9051_s13 }
  0x11   : > { %p9177_p1 = scmp.eq.s32.totalorder %s7306_s19, 0  ;;  %p9181_p2 = scmp.eq.s32.totalorder %s7306_s19, 1 }
  0x12   : > { %p272_p3 = scmp.eq.s32.totalorder %s7307_s20, 1  ;;  %p7308_p5 = scmp.ge.s32.totalorder %s9071_s18, 1 }
  0x13   : > { %s10905_s21 = scalar_select %p9177_p1, 1, 0 }
  0x14   : > { %s10906_s22 = scalar_select %p9181_p2, 1, 0 }
  0x15   : > { %p9187_p4 = por %p9177_p1, %p71_p0  ;;  %p9192_p6 = por %p272_p3, %p71_p0 }
  0x16   : > { %p331_p7 = scmp.lt.s32.totalorder %s9071_s18, 3  ;;  %s9073_s26 = smov [#allocation9]  }
  0x17   : > { %s10907_s23 = scalar_select %p9187_p4, 1, 0 }
  0x18   : > { %s10908_s24 = scalar_select %p9192_p6, 1, 0 }
  0x19   : > { %p9197_p8 = pnand %p7308_p5, %p331_p7  ;;  %s343_s27 = sshll.u32 %s9073_s26, 4  ;;  %s9201_s27 = int_to_ptr.vmem [resolvable:$true] %s343_s27 }
  0x1a   : > { %10909 = sst [smem:[#allocation25_spill]] %s10908_s24  ;;  %s9074_s29 = smov [#allocation12]  }
  0x1b   : > { %s10910_s25 = scalar_select %p9197_p8, 1, 0 }
  0x1c   : > { %p8076_p9 = pneg %p9197_p8  ;;  %s370_s30 = sshll.u32 %s9074_s29, 4  ;;  %s9212_s30 = int_to_ptr.vmem [resolvable:$true] %s370_s30 }
  0x1d   : > { %s9075_s11 = smov [#allocation11]   ;;  %s8783_s26 = scalar_lea.hbm %s10871_s1, 4096 }
  0x1e   : > { %p9208_p11 = pnand %p8076_p9, %p9177_p1  ;;  %s9214_s12 = sshll.u32 %s9075_s11, 4  ;;  %s357_s12 = int_to_ptr.vmem [resolvable:$true] %s9214_s12 }
  0x1f   : > { %p8784_p12 = scmp.ne.s32.totalorder %s10871_s1, %s8783_s26  ;;  %p8790_p5 = scmp.lt.u32.totalorder %s8783_s26, %s10871_s1 }
  0x20   : > { %p9224_p13 = pneg %p9208_p11 }
  0x22   : > { %p8786_p0 = pnand %p9224_p13, %p8784_p12 }
  0x24   : > { %p8787_p3 = pneg %p8786_p0 }
  0x26   : > { %p8792_p7 = pnand %p8790_p5, %p8787_p3 }
  0x28   : > { %8795 = shalt.err (!%p8792_p7)
}
  0x29   : > { %s8796_s13 = scalar_lea.vmem %s9201_s27, 4096  ;;  %p8804_p1 = scmp.lt.s32.totalorder %s9201_s27, %s9201_s27 }
  0x2a   : > { %p8797_p9 = scmp.ne.s32.totalorder %s9201_s27, %s8796_s13  ;;  %p8805_p4 = scmp.lt.s32.totalorder %s8796_s13, %s8796_s13 }
  0x2c   : > { %p8799_p10 = pnand %p8797_p9, %p9224_p13  ;;  %p8806_p12 = por %p8805_p4, %p8804_p1 }
  0x2e   : > { %p8800_p6 = pneg %p8799_p10 }
  0x30   : > { %p8807_p0 = pnand %p8806_p12, %p8800_p6 }
  0x32   : > { %8810 = shalt.err (!%p8807_p0)
}
  0x33   : > { %s9076_s24 = smov 256   ;;  %s9077_s19 = smov 16  }
  0x34   : > { %8079 = dma.hbm_to_vmem [thread:$0]  (!%p9208_p11), %s10871_s1, 4096, %s9201_s27, [#allocation10], %s9076_s24, %s9076_s24, %s9077_s19  }
  0x35   : > { %s8811_s13 = scalar_lea.hbm %s10873_s3, 64 }
  0x36   : > { %p8812_p1 = scmp.ne.s32.totalorder %s10873_s3, %s8811_s13  ;;  %p8818_p10 = scmp.lt.u32.totalorder %s8811_s13, %s10873_s3 }
  0x38   : > { %p8814_p4 = pnand %p8812_p1, %p9224_p13 }
  0x3a   : > { %p8815_p6 = pneg %p8814_p4 }
  0x3c   : > { %p8820_p3 = pnand %p8818_p10, %p8815_p6 }
  0x3e   : > { %8823 = shalt.err (!%p8820_p3)
}
  0x3f   : > { %s8824_s27 = scalar_lea.vmem %s9212_s30, 64  ;;  %p8832_p12 = scmp.lt.s32.totalorder %s9212_s30, %s9212_s30 }
  0x40   : > { %p8825_p5 = scmp.ne.s32.totalorder %s9212_s30, %s8824_s27  ;;  %p8833_p0 = scmp.lt.s32.totalorder %s8824_s27, %s8824_s27 }
  0x42   : > { %p8827_p7 = pnand %p8825_p5, %p9224_p13  ;;  %p8834_p1 = por %p8833_p0, %p8832_p12 }
  0x44   : > { %p8828_p9 = pneg %p8827_p7 }
  0x46   : > { %p8835_p4 = pnand %p8834_p1, %p8828_p9 }
  0x48   : > { %8838 = shalt.err (!%p8835_p4)
}
  0x49   : > { %8085 = dma.hbm_to_vmem [thread:$0]  (!%p9208_p11), %s10873_s3, 64, %s9212_s30, [#allocation13]  }
  0x4a   : > { %s8839_s20 = scalar_lea.hbm %s10872_s2, 4096 }
  0x4b   : > { %p8840_p6 = scmp.ne.s32.totalorder %s10872_s2, %s8839_s20  ;;  %p8846_p5 = scmp.lt.u32.totalorder %s8839_s20, %s10872_s2 }
  0x4d   : > { %p8842_p10 = pnand %p8840_p6, %p9224_p13 }
  0x4f   : > { %p8843_p3 = pneg %p8842_p10 }
  0x51   : > { %p8848_p7 = pnand %p8846_p5, %p8843_p3 }
  0x53   : > { %8851 = shalt.err (!%p8848_p7)
}
  0x54   : > { %s8852_s27 = scalar_lea.vmem %s357_s12, 4096  ;;  %p8860_p1 = scmp.lt.s32.totalorder %s357_s12, %s357_s12 }
  0x55   : > { %p8853_p9 = scmp.ne.s32.totalorder %s357_s12, %s8852_s27  ;;  %p8861_p4 = scmp.lt.s32.totalorder %s8852_s27, %s8852_s27 }
  0x57   : > { %p8855_p12 = pnand %p8853_p9, %p9224_p13  ;;  %p8862_p8 = por %p8861_p4, %p8860_p1 }
  0x59   : > { %p8856_p0 = pneg %p8855_p12 }
  0x5b   : > { %p8863_p2 = pnand %p8862_p8, %p8856_p0 }
  0x5d   : > { %8866 = shalt.err (!%p8863_p2)
}
  0x5e   : > { %8082 = dma.hbm_to_vmem [thread:$0]  (!%p9208_p11), %s10872_s2, 4096, %s357_s12, [#allocation10], %s9076_s24, %s9076_s24, %s9077_s19  }
  0x5f   : > { %s9078_s7 = smov [#allocation14]   ;;  %s8867_s26 = scalar_lea.hbm %s10876_s6, 4096 }
  0x60   : > { %s397_s8 = sshll.u32 %s9078_s7, 4  ;;  %p8868_p2 = scmp.ne.s32.totalorder %s10876_s6, %s8867_s26  ;;  %s398_s8 = int_to_ptr.vmem [resolvable:$true] %s397_s8 }
  0x61   : > { %p8874_p10 = scmp.lt.u32.totalorder %s8867_s26, %s10876_s6 }
  0x62   : > { %p8870_p8 = pnand %p8868_p2, %p9224_p13 }
  0x64   : > { %p8871_p6 = pneg %p8870_p8 }
  0x66   : > { %p8876_p3 = pnand %p8874_p10, %p8871_p6 }
  0x68   : > { %8879 = shalt.err (!%p8876_p3)
}
  0x69   : > { %s8880_s12 = scalar_lea.vmem %s398_s8, 4096  ;;  %p8888_p12 = scmp.lt.s32.totalorder %s398_s8, %s398_s8 }
  0x6a   : > { %p8881_p5 = scmp.ne.s32.totalorder %s398_s8, %s8880_s12  ;;  %p8889_p0 = scmp.lt.s32.totalorder %s8880_s12, %s8880_s12 }
  0x6c   : > { %p8883_p7 = pnand %p8881_p5, %p9224_p13  ;;  %p8890_p1 = por %p8889_p0, %p8888_p12 }
  0x6e   : > { %p8884_p9 = pneg %p8883_p7 }
  0x70   : > { %p8891_p4 = pnand %p8890_p1, %p8884_p9 }
  0x72   : > { %8894 = shalt.err (!%p8891_p4)
}
  0x73   : > { %8088 = dma.hbm_to_vmem [thread:$0]  (!%p9208_p11), %s10876_s6, 4096, %s398_s8, [#allocation13], %s9076_s24, %s9076_s24, %s9077_s19  }
  0x74   : > { %s45_s10 = sadd.s32 1, %s9067_s17  ;;  %s58_s28 = sadd.s32 1, %s9059_s15 }
  0x75   : > { %p47_p13 = scmp.ge.s32.totalorder %s45_s10, 2  ;;  %p65_p2 = scmp.ne.s32.totalorder %s9059_s15, %s9055_s14 }
  0x76   : > { %p66_p8 = scmp.eq.s32.totalorder %s9071_s18, 0  ;;  %p8101_p6 = scmp.lt.s32.totalorder %s9071_s18, 2 }
  0x77   : > { %s11035_s10 = smov (%p47_p13, %s45_s10), 0  ;;  %p10913_p3 = scmp.ne.s32.totalorder %s10906_s22, 0 }
  0x78   : > { %p67_p10 = por %p66_p8, %p65_p2  ;;  %s53_s9 = ssub.s32 %s9067_s17, %s11035_s10 }
  0x79   : > { %p9324_p5 = por %p10913_p3, %p65_p2  ;;  %s419_s20 = sand.u32 1, %s9059_s15  }
  0x7a   : > { %p56_p7 = scmp.eq.s32.totalorder %s53_s9, 0  ;;  %s7317_s24 = sshll.u32 %s419_s20, 6 }
  0x7b   : > { %s8012_s19 = sshll.u32 %s9067_s17, 10  ;;  %s423_s13 = scalar_lea.vmem [#allocation6], %s7317_s24 }
  0x7c   : > { %s9333_s8 = scalar_select %p56_p7, %s9059_s15, %s58_s28  }
  0x7d   : > { %s9338_s11 = scalar_lea.hbm %s10870_s0, %s8012_s19  ;;  %s431_s27 = sshll.u32 %s423_s13, 4  ;;  %s9346_s27 = int_to_ptr.vmem [resolvable:$true] %s431_s27 }
  0x7e   : > { %p9342_p11 = pnand %p8101_p6, %p67_p10  ;;  %s9348_s30 = scalar_lea.sflag [#allocation7], %s419_s20 }
  0x7f   : > { %s8895_s5 = scalar_lea.hbm %s9338_s11, 1024  ;;  %s8900_s24 = scalar_lea.hbm %s10870_s0, 2048 }
  0x80   : > { %p8896_p9 = scmp.ne.s32.totalorder %s9338_s11, %s8895_s5  ;;  %p8897_p12 = pneg %p9342_p11 }
  0x81   : > { %p8901_p4 = scmp.lt.u32.totalorder %s9338_s11, %s10870_s0  ;;  %p8902_p13 = scmp.lt.u32.totalorder %s8900_s24, %s8895_s5 }
  0x82   : > { %p8898_p0 = pnand %p8897_p12, %p8896_p9  ;;  %p8904_p8 = scmp.lt.u32.totalorder %s8895_s5, %s9338_s11 }
  0x83   : > { %p8903_p2 = por %p8902_p13, %p8901_p4 }
  0x84   : > { %p8899_p1 = pneg %p8898_p0 }
  0x85   : > { %p8905_p6 = por %p8904_p8, %p8903_p2 }
  0x87   : > { %p8906_p10 = pnand %p8905_p6, %p8899_p1 }
  0x89   : > { %8909 = shalt.err (!%p8906_p10)
}
  0x8a   : > { %s8910_s20 = scalar_lea.vmem %s9346_s27, 1024  ;;  %s9079_s29 = smov [#allocation6]  }
  0x8b   : > { %p8911_p3 = scmp.ne.s32.totalorder %s9346_s27, %s8910_s20  ;;  %s8915_s13 = sshll.u32 %s9079_s29, 4  ;;  %s8916_s13 = int_to_ptr.vmem [resolvable:$false] %s8915_s13 }
  0x8c   : > { %s8917_s28 = scalar_lea.vmem %s8916_s13, 2048  ;;  %p8918_p0 = scmp.lt.s32.totalorder %s9346_s27, %s8916_s13 }
  0x8d   : > { %p8913_p7 = pnand %p8911_p3, %p8897_p12  ;;  %p8919_p4 = scmp.lt.s32.totalorder %s8917_s28, %s8910_s20 }
  0x8f   : > { %p8914_p9 = pneg %p8913_p7  ;;  %p8920_p13 = por %p8919_p4, %p8918_p0 }
  0x91   : > { %p8921_p2 = pnand %p8920_p13, %p8914_p9 }
  0x93   : > { %8924 = shalt.err (!%p8921_p2)
}
  0x94   : > { %s9080_s5 = smov 64   ;;  %s9081_s9 = smov 4  }
  0x95   : > { %8092 = dma.hbm_to_vmem [thread:$0]  (!%p9342_p11), %s9338_s11, 1024, %s9346_s27, %s9348_s30, %s9080_s5, %s9080_s5, %s9081_s9  }
  0x96   : > { %p10916_p12 = scmp.ne.s32.totalorder %s10910_s25, 0 }
  0x98   : > { %443 = sbr.rel (%p10916_p12) target bundleno = 4764 (0x129c), region = 52 }
  0x9f   : > { %s9379_s24 = sand.u32 1, %s9055_s14   ;;  %p10917_p1 = scmp.ne.s32.totalorder %s10907_s23, 0 }
  0xa0   : > { %s7321_s19 = sshll.u32 %s9379_s24, 6  ;;  %s446_s26 = scalar_lea.sflag [#allocation7], %s9379_s24 }
  0xa1   : > { %s9383_s20 = scalar_lea.vmem [#allocation6], %s7321_s19 }
  0xa2   : > { %9030 = dma.done.wait (%p10917_p1), %s446_s26, 1024  }
  0xa3   : > { %9032 = vsyncadd (%p10917_p1), %s446_s26, 4294966272  ;;  %p10918_p11 = scmp.ne.s32.totalorder %s10905_s21, 0 }
  0xa5   : > { %9034 = dma.done.wait (%p10918_p11), [#allocation10], 8192  }
  0xa6   : > { %9036 = vsyncadd (%p10918_p11), [#allocation10], 4294959104 }
  0xa7   : > { %9038 = dma.done.wait (%p10918_p11), [#allocation13], 4160  }
  0xa8   : > { %9040 = vsyncadd (%p10918_p11), [#allocation13], 4294963136  ;;  %s7326_s25 = sshll.u32 %s9379_s24, 8  ;;  %p7327_p8 = scmp.ne.s32.totalorder %s9063_s16, 0 }
  0xa9   : > { %s9398_s11 = scalar_lea.vmem [#allocation15], %s7326_s25  ;;  %v540_v0 = vld [vmem:[%s10874_s4] sm:$0xff] (!%p7327_p8)  ;;  %s10919_s29 = sld [smem:[#allocation73_spill]] (!%p7327_p8) }
  0xaa   : > { %539 = sbr.rel (%p7327_p8) target bundleno = 177 (0xb1), region = 80  ;;  %541 = vst [vmem:[#allocation2] sm:$0xff] (!%p7327_p8), %v540_v0 }
  0xaf   : > { %v542_v1 = vld [vmem:[%s10919_s29] sm:$0xff] (!%p7327_p8) }
  0xb0   : > { %543 = vst [vmem:[#allocation3] sm:$0xff] (!%p7327_p8), %v542_v1 }
  0xb1 PF: > { %v8172_v2 = vld [vmem:[#allocation9 + $0x4] ss:$16 sps:$4 sm:$0xff]   ;;  %v8174_v3 = vld [vmem:[#allocation9 + $0xc] ss:$16 sps:$4 sm:$0xff]   ;;  %v10895_v4 = vmov 0   ;;  %s9788_s21 = sshll.u32 %s9063_s16, 4 }
  0xb2   : > { %854 = vmatprep.mubr.bf16.mxu0 %v10895_v4  ;;  %967 = vmatprep.mubr.bf16.mxu1 %v10895_v4  ;;  %v8176_v5 = vld [vmem:[#allocation9] ss:$16 sps:$4 sm:$0xff]   ;;  %v8177_v6 = vld [vmem:[#allocation9 + $0x8] ss:$16 sps:$4 sm:$0xff]   ;;  %v8178_v7 = vld [vmem:[#allocation9 + $0x24] ss:$16 sps:$4 sm:$0xff]  }
  0xb3   : > { %822 = vmatprep.subr.bf16.mxu0 %v8172_v2  ;;  %935 = vmatprep.subr.bf16.mxu1 %v8174_v3  ;;  %v8180_v8 = vld [vmem:[#allocation9 + $0x2c] ss:$16 sps:$4 sm:$0xff]   ;;  %v8182_v9 = vld [vmem:[#allocation9 + $0x20] ss:$16 sps:$4 sm:$0xff]   ;;  %v8183_v10 = vld [vmem:[#allocation9 + $0x28] ss:$16 sps:$4 sm:$0xff]  }
  0xb4   : > { %823 = vmatpush1.bf16.msra.mxu0 %v8176_v5  ;;  %936 = vmatpush1.bf16.msra.mxu1 %v8177_v6  ;;  %v8184_v11 = vld [vmem:[#allocation9 + $0x44] ss:$16 sps:$4 sm:$0xff]   ;;  %v8186_v12 = vld [vmem:[#allocation9 + $0x4c] ss:$16 sps:$4 sm:$0xff]   ;;  %v8188_v13 = vld [vmem:[#allocation9 + $0x40] ss:$16 sps:$4 sm:$0xff]  }
  0xb5   : > { %824 = vmatprep.subr.bf16.mxu0 %v8178_v7  ;;  %937 = vmatprep.subr.bf16.mxu1 %v8180_v8  ;;  %v8189_v14 = vld [vmem:[#allocation9 + $0x48] ss:$16 sps:$4 sm:$0xff]   ;;  %v8190_v15 = vld [vmem:[#allocation9 + $0x64] ss:$16 sps:$4 sm:$0xff]   ;;  %v8192_v16 = vld [vmem:[#allocation9 + $0x6c] ss:$16 sps:$4 sm:$0xff]  }
  0xb6   : > { %v8194_v17 = vld [vmem:[#allocation9 + $0x60] ss:$16 sps:$4 sm:$0xff]   ;;  %v8195_v18 = vld [vmem:[#allocation9 + $0x68] ss:$16 sps:$4 sm:$0xff]   ;;  %v8196_v19 = vld [vmem:[#allocation9 + $0x84] ss:$16 sps:$4 sm:$0xff]  }
  0xb7   : > { %v8198_v20 = vld [vmem:[#allocation9 + $0x8c] ss:$16 sps:$4 sm:$0xff]   ;;  %v8200_v21 = vld [vmem:[#allocation9 + $0x80] ss:$16 sps:$4 sm:$0xff]   ;;  %v8201_v22 = vld [vmem:[#allocation9 + $0x88] ss:$16 sps:$4 sm:$0xff]  }
  0xb8   : > { %825 = vmatpush1.bf16.msra.mxu0 %v8182_v9  ;;  %938 = vmatpush1.bf16.msra.mxu1 %v8183_v10  ;;  %v8202_v23 = vld [vmem:[#allocation9 + $0xa4] ss:$16 sps:$4 sm:$0xff]   ;;  %v8204_v24 = vld [vmem:[#allocation9 + $0xac] ss:$16 sps:$4 sm:$0xff]   ;;  %v8206_v25 = vld [vmem:[#allocation9 + $0xa0] ss:$16 sps:$4 sm:$0xff]  }
  0xb9   : > { %826 = vmatprep.subr.bf16.mxu0 %v8184_v11  ;;  %939 = vmatprep.subr.bf16.mxu1 %v8186_v12  ;;  %v8207_v26 = vld [vmem:[#allocation9 + $0xa8] ss:$16 sps:$4 sm:$0xff]   ;;  %v8208_v27 = vld [vmem:[#allocation9 + $0xc4] ss:$16 sps:$4 sm:$0xff]   ;;  %v8210_v28 = vld [vmem:[#allocation9 + $0xcc] ss:$16 sps:$4 sm:$0xff]  }
  0xba   : > { %v8212_v29 = vld [vmem:[#allocation9 + $0xc0] ss:$16 sps:$4 sm:$0xff]   ;;  %v8213_v30 = vld [vmem:[#allocation9 + $0xc8] ss:$16 sps:$4 sm:$0xff]   ;;  %v8214_v31 = vld [vmem:[#allocation9 + $0xe4] ss:$16 sps:$4 sm:$0xff]  }
  0xbb   : > { %v8216_v32 = vld [vmem:[#allocation9 + $0xec] ss:$16 sps:$4 sm:$0xff]   ;;  %v8218_v33 = vld [vmem:[#allocation9 + $0xe0] ss:$16 sps:$4 sm:$0xff]   ;;  %v8219_v34 = vld [vmem:[#allocation9 + $0xe8] ss:$16 sps:$4 sm:$0xff]  }
  0xbc   : > { %827 = vmatpush1.bf16.msra.mxu0 %v8188_v13  ;;  %940 = vmatpush1.bf16.msra.mxu1 %v8189_v14  ;;  %v9409_v35 = vld [vmem:[#allocation11 + $0x4] ss:$16 sps:$4 sm:$0xff]   ;;  %v9411_v36 = vld [vmem:[#allocation11 + $0xc] ss:$16 sps:$4 sm:$0xff]   ;;  %v9414_v38 = vld [vmem:[#allocation11] ss:$16 sps:$4 sm:$0xff]   ;;  %v594_v14 = vlaneseq }
  0xbd   : > { %828 = vmatprep.subr.bf16.mxu0 %v8190_v15  ;;  %941 = vmatprep.subr.bf16.mxu1 %v8192_v16  ;;  %v8220_v37 = vld [vmem:[%s9383_s20] sm:$0xff]   ;;  %v9420_v40 = vld [vmem:[#allocation11 + $0x8] ss:$16 sps:$4 sm:$0xff]   ;;  %v9422_v41 = vld [vmem:[#allocation11 + $0x2c] ss:$16 sps:$4 sm:$0xff]   ;;  %p1422_p6 = scmp.lt.s32.totalorder %s9788_s21, 20 }
  0xbe   : > { %v9417_v39 = vld [vmem:[#allocation11 + $0x24] ss:$16 sps:$4 sm:$0xff]   ;;  %v9426_v42 = vld [vmem:[#allocation11 + $0x20] ss:$16 sps:$4 sm:$0xff]   ;;  %v9433_v44 = vld [vmem:[#allocation11 + $0x28] ss:$16 sps:$4 sm:$0xff]  }
  0xbf   : > { %v9430_v43 = vld [vmem:[#allocation11 + $0x44] ss:$16 sps:$4 sm:$0xff]   ;;  %v8224_v45 = vld [vmem:[%s9383_s20 + $0x8] sm:$0xff]   ;;  %v9438_v46 = vld [vmem:[#allocation11 + $0x40] ss:$16 sps:$4 sm:$0xff]   ;;  %v9569_v15 = vshrl.u32 %v594_v14, 7 }
  0xc0   : > { %829 = vmatpush1.bf16.msra.mxu0 %v8194_v17  ;;  %942 = vmatpush1.bf16.msra.mxu1 %v8195_v18  ;;  %v9441_v47 = vld [vmem:[#allocation11 + $0x64] ss:$16 sps:$4 sm:$0xff]   ;;  %v9443_v48 = vld [vmem:[#allocation11 + $0x4c] ss:$16 sps:$4 sm:$0xff]   ;;  %v9446_v49 = vld [vmem:[#allocation11 + $0x48] ss:$16 sps:$4 sm:$0xff]  }
  0xc1   : > { %830 = vmatprep.subr.bf16.mxu0 %v8196_v19  ;;  %943 = vmatprep.subr.bf16.mxu1 %v8198_v20  ;;  %v9448_v50 = vld [vmem:[#allocation11 + $0x6c] ss:$16 sps:$4 sm:$0xff]   ;;  %v9453_v51 = vld [vmem:[#allocation11 + $0x60] ss:$16 sps:$4 sm:$0xff]   ;;  %v9456_v52 = vld [vmem:[#allocation11 + $0x84] ss:$16 sps:$4 sm:$0xff]  }
  0xc2   : > { %v9460_v53 = vld [vmem:[#allocation11 + $0x68] ss:$16 sps:$4 sm:$0xff]   ;;  %v8231_v54 = vld [vmem:[%s9383_s20 + $0x10] sm:$0xff]   ;;  %v9467_v56 = vld [vmem:[#allocation11 + $0x8c] ss:$16 sps:$4 sm:$0xff]   ;;  %10920 = vst [vmem:[#allocation26_spill] sm:$0xff] %v9569_v15 }
  0xc3   : > { %v9464_v55 = vld [vmem:[#allocation11 + $0x80] ss:$16 sps:$4 sm:$0xff]   ;;  %v9470_v57 = vld [vmem:[#allocation11 + $0xa4] ss:$16 sps:$4 sm:$0xff]   ;;  %v9473_v58 = vld [vmem:[#allocation11 + $0x88] ss:$16 sps:$4 sm:$0xff]  }
  0xc4   : > { %831 = vmatpush1.bf16.msra.mxu0 %v8200_v21  ;;  %944 = vmatpush1.bf16.msra.mxu1 %v8201_v22  ;;  %v9475_v59 = vld [vmem:[#allocation11 + $0xa0] ss:$16 sps:$4 sm:$0xff]   ;;  %v9477_v60 = vld [vmem:[#allocation11 + $0xac] ss:$16 sps:$4 sm:$0xff]   ;;  %v9481_v61 = vld [vmem:[#allocation11 + $0xc4] ss:$16 sps:$4 sm:$0xff]  }
  0xc5   : > { %832 = vmatprep.subr.bf16.mxu0 %v8202_v23  ;;  %945 = vmatprep.subr.bf16.mxu1 %v8204_v24  ;;  %v9483_v62 = vld [vmem:[#allocation11 + $0xa8] ss:$16 sps:$4 sm:$0xff]   ;;  %v9490_v0 = vld [vmem:[#allocation11 + $0xc0] ss:$16 sps:$4 sm:$0xff]   ;;  %v9493_v1 = vld [vmem:[#allocation11 + $0xcc] ss:$16 sps:$4 sm:$0xff]  }
  0xc6   : > { %v8238_v63 = vld [vmem:[%s9383_s20 + $0x18] sm:$0xff]   ;;  %v9495_v2 = vld [vmem:[#allocation11 + $0xe4] ss:$16 sps:$4 sm:$0xff]   ;;  %v9504_v6 = vld [vmem:[#allocation11 + $0xe0] ss:$16 sps:$4 sm:$0xff]   ;;  %v10893_v16 = vsub.s32 2, %v9569_v15 }
  0xc7   : > { %v9497_v3 = vld [vmem:[#allocation11 + $0xc8] ss:$16 sps:$4 sm:$0xff]   ;;  %v9500_v5 = vld [vmem:[#allocation11 + $0xec] ss:$16 sps:$4 sm:$0xff]   ;;  %v8245_v8 = vld [vmem:[%s9383_s20 + $0x20] sm:$0xff]   ;;  %v10891_v17 = vsub.s32 3, %v9569_v15 }
  0xc8   : > { %833 = vmatpush1.bf16.msra.mxu0 %v8206_v25  ;;  %946 = vmatpush1.bf16.msra.mxu1 %v8207_v26  ;;  %v9508_v7 = vld [vmem:[#allocation11 + $0xe8] ss:$16 sps:$4 sm:$0xff]   ;;  %v8259_v10 = vld [vmem:[%s9383_s20 + $0x30] sm:$0xff]   ;;  %v10894_v18 = vsub.s32 0, %v9569_v15  ;;  %v592_v19 = vld [vmem:[#allocation12] sm:$0xf] }
  0xc9   : > { %834 = vmatprep.subr.bf16.mxu0 %v8208_v27  ;;  %947 = vmatprep.subr.bf16.mxu1 %v8210_v28  ;;  %v8252_v9 = vld [vmem:[%s9383_s20 + $0x28] sm:$0xff]   ;;  %v8266_v11 = vld [vmem:[%s9383_s20 + $0x38] sm:$0xff]   ;;  %v9529_v12 = vld [vmem:[#allocation2] sm:$0xff]  ;;  %v10892_v20 = vsub.s32 1, %v9569_v15  ;;  %v9577_v21 = vrot.slane %v592_v19, %v10893_v16  ;;  %v9585_v24 = vrot.slane %v592_v19, %v10891_v17  ;;  %s1423_s13 = scalar_select %p1422_p6, 1, 0 }
  0xca   : > { %v1118_v13 = vpack.c.bf16 %v9529_v12, %v9529_v12  ;;  %v9589_v25 = vrot.slane %v592_v19, %v10894_v18  ;;  %s1742_s28 = sadd.s32 1, %s9788_s21  ;;  %s2064_s9 = sadd.s32 2, %s9788_s21 }
  0xcb   : > { %v9597_v28 = vrot.slane %v592_v19, %v10892_v20  ;;  %p1743_p10 = scmp.lt.s32.totalorder %s1742_s28, 20  ;;  %p2065_p3 = scmp.lt.s32.totalorder %s2064_s9, 20 }
  0xcc   : > { %835 = vmatpush1.bf16.msra.mxu0 %v8212_v29  ;;  %948 = vmatpush1.bf16.msra.mxu1 %v8213_v30  ;;  %s2386_s26 = sadd.s32 3, %s9788_s21  ;;  %s2708_s25 = sadd.s32 4, %s9788_s21 }
  0xcd   : > { %836 = vmatprep.subr.bf16.mxu0 %v8214_v31  ;;  %949 = vmatprep.subr.bf16.mxu1 %v8216_v32  ;;  %s1744_s5 = scalar_select %p1743_p10, 1, 0 }
  0xce   : > { %s2066_s19 = scalar_select %p2065_p3, 1, 0 }
  0xcf   : > { %p2387_p7 = scmp.lt.s32.totalorder %s2386_s26, 20  ;;  %p2709_p9 = scmp.lt.s32.totalorder %s2708_s25, 20 }
  0xd0   : > { %837 = vmatpush1.bf16.msra.mxu0 %v8218_v33  ;;  %950 = vmatpush1.bf16.msra.mxu1 %v8219_v34  ;;  %s3030_s27 = sadd.s32 5, %s9788_s21  ;;  %s3352_s30 = sadd.s32 6, %s9788_s21 }
  0xd1   : > { %1311 = vmatprep.subr.bf16.mxu0 %v9409_v35  ;;  %1352 = vmatprep.subr.bf16.mxu1 %v9411_v36  ;;  %s2388_s20 = scalar_select %p2387_p7, 1, 0 }
  0xd2   : > { %s2710_s23 = scalar_select %p2709_p9, 1, 0 }
  0xd3   : > { %855 = vmatmul.mubr.bf16.vlgmr.msra.gmra.mrb[0].mxu0 %v8220_v37  ;;  %968 = vmatmul.mubr.bf16.vlgmr.msra.gmra.mrb[0].mxu1 %v8220_v37  ;;  %p3031_p0 = scmp.lt.s32.totalorder %s3030_s27, 20  ;;  %p3353_p4 = scmp.lt.s32.totalorder %s3352_s30, 20 }
  0xd4   : > { %1312 = vmatpush1.bf16.msra.mxu0 %v9414_v38  ;;  %864 = vmatprep.mubr.bf16.mxu0 %v10895_v4  ;;  %p7054_p7 = scmp.eq.s32.totalorder %s9063_s16, 1 }
  0xd5   : > { %977 = vmatprep.mubr.bf16.mxu1 %v10895_v4  ;;  %1313 = vmatprep.subr.bf16.mxu0 %v9417_v39  ;;  %s3032_s12 = scalar_select %p3031_p0, 1, 0 }
  0xd6   : > { %1353 = vmatpush1.bf16.msra.mxu1 %v9420_v40  ;;  %s3354_s29 = scalar_select %p3353_p4, 1, 0 }
  0xd7   : > { %1354 = vmatprep.subr.bf16.mxu1 %v9422_v41 }
  0xd8   : > { %1314 = vmatpush1.bf16.msra.mxu0 %v9426_v42 }
  0xd9   : > { %1315 = vmatprep.subr.bf16.mxu0 %v9430_v43 }
  0xda   : > { %1355 = vmatpush1.bf16.msra.mxu1 %v9433_v44 }
  0xdb   : > { %865 = vmatmul.mubr.bf16.gmra.mrb[4].mxu0 %v8224_v45  ;;  %978 = vmatmul.mubr.bf16.gmra.mrb[4].mxu1 %v8224_v45 }
  0xdc   : > { %874 = vmatprep.mubr.bf16.mxu0 %v10895_v4  ;;  %987 = vmatprep.mubr.bf16.mxu1 %v10895_v4 }
  0xdd   : > { %1316 = vmatpush1.bf16.msra.mxu0 %v9438_v46  ;;  %1356 = vmatprep.subr.bf16.mxu1 %v9443_v48 }
  0xde   : > { %1317 = vmatprep.subr.bf16.mxu0 %v9441_v47  ;;  %1357 = vmatpush1.bf16.msra.mxu1 %v9446_v49 }
  0xdf   : > { %1358 = vmatprep.subr.bf16.mxu1 %v9448_v50 }
  0xe1   : > { %1318 = vmatpush1.bf16.msra.mxu0 %v9453_v51 }
  0xe2   : > { %1319 = vmatprep.subr.bf16.mxu0 %v9456_v52  ;;  %1359 = vmatpush1.bf16.msra.mxu1 %v9460_v53 }
  0xe3   : > { %875 = vmatmul.mubr.bf16.gmra.mrb[8].mxu0 %v8231_v54  ;;  %988 = vmatmul.mubr.bf16.gmra.mrb[8].mxu1 %v8231_v54 }
  0xe4   : > { %884 = vmatprep.mubr.bf16.mxu0 %v10895_v4  ;;  %997 = vmatprep.mubr.bf16.mxu1 %v10895_v4 }
  0xe5   : > { %1320 = vmatpush1.bf16.msra.mxu0 %v9464_v55  ;;  %1360 = vmatprep.subr.bf16.mxu1 %v9467_v56 }
  0xe6   : > { %1321 = vmatprep.subr.bf16.mxu0 %v9470_v57  ;;  %1361 = vmatpush1.bf16.msra.mxu1 %v9473_v58 }
  0xe7   : > { %1362 = vmatprep.subr.bf16.mxu1 %v9477_v60 }
  0xe9   : > { %1322 = vmatpush1.bf16.msra.mxu0 %v9475_v59 }
  0xea   : > { %1323 = vmatprep.subr.bf16.mxu0 %v9481_v61  ;;  %1363 = vmatpush1.bf16.msra.mxu1 %v9483_v62 }
  0xeb   : > { %885 = vmatmul.mubr.bf16.gmra.mrb[12].mxu0 %v8238_v63  ;;  %998 = vmatmul.mubr.bf16.gmra.mrb[12].mxu1 %v8238_v63 }
  0xec   : > { %894 = vmatprep.mubr.bf16.mxu0 %v10895_v4  ;;  %1007 = vmatprep.mubr.bf16.mxu1 %v10895_v4 }
  0xed   : > { %1324 = vmatpush1.bf16.msra.mxu0 %v9490_v0  ;;  %1364 = vmatprep.subr.bf16.mxu1 %v9493_v1 }
  0xee   : > { %1325 = vmatprep.subr.bf16.mxu0 %v9495_v2  ;;  %1365 = vmatpush1.bf16.msra.mxu1 %v9497_v3 }
  0xef   : > { %1366 = vmatprep.subr.bf16.mxu1 %v9500_v5 }
  0xf1   : > { %1326 = vmatpush1.bf16.msra.mxu0 %v9504_v6 }
  0xf2   : > { %1367 = vmatpush1.bf16.msra.mxu1 %v9508_v7  ;;  %1632 = vmatprep.subr.bf16.mxu0 %v9409_v35 }
  0xf3   : > { %895 = vmatmul.mubr.bf16.gmra.mrb[16].mxu0 %v8245_v8  ;;  %1008 = vmatmul.mubr.bf16.gmra.mrb[16].mxu1 %v8245_v8 }
  0xf4   : > { %904 = vmatprep.mubr.bf16.mxu0 %v10895_v4  ;;  %1017 = vmatprep.mubr.bf16.mxu1 %v10895_v4 }
  0xf5   : > { %1673 = vmatprep.subr.bf16.mxu1 %v9411_v36 }
  0xfb   : > { %905 = vmatmul.mubr.bf16.gmra.mrb[20].mxu0 %v8252_v9  ;;  %1018 = vmatmul.mubr.bf16.gmra.mrb[20].mxu1 %v8252_v9 }
  0xfc   : > { %914 = vmatprep.mubr.bf16.mxu0 %v10895_v4  ;;  %1027 = vmatprep.mubr.bf16.mxu1 %v10895_v4 }
 0x103   : > { %915 = vmatmul.mubr.bf16.gmra.mrb[24].mxu0 %v8259_v10  ;;  %1028 = vmatmul.mubr.bf16.gmra.mrb[24].mxu1 %v8259_v10 }
 0x104   : > { %924 = vmatprep.mubr.bf16.mxu0 %v10895_v4  ;;  %1037 = vmatprep.mubr.bf16.mxu1 %v10895_v4 }
 0x10b   : > { %925 = vmatmul.mubr.bf16.gmra.mrb[28].mxu0 %v8266_v11  ;;  %1038 = vmatmul.mubr.bf16.gmra.mrb[28].mxu1 %v8266_v11 }
 0x10c   : > { %1343 = vmatprep.mubr.bf16.mxu0 %v10895_v4  ;;  %1384 = vmatprep.mubr.bf16.mxu1 %v10895_v4 }
 0x113   : > { %1344 = vmatmul.mubr.bf16.vlgmr.msra.gmra.mrb[32].mxu0 %v1118_v13  ;;  %1385 = vmatmul.mubr.bf16.vlgmr.msra.gmra.mrb[32].mxu1 %v1118_v13 }
 0x114   : > { %1633 = vmatpush1.bf16.msra.mxu0 %v9414_v38  ;;  %1674 = vmatpush1.bf16.msra.mxu1 %v9420_v40 }
 0x115   : > { %1634 = vmatprep.subr.bf16.mxu0 %v9417_v39  ;;  %1675 = vmatprep.subr.bf16.mxu1 %v9422_v41 }
 0x116   : > { %1664 = vmatprep.mubr.bf16.mxu0 %v10895_v4  ;;  %1705 = vmatprep.mubr.bf16.mxu1 %v10895_v4 }
 0x118   : > { %1635 = vmatpush1.bf16.msra.mxu0 %v9426_v42  ;;  %1676 = vmatpush1.bf16.msra.mxu1 %v9433_v44 }
 0x119   : > { %1636 = vmatprep.subr.bf16.mxu0 %v9430_v43  ;;  %1677 = vmatprep.subr.bf16.mxu1 %v9443_v48 }
 0x11c   : > { %1637 = vmatpush1.bf16.msra.mxu0 %v9438_v46  ;;  %1678 = vmatpush1.bf16.msra.mxu1 %v9446_v49 }
 0x11d   : > { %1638 = vmatprep.subr.bf16.mxu0 %v9441_v47  ;;  %1679 = vmatprep.subr.bf16.mxu1 %v9448_v50 }
 0x120   : > { %1639 = vmatpush1.bf16.msra.mxu0 %v9453_v51  ;;  %1680 = vmatpush1.bf16.msra.mxu1 %v9460_v53 }
 0x121   : > { %1640 = vmatprep.subr.bf16.mxu0 %v9456_v52  ;;  %1681 = vmatprep.subr.bf16.mxu1 %v9467_v56 }
 0x124   : > { %1641 = vmatpush1.bf16.msra.mxu0 %v9464_v55  ;;  %1682 = vmatpush1.bf16.msra.mxu1 %v9473_v58 }
 0x125   : > { %1642 = vmatprep.subr.bf16.mxu0 %v9470_v57  ;;  %1683 = vmatprep.subr.bf16.mxu1 %v9477_v60 }
 0x128   : > { %1643 = vmatpush1.bf16.msra.mxu0 %v9475_v59  ;;  %1684 = vmatpush1.bf16.msra.mxu1 %v9483_v62 }
 0x129   : > { %1644 = vmatprep.subr.bf16.mxu0 %v9481_v61  ;;  %1685 = vmatprep.subr.bf16.mxu1 %v9493_v1 }
 0x12c   : > { %1645 = vmatpush1.bf16.msra.mxu0 %v9490_v0  ;;  %1686 = vmatpush1.bf16.msra.mxu1 %v9497_v3 }
 0x12d   : > { %1646 = vmatprep.subr.bf16.mxu0 %v9495_v2  ;;  %1687 = vmatprep.subr.bf16.mxu1 %v9500_v5 }
 0x130   : > { %1647 = vmatpush1.bf16.msra.mxu0 %v9504_v6  ;;  %1688 = vmatpush1.bf16.msra.mxu1 %v9508_v7 }
 0x131   : > { %1954 = vmatprep.subr.bf16.mxu0 %v9409_v35  ;;  %1995 = vmatprep.subr.bf16.mxu1 %v9411_v36 }
 0x1a6   : > { %v9579_v22 = vpop.f32.mrb[0].mxu0  ;;  %v9581_v23 = vpop.f32.mrb[0].mxu1 }
 0x1a7   : > { %v9591_v26 = vpop.f32.mrb[1].mxu0  ;;  %v9593_v27 = vpop.f32.mrb[1].mxu1 }
 0x1a8   : > { %v860_v29 = vpop.f32.mrb[2].mxu0  ;;  %v973_v30 = vpop.f32.mrb[2].mxu1 }
 0x1a9   : > { %v9600_v31 = vadd.f32 %v860_v29, %v9589_v25  ;;  %v862_v32 = vpop.f32.mrb[3].mxu0  ;;  %v9603_v33 = vadd.f32 %v973_v30, %v9577_v21  ;;  %v975_v34 = vpop.f32.mrb[3].mxu1 }
 0x1aa   : > { %v9606_v35 = vadd.f32 %v862_v32, %v9597_v28  ;;  %v9609_v36 = vadd.f32 %v975_v34, %v9585_v24 }
 0x1ae   : > { %v866_v37 = vpop.f32.mrb[4].mxu0  ;;  %v979_v38 = vpop.f32.mrb[4].mxu1 }
 0x1af   : > { %v9612_v39 = vadd.f32 %v866_v37, %v9589_v25  ;;  %v868_v40 = vpop.f32.mrb[5].mxu0  ;;  %v9615_v45 = vadd.f32 %v979_v38, %v9577_v21  ;;  %v981_v54 = vpop.f32.mrb[5].mxu1 }
 0x1b0   : > { %v9618_v63 = vadd.f32 %v868_v40, %v9597_v28  ;;  %v870_v8 = vpop.f32.mrb[6].mxu0  ;;  %v9621_v9 = vadd.f32 %v981_v54, %v9585_v24  ;;  %v983_v10 = vpop.f32.mrb[6].mxu1 }
 0x1b1   : > { %v9624_v11 = vadd.f32 %v870_v8, %v9589_v25  ;;  %v872_v13 = vpop.f32.mrb[7].mxu0  ;;  %v9627_v14 = vadd.f32 %v983_v10, %v9577_v21  ;;  %v985_v19 = vpop.f32.mrb[7].mxu1 }
 0x1b2   : > { %v9630_v29 = vadd.f32 %v872_v13, %v9597_v28  ;;  %v9633_v30 = vadd.f32 %v985_v19, %v9585_v24 }
 0x1b6   : > { %v876_v32 = vpop.f32.mrb[8].mxu0  ;;  %v989_v34 = vpop.f32.mrb[8].mxu1 }
 0x1b7   : > { %v9636_v37 = vadd.f32 %v876_v32, %v9589_v25  ;;  %v878_v38 = vpop.f32.mrb[9].mxu0  ;;  %v9639_v40 = vadd.f32 %v989_v34, %v9577_v21  ;;  %v991_v54 = vpop.f32.mrb[9].mxu1 }
 0x1b8   : > { %v9642_v8 = vadd.f32 %v878_v38, %v9597_v28  ;;  %v880_v10 = vpop.f32.mrb[10].mxu0  ;;  %v9645_v13 = vadd.f32 %v991_v54, %v9585_v24  ;;  %v993_v17 = vpop.f32.mrb[10].mxu1 }
 0x1b9   : > { %v9648_v19 = vadd.f32 %v880_v10, %v9589_v25  ;;  %v882_v20 = vpop.f32.mrb[11].mxu0  ;;  %v9651_v32 = vadd.f32 %v993_v17, %v9577_v21  ;;  %v995_v16 = vpop.f32.mrb[11].mxu1 }
 0x1ba   : > { %10921 = vst [vmem:[#allocation27_spill] sm:$0xff] %v9642_v8  ;;  %10922 = vst [vmem:[#allocation28_spill] sm:$0xff] %v9645_v13  ;;  %v9654_v34 = vadd.f32 %v882_v20, %v9597_v28  ;;  %v9657_v18 = vadd.f32 %v995_v16, %v9585_v24 }
 0x1bb   : > { %10923 = vst [vmem:[#allocation29_spill] sm:$0xff] %v9648_v19  ;;  %10924 = vst [vmem:[#allocation30_spill] sm:$0xff] %v9651_v32 }
 0x1bc   : > { %10925 = vst [vmem:[#allocation31_spill] sm:$0xff] %v9654_v34  ;;  %10926 = vst [vmem:[#allocation32_spill] sm:$0xff] %v9657_v18 }
 0x1be   : > { %v886_v38 = vpop.f32.mrb[12].mxu0  ;;  %v999_v4 = vpop.f32.mrb[12].mxu1 }
 0x1bf   : > { %v9660_v54 = vadd.f32 %v886_v38, %v9589_v25  ;;  %v888_v15 = vpop.f32.mrb[13].mxu0  ;;  %v9663_v10 = vadd.f32 %v999_v4, %v9577_v21  ;;  %v1001_v19 = vpop.f32.mrb[13].mxu1 }
 0x1c0   : > { %v9666_v17 = vadd.f32 %v888_v15, %v9597_v28  ;;  %v890_v32 = vpop.f32.mrb[14].mxu0  ;;  %v9669_v20 = vadd.f32 %v1001_v19, %v9585_v24  ;;  %v1003_v34 = vpop.f32.mrb[14].mxu1 }
 0x1c1   : > { %10927 = vst [vmem:[#allocation33_spill] sm:$0xff] %v9660_v54  ;;  %10928 = vst [vmem:[#allocation34_spill] sm:$0xff] %v9663_v10  ;;  %v9672_v16 = vadd.f32 %v890_v32, %v9589_v25  ;;  %v892_v18 = vpop.f32.mrb[15].mxu0  ;;  %v9675_v38 = vadd.f32 %v1003_v34, %v9577_v21  ;;  %v1005_v54 = vpop.f32.mrb[15].mxu1 }
 0x1c2   : > { %10929 = vst [vmem:[#allocation35_spill] sm:$0xff] %v9666_v17  ;;  %10930 = vst [vmem:[#allocation36_spill] sm:$0xff] %v9669_v20  ;;  %v9678_v4 = vadd.f32 %v892_v18, %v9597_v28  ;;  %v9681_v10 = vadd.f32 %v1005_v54, %v9585_v24 }
 0x1c3   : > { %10931 = vst [vmem:[#allocation37_spill] sm:$0xff] %v9672_v16  ;;  %10932 = vst [vmem:[#allocation38_spill] sm:$0xff] %v9675_v38 }
 0x1c4   : > { %10933 = vst [vmem:[#allocation39_spill] sm:$0xff] %v9678_v4  ;;  %10934 = vst [vmem:[#allocation40_spill] sm:$0xff] %v9681_v10 }
 0x1c6   : > { %v896_v15 = vpop.f32.mrb[16].mxu0  ;;  %v1009_v17 = vpop.f32.mrb[16].mxu1 }
 0x1c7   : > { %v9684_v19 = vadd.f32 %v896_v15, %v9589_v25  ;;  %v898_v20 = vpop.f32.mrb[17].mxu0  ;;  %v9687_v32 = vadd.f32 %v1009_v17, %v9577_v21  ;;  %v1011_v16 = vpop.f32.mrb[17].mxu1 }
 0x1c8   : > { %v9690_v34 = vadd.f32 %v898_v20, %v9597_v28  ;;  %v900_v38 = vpop.f32.mrb[18].mxu0  ;;  %v9693_v18 = vadd.f32 %v1011_v16, %v9585_v24  ;;  %v1013_v4 = vpop.f32.mrb[18].mxu1 }
 0x1c9   : > { %10935 = vst [vmem:[#allocation41_spill] sm:$0xff] %v9684_v19  ;;  %10936 = vst [vmem:[#allocation42_spill] sm:$0xff] %v9687_v32  ;;  %v9696_v54 = vadd.f32 %v900_v38, %v9589_v25  ;;  %v902_v10 = vpop.f32.mrb[19].mxu0  ;;  %v9699_v15 = vadd.f32 %v1013_v4, %v9577_v21  ;;  %v1015_v19 = vpop.f32.mrb[19].mxu1 }
 0x1ca   : > { %10937 = vst [vmem:[#allocation43_spill] sm:$0xff] %v9690_v34  ;;  %10938 = vst [vmem:[#allocation44_spill] sm:$0xff] %v9693_v18  ;;  %v9702_v17 = vadd.f32 %v902_v10, %v9597_v28  ;;  %v9705_v32 = vadd.f32 %v1015_v19, %v9585_v24 }
 0x1cb   : > { %10939 = vst [vmem:[#allocation45_spill] sm:$0xff] %v9696_v54  ;;  %10940 = vst [vmem:[#allocation46_spill] sm:$0xff] %v9699_v15 }
 0x1cc   : > { %10941 = vst [vmem:[#allocation47_spill] sm:$0xff] %v9702_v17  ;;  %10942 = vst [vmem:[#allocation48_spill] sm:$0xff] %v9705_v32 }
 0x1ce   : > { %v906_v20 = vpop.f32.mrb[20].mxu0  ;;  %v1019_v34 = vpop.f32.mrb[20].mxu1 }
 0x1cf   : > { %v9708_v16 = vadd.f32 %v906_v20, %v9589_v25  ;;  %v908_v18 = vpop.f32.mrb[21].mxu0  ;;  %v9711_v38 = vadd.f32 %v1019_v34, %v9577_v21  ;;  %v1021_v54 = vpop.f32.mrb[21].mxu1 }
 0x1d0   : > { %v9714_v4 = vadd.f32 %v908_v18, %v9597_v28  ;;  %v910_v15 = vpop.f32.mrb[22].mxu0  ;;  %v9717_v10 = vadd.f32 %v1021_v54, %v9585_v24  ;;  %v1023_v17 = vpop.f32.mrb[22].mxu1 }
 0x1d1   : > { %10943 = vst [vmem:[#allocation49_spill] sm:$0xff] %v9708_v16  ;;  %10944 = vst [vmem:[#allocation50_spill] sm:$0xff] %v9711_v38  ;;  %v9720_v19 = vadd.f32 %v910_v15, %v9589_v25  ;;  %v912_v32 = vpop.f32.mrb[23].mxu0  ;;  %v9723_v20 = vadd.f32 %v1023_v17, %v9577_v21  ;;  %v1025_v16 = vpop.f32.mrb[23].mxu1 }
 0x1d2   : > { %10945 = vst [vmem:[#allocation51_spill] sm:$0xff] %v9714_v4  ;;  %10946 = vst [vmem:[#allocation52_spill] sm:$0xff] %v9717_v10  ;;  %v9726_v34 = vadd.f32 %v912_v32, %v9597_v28  ;;  %v9729_v38 = vadd.f32 %v1025_v16, %v9585_v24 }
 0x1d3   : > { %10947 = vst [vmem:[#allocation53_spill] sm:$0xff] %v9720_v19  ;;  %10948 = vst [vmem:[#allocation54_spill] sm:$0xff] %v9723_v20 }
 0x1d4   : > { %10949 = vst [vmem:[#allocation55_spill] sm:$0xff] %v9726_v34  ;;  %10950 = vst [vmem:[#allocation56_spill] sm:$0xff] %v9729_v38 }
 0x1d6   : > { %v916_v18 = vpop.f32.mrb[24].mxu0  ;;  %v1029_v4 = vpop.f32.mrb[24].mxu1 }
 0x1d7   : > { %v9732_v54 = vadd.f32 %v916_v18, %v9589_v25  ;;  %v918_v10 = vpop.f32.mrb[25].mxu0  ;;  %v9735_v15 = vadd.f32 %v1029_v4, %v9577_v21  ;;  %v1031_v19 = vpop.f32.mrb[25].mxu1 }
 0x1d8   : > { %v9738_v17 = vadd.f32 %v918_v10, %v9597_v28  ;;  %v920_v20 = vpop.f32.mrb[26].mxu0  ;;  %v9741_v32 = vadd.f32 %v1031_v19, %v9585_v24  ;;  %v1033_v34 = vpop.f32.mrb[26].mxu1 }
 0x1d9   : > { %10951 = vst [vmem:[#allocation57_spill] sm:$0xff] %v9732_v54  ;;  %10952 = vst [vmem:[#allocation58_spill] sm:$0xff] %v9735_v15  ;;  %v9744_v16 = vadd.f32 %v920_v20, %v9589_v25  ;;  %v922_v38 = vpop.f32.mrb[27].mxu0  ;;  %v9747_v18 = vadd.f32 %v1033_v34, %v9577_v21  ;;  %v1035_v54 = vpop.f32.mrb[27].mxu1 }
 0x1da   : > { %10953 = vst [vmem:[#allocation59_spill] sm:$0xff] %v9738_v17  ;;  %10954 = vst [vmem:[#allocation60_spill] sm:$0xff] %v9741_v32  ;;  %v9750_v4 = vadd.f32 %v922_v38, %v9597_v28  ;;  %v9753_v15 = vadd.f32 %v1035_v54, %v9585_v24 }
 0x1db   : > { %10955 = vst [vmem:[#allocation61_spill] sm:$0xff] %v9744_v16  ;;  %10956 = vst [vmem:[#allocation62_spill] sm:$0xff] %v9747_v18 }
 0x1dc   : > { %10957 = vst [vmem:[#allocation63_spill] sm:$0xff] %v9750_v4  ;;  %10958 = vst [vmem:[#allocation64_spill] sm:$0xff] %v9753_v15 }
 0x1de   : > { %v926_v10 = vpop.f32.mrb[28].mxu0  ;;  %v1039_v17 = vpop.f32.mrb[28].mxu1 }
 0x1df   : > { %v9756_v19 = vadd.f32 %v926_v10, %v9589_v25  ;;  %v928_v32 = vpop.f32.mrb[29].mxu0  ;;  %v9759_v20 = vadd.f32 %v1039_v17, %v9577_v21  ;;  %v1041_v16 = vpop.f32.mrb[29].mxu1 }
 0x1e0   : > { %v9762_v34 = vadd.f32 %v928_v32, %v9597_v28  ;;  %v930_v18 = vpop.f32.mrb[30].mxu0  ;;  %v9765_v38 = vadd.f32 %v1041_v16, %v9585_v24  ;;  %v1043_v4 = vpop.f32.mrb[30].mxu1  ;;  %v857_v32 = vadd.f32 %v9579_v22, %v9589_v25  ;;  %v970_v16 = vadd.f32 %v9581_v23, %v9577_v21 }
 0x1e1   : > { %10959 = vst [vmem:[#allocation65_spill] sm:$0xff] %v9756_v19  ;;  %10960 = vst [vmem:[#allocation66_spill] sm:$0xff] %v9759_v20  ;;  %v9768_v54 = vadd.f32 %v930_v18, %v9589_v25  ;;  %v932_v15 = vpop.f32.mrb[31].mxu0  ;;  %v9771_v10 = vadd.f32 %v1043_v4, %v9577_v21  ;;  %v1045_v19 = vpop.f32.mrb[31].mxu1  ;;  %v859_v18 = vadd.f32 %v9591_v26, %v9597_v28 }
 0x1e2   : > { %10961 = vst [vmem:[#allocation67_spill] sm:$0xff] %v9762_v34  ;;  %10962 = vst [vmem:[#allocation68_spill] sm:$0xff] %v9765_v38  ;;  %v9774_v17 = vadd.f32 %v932_v15, %v9597_v28  ;;  %v9777_v20 = vadd.f32 %v1045_v19, %v9585_v24  ;;  %v972_v4 = vadd.f32 %v9593_v27, %v9585_v24 }
 0x1e3   : > { %10963 = vst [vmem:[#allocation69_spill] sm:$0xff] %v9768_v54  ;;  %10964 = vst [vmem:[#allocation70_spill] sm:$0xff] %v9771_v10 }
 0x1e4   : > { %10965 = vst [vmem:[#allocation71_spill] sm:$0xff] %v9774_v17  ;;  %10966 = vst [vmem:[#allocation72_spill] sm:$0xff] %v9777_v20 }
 0x1e6   : > { %v1345_v10 = vpop.f32.mrb[32].mxu0  ;;  %v1386_v54 = vpop.f32.mrb[32].mxu1 }
 0x1e7   : > { %v1393_v38 = vadd.f32 %v1345_v10, %v857_v32  ;;  %v1395_v15 = vadd.f32 %v1386_v54, %v970_v16  ;;  %v1347_v17 = vpop.f32.mrb[33].mxu0  ;;  %v1388_v34 = vpop.f32.mrb[33].mxu1  ;;  %v1424_v10 = vstv %s1423_s13  ;;  %s3674_s13 = sadd.s32 7, %s9788_s21 }
 0x1e8   : > { %v1394_v19 = vadd.f32 %v1347_v17, %v859_v18  ;;  %v1396_v20 = vadd.f32 %v1388_v34, %v972_v4  ;;  %v1349_v13 = vpop.f32.mrb[34].mxu0  ;;  %v1390_v22 = vpop.f32.mrb[34].mxu1  ;;  %v1113_v34 = vld [vmem:[#allocation3] sm:$0xff]  ;;  %vm1425_vm0 = vcmp.eq.s32.totalorder %v1424_v10, 1  ;;  %v9855_v10 = vld [vmem:[#allocation11 + $0x24] ss:$16 sps:$4 sm:$0xff]  }
 0x1e9   : > { %v7400_v25 = vmul.f32 -1.442695, %v1393_v38  ;;  %v1350_v8 = vpop.f32.mrb[35].mxu0  ;;  %v1391_v21 = vpop.f32.mrb[35].mxu1  ;;  %p3675_p13 = scmp.lt.s32.totalorder %s3674_s13, 20 }
 0x1ea   : > { %v7401_v23 = vmul.f32 -1.442695, %v1394_v19  ;;  %v7402_v26 = vmul.f32 -1.442695, %v1396_v20 }
 0x1eb   : > { %8524 = vpow2.f32 %v7400_v25  ;;  %s3676_s28 = scalar_select %p3675_p13, 1, 0 }
 0x1ec   : > { %8526 = vpow2.f32 %v7401_v23  ;;  %v8780_v23 = vld [vmem:[#allocation11] ss:$16 sps:$4 sm:$0xff]  }
 0x1ed   : > { %8528 = vpow2.f32 %v7402_v26  ;;  %v8781_v26 = vld [vmem:[#allocation11 + $0x8] ss:$16 sps:$4 sm:$0xff]  }
 0x1ee   : > { %8530 = vtanh.f32 %v1395_v15 }
 0x1f5   : > { %v8525_v28 = vpop.eup %8524 }
 0x1f6   : > { %v8527_v24 = vpop.eup %8526  ;;  %v1400_v27 = vadd.f32 1.0, %v8525_v28  ;;  %v8782_v28 = vld [vmem:[#allocation11 + $0x24] ss:$16 sps:$4 sm:$0xff]  }
 0x1f7   : > { %v1406_v54 = vadd.f32 1.0, %v8527_v24  ;;  %v8529_v13 = vpop.eup %8528  ;;  %v10967_v24 = vmov 0  }
 0x1f8   : > { %8532 = vrcp.f32 %v1400_v27  ;;  %v8531_v8 = vpop.eup %8530  ;;  %v1413_v32 = vadd.f32 1.0, %v8529_v13  ;;  %v9843_v13 = vld [vmem:[#allocation11 + $0x4] ss:$16 sps:$4 sm:$0xff]  }
 0x1f9   : > { %8534 = vrcp.f32 %v1406_v54 }
 0x1fa   : > { %8536 = vrcp.f32 %v1413_v32  ;;  %v9861_v32 = vld [vmem:[#allocation11 + $0x28] ss:$16 sps:$4 sm:$0xff]  }
 0x202   : > { %v8533_v38 = vpop.eup %8532 }
 0x203   : > { %v8535_v17 = vpop.eup %8534  ;;  %v1417_v20 = vmul.f32 %v8533_v38, %v8531_v8  ;;  %v9845_v8 = vld [vmem:[#allocation11 + $0xc] ss:$16 sps:$4 sm:$0xff]   ;;  %v9849_v38 = vld [vmem:[#allocation11 + $0x8] ss:$16 sps:$4 sm:$0xff]  }
 0x204   : > { %v1416_v16 = vmul.f32 %v8535_v17, %v1113_v34  ;;  %v8537_v15 = vpop.eup %8536  ;;  %v9857_v17 = vld [vmem:[#allocation11 + $0x2c] ss:$16 sps:$4 sm:$0xff]  }
 0x206   : > { %v1418_v18 = vadd.f32 %v1417_v20, %v1416_v16  ;;  %v9859_v20 = vld [vmem:[#allocation11 + $0x20] ss:$16 sps:$4 sm:$0xff]   ;;  %v9867_v16 = vld [vmem:[#allocation11 + $0x44] ss:$16 sps:$4 sm:$0xff]  }
 0x208   : > { %8538 = vtanh.f32 %v1418_v18  ;;  %v9791_v4 = vsel %vm1425_vm0, %v1418_v18, %v1113_v34  ;;  %v9847_v34 = vld [vmem:[#allocation11] ss:$16 sps:$4 sm:$0xff]   ;;  %v9869_v18 = vld [vmem:[#allocation11 + $0x4c] ss:$16 sps:$4 sm:$0xff]  }
 0x212   : > { %v8539_v19 = vpop.eup %8538 }
 0x213   : > { %v1420_v22 = vmul.f32 %v8539_v19, %v8537_v15  ;;  %v9873_v15 = vld [vmem:[#allocation11 + $0x48] ss:$16 sps:$4 sm:$0xff]   ;;  %v9879_v19 = vld [vmem:[#allocation11 + $0x64] ss:$16 sps:$4 sm:$0xff]  }
 0x215   : > { %v9794_v25 = vsel %vm1425_vm0, %v1420_v22, %v9529_v12  ;;  %v9881_v22 = vld [vmem:[#allocation11 + $0x6c] ss:$16 sps:$4 sm:$0xff]  }
 0x216   : > { %v1430_v21 = vpack.c.bf16 %v9794_v25, %v9794_v25 }
 0x218   : > { %1431 = vst [vmem:[#allocation5] sm:$0xf] %v1430_v21  ;;  %1665 = vmatmul.mubr.bf16.vlgmr.msra.gmra.mrb[36].mxu0 %v1430_v21  ;;  %1706 = vmatmul.mubr.bf16.vlgmr.msra.gmra.mrb[36].mxu1 %v1430_v21  ;;  %v9885_v21 = vld [vmem:[#allocation11 + $0x68] ss:$16 sps:$4 sm:$0xff]  }
 0x219   : > { %1955 = vmatpush1.bf16.msra.mxu0 %v8780_v23  ;;  %1996 = vmatpush1.bf16.msra.mxu1 %v8781_v26  ;;  %v9891_v23 = vld [vmem:[#allocation11 + $0x84] ss:$16 sps:$4 sm:$0xff]   ;;  %v9893_v26 = vld [vmem:[#allocation11 + $0x8c] ss:$16 sps:$4 sm:$0xff]  }
 0x21a   : > { %1956 = vmatprep.subr.bf16.mxu0 %v8782_v28  ;;  %1997 = vmatprep.subr.bf16.mxu1 %v9422_v41  ;;  %v9895_v28 = vld [vmem:[#allocation11 + $0x80] ss:$16 sps:$4 sm:$0xff]  }
 0x21b   : > { %1986 = vmatprep.mubr.bf16.mxu0 %v10967_v24  ;;  %2027 = vmatprep.mubr.bf16.mxu1 %v10967_v24 }
 0x21d   : > { %1957 = vmatpush1.bf16.msra.mxu0 %v9426_v42  ;;  %1998 = vmatpush1.bf16.msra.mxu1 %v9433_v44 }
 0x21e   : > { %1958 = vmatprep.subr.bf16.mxu0 %v9430_v43  ;;  %1999 = vmatprep.subr.bf16.mxu1 %v9443_v48 }
 0x221   : > { %1959 = vmatpush1.bf16.msra.mxu0 %v9438_v46  ;;  %2000 = vmatpush1.bf16.msra.mxu1 %v9446_v49 }
 0x222   : > { %1960 = vmatprep.subr.bf16.mxu0 %v9441_v47  ;;  %2001 = vmatprep.subr.bf16.mxu1 %v9448_v50 }
 0x225   : > { %1961 = vmatpush1.bf16.msra.mxu0 %v9453_v51  ;;  %2002 = vmatpush1.bf16.msra.mxu1 %v9460_v53 }
 0x226   : > { %1962 = vmatprep.subr.bf16.mxu0 %v9456_v52  ;;  %2003 = vmatprep.subr.bf16.mxu1 %v9467_v56 }
 0x229   : > { %1963 = vmatpush1.bf16.msra.mxu0 %v9464_v55  ;;  %2004 = vmatpush1.bf16.msra.mxu1 %v9473_v58 }
 0x22a   : > { %1964 = vmatprep.subr.bf16.mxu0 %v9470_v57  ;;  %2005 = vmatprep.subr.bf16.mxu1 %v9477_v60 }
 0x22d   : > { %1965 = vmatpush1.bf16.msra.mxu0 %v9475_v59  ;;  %2006 = vmatpush1.bf16.msra.mxu1 %v9483_v62 }
 0x22e   : > { %1966 = vmatprep.subr.bf16.mxu0 %v9481_v61  ;;  %2007 = vmatprep.subr.bf16.mxu1 %v9493_v1 }
 0x231   : > { %1967 = vmatpush1.bf16.msra.mxu0 %v9490_v0  ;;  %2008 = vmatpush1.bf16.msra.mxu1 %v9497_v3 }
 0x232   : > { %1968 = vmatprep.subr.bf16.mxu0 %v9495_v2  ;;  %2009 = vmatprep.subr.bf16.mxu1 %v9500_v5  ;;  %v1745_v2 = vstv %s1744_s5  ;;  %s3996_s5 = sadd.s32 8, %s9788_s21 }
 0x233   : > { %vm1746_vm1 = vcmp.eq.s32.totalorder %v1745_v2, 1  ;;  %p3997_p2 = scmp.lt.s32.totalorder %s3996_s5, 20 }
 0x235   : > { %1969 = vmatpush1.bf16.msra.mxu0 %v9504_v6  ;;  %2010 = vmatpush1.bf16.msra.mxu1 %v9508_v7  ;;  %s3998_s9 = scalar_select %p3997_p2, 1, 0 }
 0x236   : > { %2276 = vmatprep.subr.bf16.mxu0 %v9843_v13  ;;  %2317 = vmatprep.subr.bf16.mxu1 %v9845_v8 }
 0x2eb   : > { %v1666_v41 = vpop.f32.mrb[36].mxu0  ;;  %v1707_v42 = vpop.f32.mrb[36].mxu1 }
 0x2ec   : > { %v1714_v43 = vadd.f32 %v1666_v41, %v9600_v31  ;;  %v1716_v44 = vadd.f32 %v1707_v42, %v9603_v33  ;;  %v1668_v46 = vpop.f32.mrb[37].mxu0  ;;  %v1709_v47 = vpop.f32.mrb[37].mxu1  ;;  %v9897_v41 = vld [vmem:[#allocation11 + $0x88] ss:$16 sps:$4 sm:$0xff]   ;;  %v9903_v42 = vld [vmem:[#allocation11 + $0xa4] ss:$16 sps:$4 sm:$0xff]  }
 0x2ed   : > { %v1715_v48 = vadd.f32 %v1668_v46, %v9606_v35  ;;  %v1717_v49 = vadd.f32 %v1709_v47, %v9609_v36  ;;  %v1670_v50 = vpop.f32.mrb[38].mxu0  ;;  %v1711_v51 = vpop.f32.mrb[38].mxu1  ;;  %v9909_v46 = vld [vmem:[#allocation11 + $0xa8] ss:$16 sps:$4 sm:$0xff]   ;;  %v9915_v47 = vld [vmem:[#allocation11 + $0xc4] ss:$16 sps:$4 sm:$0xff]  }
 0x2ee   : > { %v7436_v52 = vmul.f32 -1.442695, %v1714_v43  ;;  %v1671_v53 = vpop.f32.mrb[39].mxu0  ;;  %v1712_v55 = vpop.f32.mrb[39].mxu1  ;;  %v9905_v43 = vld [vmem:[#allocation11 + $0xac] ss:$16 sps:$4 sm:$0xff]  }
 0x2ef   : > { %v7437_v56 = vmul.f32 -1.442695, %v1715_v48  ;;  %v7438_v57 = vmul.f32 -1.442695, %v1717_v49  ;;  %v9917_v48 = vld [vmem:[#allocation11 + $0xcc] ss:$16 sps:$4 sm:$0xff]  }
 0x2f0   : > { %8540 = vpow2.f32 %v7436_v52  ;;  %v9919_v49 = vld [vmem:[#allocation11 + $0xc0] ss:$16 sps:$4 sm:$0xff]   ;;  %v9921_v50 = vld [vmem:[#allocation11 + $0xc8] ss:$16 sps:$4 sm:$0xff]   ;;  %v9927_v51 = vld [vmem:[#allocation11 + $0xe4] ss:$16 sps:$4 sm:$0xff]  }
 0x2f1   : > { %8542 = vpow2.f32 %v7437_v56  ;;  %v9929_v52 = vld [vmem:[#allocation11 + $0xec] ss:$16 sps:$4 sm:$0xff]   ;;  %v9931_v53 = vld [vmem:[#allocation11 + $0xe0] ss:$16 sps:$4 sm:$0xff]   ;;  %v9933_v55 = vld [vmem:[#allocation11 + $0xe8] ss:$16 sps:$4 sm:$0xff]  }
 0x2f2   : > { %8544 = vpow2.f32 %v7438_v57 }
 0x2f3   : > { %8546 = vtanh.f32 %v1716_v44  ;;  %v9907_v44 = vld [vmem:[#allocation11 + $0xa0] ss:$16 sps:$4 sm:$0xff]  }
 0x2fa   : > { %v8541_v58 = vpop.eup %8540 }
 0x2fb   : > { %v8543_v59 = vpop.eup %8542  ;;  %v1721_v60 = vadd.f32 1.0, %v8541_v58 }
 0x2fc   : > { %v1727_v61 = vadd.f32 1.0, %v8543_v59  ;;  %v8545_v62 = vpop.eup %8544 }
 0x2fd   : > { %8548 = vrcp.f32 %v1721_v60  ;;  %v8547_v0 = vpop.eup %8546  ;;  %v1734_v6 = vadd.f32 1.0, %v8545_v62 }
 0x2fe   : > { %8550 = vrcp.f32 %v1727_v61 }
 0x2ff   : > { %8552 = vrcp.f32 %v1734_v6 }
 0x307   : > { %v8549_v1 = vpop.eup %8548 }
 0x308   : > { %v8551_v3 = vpop.eup %8550  ;;  %v1738_v5 = vmul.f32 %v8549_v1, %v8547_v0 }
 0x309   : > { %v1737_v7 = vmul.f32 %v8551_v3, %v9791_v4  ;;  %v8553_v33 = vpop.eup %8552 }
 0x30b   : > { %v1739_v12 = vadd.f32 %v1738_v5, %v1737_v7 }
 0x30d   : > { %8554 = vtanh.f32 %v1739_v12  ;;  %v9834_v31 = vsel %vm1746_vm1, %v1739_v12, %v9791_v4  ;;  %v9871_v4 = vld [vmem:[#allocation11 + $0x40] ss:$16 sps:$4 sm:$0xff]  }
 0x317   : > { %v8555_v35 = vpop.eup %8554 }
 0x318   : > { %v1741_v36 = vmul.f32 %v8555_v35, %v8553_v33 }
 0x31a   : > { %v9837_v27 = vsel %vm1746_vm1, %v1741_v36, %v9794_v25  ;;  %v9883_v25 = vld [vmem:[#allocation11 + $0x60] ss:$16 sps:$4 sm:$0xff]  }
 0x31b   : > { %v1751_v54 = vpack.c.bf16 %v9837_v27, %v9837_v27 }
 0x31d   : > { %1753 = vst [vmem:[#allocation5 + $0x4] sm:$0xf] %v1751_v54  ;;  %1987 = vmatmul.mubr.bf16.vlgmr.msra.gmra.mrb[40].mxu0 %v1751_v54  ;;  %2028 = vmatmul.mubr.bf16.vlgmr.msra.gmra.mrb[40].mxu1 %v1751_v54  ;;  %v2067_v54 = vstv %s2066_s19  ;;  %s4318_s19 = sadd.s32 9, %s9788_s21 }
 0x31e   : > { %2308 = vmatprep.mubr.bf16.mxu0 %v10967_v24  ;;  %2349 = vmatprep.mubr.bf16.mxu1 %v10967_v24  ;;  %vm2068_vm2 = vcmp.eq.s32.totalorder %v2067_v54, 1  ;;  %p4319_p12 = scmp.lt.s32.totalorder %s4318_s19, 20 }
 0x31f   : > { %2277 = vmatpush1.bf16.msra.mxu0 %v9847_v34  ;;  %2318 = vmatpush1.bf16.msra.mxu1 %v9849_v38 }
 0x320   : > { %2278 = vmatprep.subr.bf16.mxu0 %v9855_v10  ;;  %2319 = vmatprep.subr.bf16.mxu1 %v9857_v17  ;;  %s4320_s26 = scalar_select %p4319_p12, 1, 0 }
 0x323   : > { %2279 = vmatpush1.bf16.msra.mxu0 %v9859_v20  ;;  %2320 = vmatpush1.bf16.msra.mxu1 %v9861_v32 }
 0x324   : > { %2280 = vmatprep.subr.bf16.mxu0 %v9867_v16  ;;  %2321 = vmatprep.subr.bf16.mxu1 %v9869_v18 }
 0x327   : > { %2281 = vmatpush1.bf16.msra.mxu0 %v9871_v4  ;;  %2322 = vmatpush1.bf16.msra.mxu1 %v9873_v15 }
 0x328   : > { %2282 = vmatprep.subr.bf16.mxu0 %v9879_v19  ;;  %2323 = vmatprep.subr.bf16.mxu1 %v9881_v22 }
 0x32b   : > { %2283 = vmatpush1.bf16.msra.mxu0 %v9883_v25  ;;  %2324 = vmatpush1.bf16.msra.mxu1 %v9885_v21 }
 0x32c   : > { %2284 = vmatprep.subr.bf16.mxu0 %v9891_v23  ;;  %2325 = vmatprep.subr.bf16.mxu1 %v9893_v26 }
 0x32f   : > { %2285 = vmatpush1.bf16.msra.mxu0 %v9895_v28  ;;  %2326 = vmatpush1.bf16.msra.mxu1 %v9897_v41 }
 0x330   : > { %2286 = vmatprep.subr.bf16.mxu0 %v9903_v42  ;;  %2327 = vmatprep.subr.bf16.mxu1 %v9905_v43 }
 0x333   : > { %2287 = vmatpush1.bf16.msra.mxu0 %v9907_v44  ;;  %2328 = vmatpush1.bf16.msra.mxu1 %v9909_v46 }
 0x334   : > { %2288 = vmatprep.subr.bf16.mxu0 %v9915_v47  ;;  %2329 = vmatprep.subr.bf16.mxu1 %v9917_v48 }
 0x337   : > { %2289 = vmatpush1.bf16.msra.mxu0 %v9919_v49  ;;  %2330 = vmatpush1.bf16.msra.mxu1 %v9921_v50 }
 0x338   : > { %2290 = vmatprep.subr.bf16.mxu0 %v9927_v51  ;;  %2331 = vmatprep.subr.bf16.mxu1 %v9929_v52 }
 0x33b   : > { %2291 = vmatpush1.bf16.msra.mxu0 %v9931_v53  ;;  %2332 = vmatpush1.bf16.msra.mxu1 %v9933_v55 }
 0x33c   : > { %2598 = vmatprep.subr.bf16.mxu0 %v9843_v13  ;;  %2639 = vmatprep.subr.bf16.mxu1 %v9845_v8 }
 0x3f0   : > { %v1988_v56 = vpop.f32.mrb[40].mxu0  ;;  %v2029_v57 = vpop.f32.mrb[40].mxu1 }
 0x3f1   : > { %v2036_v58 = vadd.f32 %v1988_v56, %v9612_v39  ;;  %v2038_v59 = vadd.f32 %v2029_v57, %v9615_v45  ;;  %v1990_v60 = vpop.f32.mrb[41].mxu0  ;;  %v2031_v61 = vpop.f32.mrb[41].mxu1 }
 0x3f2   : > { %v2037_v62 = vadd.f32 %v1990_v60, %v9618_v63  ;;  %v2039_v0 = vadd.f32 %v2031_v61, %v9621_v9  ;;  %v1992_v1 = vpop.f32.mrb[42].mxu0  ;;  %v2033_v2 = vpop.f32.mrb[42].mxu1 }
 0x3f3   : > { %v7471_v3 = vmul.f32 -1.442695, %v2036_v58  ;;  %v1993_v5 = vpop.f32.mrb[43].mxu0  ;;  %v2034_v6 = vpop.f32.mrb[43].mxu1 }
 0x3f4   : > { %v7472_v7 = vmul.f32 -1.442695, %v2037_v62  ;;  %v7473_v12 = vmul.f32 -1.442695, %v2039_v0 }
 0x3f5   : > { %8556 = vpow2.f32 %v7471_v3 }
 0x3f6   : > { %8558 = vpow2.f32 %v7472_v7 }
 0x3f7   : > { %8560 = vpow2.f32 %v7473_v12 }
 0x3f8   : > { %8562 = vtanh.f32 %v2038_v59 }
 0x3ff   : > { %v8557_v33 = vpop.eup %8556 }
 0x400   : > { %v8559_v39 = vpop.eup %8558  ;;  %v2043_v35 = vadd.f32 1.0, %v8557_v33 }
 0x401   : > { %v2049_v45 = vadd.f32 1.0, %v8559_v39  ;;  %v8561_v63 = vpop.eup %8560 }
 0x402   : > { %8564 = vrcp.f32 %v2043_v35  ;;  %v8563_v9 = vpop.eup %8562  ;;  %v2056_v58 = vadd.f32 1.0, %v8561_v63 }
 0x403   : > { %8566 = vrcp.f32 %v2049_v45 }
 0x404   : > { %8568 = vrcp.f32 %v2056_v58 }
 0x40c   : > { %v8565_v36 = vpop.eup %8564 }
 0x40d   : > { %v8567_v56 = vpop.eup %8566  ;;  %v2060_v57 = vmul.f32 %v8565_v36, %v8563_v9 }
 0x40e   : > { %v2059_v60 = vmul.f32 %v8567_v56, %v9834_v31  ;;  %v8569_v62 = vpop.eup %8568 }
 0x410   : > { %v2061_v61 = vadd.f32 %v2060_v57, %v2059_v60 }
 0x412   : > { %8570 = vtanh.f32 %v2061_v61  ;;  %v9948_v59 = vsel %vm2068_vm2, %v2061_v61, %v9834_v31  ;;  %v2389_v61 = vstv %s2388_s20  ;;  %s4640_s20 = sadd.s32 10, %s9788_s21 }
 0x413   : > { %vm2390_vm3 = vcmp.eq.s32.totalorder %v2389_v61, 1  ;;  %p4641_p1 = scmp.lt.s32.totalorder %s4640_s20, 20 }
 0x415   : > { %s4642_s25 = scalar_select %p4641_p1, 1, 0 }
 0x41c   : > { %v8571_v0 = vpop.eup %8570 }
 0x41d   : > { %v2063_v1 = vmul.f32 %v8571_v0, %v8569_v62 }
 0x41f   : > { %v9951_v2 = vsel %vm2068_vm2, %v2063_v1, %v9837_v27 }
 0x420   : > { %v2073_v3 = vpack.c.bf16 %v9951_v2, %v9951_v2 }
 0x422   : > { %2075 = vst [vmem:[#allocation5 + $0x8] sm:$0xf] %v2073_v3  ;;  %2309 = vmatmul.mubr.bf16.vlgmr.msra.gmra.mrb[44].mxu0 %v2073_v3  ;;  %2350 = vmatmul.mubr.bf16.vlgmr.msra.gmra.mrb[44].mxu1 %v2073_v3 }
 0x423   : > { %2599 = vmatpush1.bf16.msra.mxu0 %v9847_v34  ;;  %2640 = vmatpush1.bf16.msra.mxu1 %v9849_v38 }
 0x424   : > { %2600 = vmatprep.subr.bf16.mxu0 %v9855_v10  ;;  %2641 = vmatprep.subr.bf16.mxu1 %v9857_v17 }
 0x425   : > { %2630 = vmatprep.mubr.bf16.mxu0 %v10967_v24  ;;  %2671 = vmatprep.mubr.bf16.mxu1 %v10967_v24 }
 0x427   : > { %2601 = vmatpush1.bf16.msra.mxu0 %v9859_v20  ;;  %2642 = vmatpush1.bf16.msra.mxu1 %v9861_v32 }
 0x428   : > { %2602 = vmatprep.subr.bf16.mxu0 %v9867_v16  ;;  %2643 = vmatprep.subr.bf16.mxu1 %v9869_v18 }
 0x42b   : > { %2603 = vmatpush1.bf16.msra.mxu0 %v9871_v4  ;;  %2644 = vmatpush1.bf16.msra.mxu1 %v9873_v15 }
 0x42c   : > { %2604 = vmatprep.subr.bf16.mxu0 %v9879_v19  ;;  %2645 = vmatprep.subr.bf16.mxu1 %v9881_v22 }
 0x42f   : > { %2605 = vmatpush1.bf16.msra.mxu0 %v9883_v25  ;;  %2646 = vmatpush1.bf16.msra.mxu1 %v9885_v21 }
 0x430   : > { %2606 = vmatprep.subr.bf16.mxu0 %v9891_v23  ;;  %2647 = vmatprep.subr.bf16.mxu1 %v9893_v26 }
 0x433   : > { %2607 = vmatpush1.bf16.msra.mxu0 %v9895_v28  ;;  %2648 = vmatpush1.bf16.msra.mxu1 %v9897_v41 }
 0x434   : > { %2608 = vmatprep.subr.bf16.mxu0 %v9903_v42  ;;  %2649 = vmatprep.subr.bf16.mxu1 %v9905_v43 }
 0x437   : > { %2609 = vmatpush1.bf16.msra.mxu0 %v9907_v44  ;;  %2650 = vmatpush1.bf16.msra.mxu1 %v9909_v46 }
 0x438   : > { %2610 = vmatprep.subr.bf16.mxu0 %v9915_v47  ;;  %2651 = vmatprep.subr.bf16.mxu1 %v9917_v48 }
 0x43b   : > { %2611 = vmatpush1.bf16.msra.mxu0 %v9919_v49  ;;  %2652 = vmatpush1.bf16.msra.mxu1 %v9921_v50 }
 0x43c   : > { %2612 = vmatprep.subr.bf16.mxu0 %v9927_v51  ;;  %2653 = vmatprep.subr.bf16.mxu1 %v9929_v52 }
 0x43f   : > { %2613 = vmatpush1.bf16.msra.mxu0 %v9931_v53  ;;  %2654 = vmatpush1.bf16.msra.mxu1 %v9933_v55 }
 0x440   : > { %2920 = vmatprep.subr.bf16.mxu0 %v9843_v13  ;;  %2961 = vmatprep.subr.bf16.mxu1 %v9845_v8 }
 0x4f5   : > { %v2310_v31 = vpop.f32.mrb[44].mxu0  ;;  %v2351_v27 = vpop.f32.mrb[44].mxu1 }
 0x4f6   : > { %v2358_v5 = vadd.f32 %v2310_v31, %v9624_v11  ;;  %v2360_v6 = vadd.f32 %v2351_v27, %v9627_v14  ;;  %v2312_v7 = vpop.f32.mrb[45].mxu0  ;;  %v2353_v12 = vpop.f32.mrb[45].mxu1 }
 0x4f7   : > { %v2359_v33 = vadd.f32 %v2312_v7, %v9630_v29  ;;  %v2361_v39 = vadd.f32 %v2353_v12, %v9633_v30  ;;  %v2314_v35 = vpop.f32.mrb[46].mxu0  ;;  %v2355_v45 = vpop.f32.mrb[46].mxu1 }
 0x4f8   : > { %v7506_v63 = vmul.f32 -1.442695, %v2358_v5  ;;  %v2315_v9 = vpop.f32.mrb[47].mxu0  ;;  %v2356_v36 = vpop.f32.mrb[47].mxu1 }
 0x4f9   : > { %v7507_v54 = vmul.f32 -1.442695, %v2359_v33  ;;  %v7508_v56 = vmul.f32 -1.442695, %v2361_v39  ;;  %v10968_v9 = vld [vmem:[#allocation27_spill] sm:$0xff] }
 0x4fa   : > { %8572 = vpow2.f32 %v7506_v63 }
 0x4fb   : > { %8574 = vpow2.f32 %v7507_v54  ;;  %v10969_v54 = vld [vmem:[#allocation28_spill] sm:$0xff] }
 0x4fc   : > { %8576 = vpow2.f32 %v7508_v56 }
 0x4fd   : > { %8578 = vtanh.f32 %v2360_v6 }
 0x504   : > { %v8573_v57 = vpop.eup %8572 }
 0x505   : > { %v8575_v11 = vpop.eup %8574  ;;  %v2365_v58 = vadd.f32 1.0, %v8573_v57 }
 0x506   : > { %v2371_v14 = vadd.f32 1.0, %v8575_v11  ;;  %v8577_v29 = vpop.eup %8576 }
 0x507   : > { %8580 = vrcp.f32 %v2365_v58  ;;  %v8579_v30 = vpop.eup %8578  ;;  %v2378_v1 = vadd.f32 1.0, %v8577_v29 }
 0x508   : > { %8582 = vrcp.f32 %v2371_v14 }
 0x509   : > { %8584 = vrcp.f32 %v2378_v1  ;;  %v2711_v1 = vstv %s2710_s23  ;;  %s4962_s23 = sadd.s32 11, %s9788_s21 }
 0x50a   : > { %vm2712_vm4 = vcmp.eq.s32.totalorder %v2711_v1, 1  ;;  %v10137_v1 = vld [vmem:[#allocation11 + $0x6c] ss:$16 sps:$4 sm:$0xff]   ;;  %p4963_p11 = scmp.lt.s32.totalorder %s4962_s23, 20 }
 0x50c   : > { %s4964_s27 = scalar_select %p4963_p11, 1, 0 }
 0x511   : > { %v8581_v60 = vpop.eup %8580 }
 0x512   : > { %v8583_v62 = vpop.eup %8582  ;;  %v2382_v0 = vmul.f32 %v8581_v60, %v8579_v30 }
 0x513   : > { %v2381_v3 = vmul.f32 %v8583_v62, %v9948_v59  ;;  %v8585_v5 = vpop.eup %8584 }
 0x515   : > { %v2383_v31 = vadd.f32 %v2382_v0, %v2381_v3 }
 0x517   : > { %8586 = vtanh.f32 %v2383_v31  ;;  %v9996_v27 = vsel %vm2390_vm3, %v2383_v31, %v9948_v59 }
 0x521   : > { %v8587_v6 = vpop.eup %8586 }
 0x522   : > { %v2385_v7 = vmul.f32 %v8587_v6, %v8585_v5 }
 0x524   : > { %v9999_v12 = vsel %vm2390_vm3, %v2385_v7, %v9951_v2 }
 0x525   : > { %v2395_v33 = vpack.c.bf16 %v9999_v12, %v9999_v12 }
 0x527   : > { %2397 = vst [vmem:[#allocation5 + $0xc] sm:$0xf] %v2395_v33  ;;  %2631 = vmatmul.mubr.bf16.vlgmr.msra.gmra.mrb[48].mxu0 %v2395_v33  ;;  %2672 = vmatmul.mubr.bf16.vlgmr.msra.gmra.mrb[48].mxu1 %v2395_v33 }
 0x528   : > { %2921 = vmatpush1.bf16.msra.mxu0 %v9847_v34  ;;  %2962 = vmatpush1.bf16.msra.mxu1 %v9849_v38 }
 0x529   : > { %2922 = vmatprep.subr.bf16.mxu0 %v9855_v10  ;;  %2963 = vmatprep.subr.bf16.mxu1 %v9857_v17 }
 0x52a   : > { %2952 = vmatprep.mubr.bf16.mxu0 %v10967_v24  ;;  %2993 = vmatprep.mubr.bf16.mxu1 %v10967_v24 }
 0x52c   : > { %2923 = vmatpush1.bf16.msra.mxu0 %v9859_v20  ;;  %2964 = vmatpush1.bf16.msra.mxu1 %v9861_v32 }
 0x52d   : > { %2924 = vmatprep.subr.bf16.mxu0 %v9867_v16  ;;  %2965 = vmatprep.subr.bf16.mxu1 %v9869_v18 }
 0x530   : > { %2925 = vmatpush1.bf16.msra.mxu0 %v9871_v4  ;;  %2966 = vmatpush1.bf16.msra.mxu1 %v9873_v15 }
 0x531   : > { %2926 = vmatprep.subr.bf16.mxu0 %v9879_v19  ;;  %2967 = vmatprep.subr.bf16.mxu1 %v9881_v22 }
 0x534   : > { %2927 = vmatpush1.bf16.msra.mxu0 %v9883_v25  ;;  %2968 = vmatpush1.bf16.msra.mxu1 %v9885_v21 }
 0x535   : > { %2928 = vmatprep.subr.bf16.mxu0 %v9891_v23  ;;  %2969 = vmatprep.subr.bf16.mxu1 %v9893_v26 }
 0x538   : > { %2929 = vmatpush1.bf16.msra.mxu0 %v9895_v28  ;;  %2970 = vmatpush1.bf16.msra.mxu1 %v9897_v41 }
 0x539   : > { %2930 = vmatprep.subr.bf16.mxu0 %v9903_v42  ;;  %2971 = vmatprep.subr.bf16.mxu1 %v9905_v43 }
 0x53c   : > { %2931 = vmatpush1.bf16.msra.mxu0 %v9907_v44  ;;  %2972 = vmatpush1.bf16.msra.mxu1 %v9909_v46 }
 0x53d   : > { %2932 = vmatprep.subr.bf16.mxu0 %v9915_v47  ;;  %2973 = vmatprep.subr.bf16.mxu1 %v9917_v48 }
 0x540   : > { %2933 = vmatpush1.bf16.msra.mxu0 %v9919_v49  ;;  %2974 = vmatpush1.bf16.msra.mxu1 %v9921_v50 }
 0x541   : > { %2934 = vmatprep.subr.bf16.mxu0 %v9927_v51  ;;  %2975 = vmatprep.subr.bf16.mxu1 %v9929_v52 }
 0x544   : > { %2935 = vmatpush1.bf16.msra.mxu0 %v9931_v53  ;;  %2976 = vmatpush1.bf16.msra.mxu1 %v9933_v55 }
 0x545   : > { %3242 = vmatprep.subr.bf16.mxu0 %v9843_v13  ;;  %3283 = vmatprep.subr.bf16.mxu1 %v9845_v8 }
 0x5fa   : > { %v2632_v59 = vpop.f32.mrb[48].mxu0  ;;  %v2673_v2 = vpop.f32.mrb[48].mxu1 }
 0x5fb   : > { %v2680_v39 = vadd.f32 %v2632_v59, %v9636_v37  ;;  %v2682_v35 = vadd.f32 %v2673_v2, %v9639_v40  ;;  %v2634_v45 = vpop.f32.mrb[49].mxu0  ;;  %v2675_v63 = vpop.f32.mrb[49].mxu1 }
 0x5fc   : > { %v2681_v36 = vadd.f32 %v2634_v45, %v10968_v9  ;;  %v2683_v56 = vadd.f32 %v2675_v63, %v10969_v54  ;;  %v2636_v57 = vpop.f32.mrb[50].mxu0  ;;  %v2677_v11 = vpop.f32.mrb[50].mxu1 }
 0x5fd   : > { %v7541_v58 = vmul.f32 -1.442695, %v2680_v39  ;;  %v2637_v14 = vpop.f32.mrb[51].mxu0  ;;  %v2678_v13 = vpop.f32.mrb[51].mxu1  ;;  %v10099_v11 = vld [vmem:[#allocation11 + $0x4] ss:$16 sps:$4 sm:$0xff]  }
 0x5fe   : > { %v7542_v29 = vmul.f32 -1.442695, %v2681_v36  ;;  %v7543_v8 = vmul.f32 -1.442695, %v2683_v56  ;;  %v10103_v14 = vld [vmem:[#allocation11] ss:$16 sps:$4 sm:$0xff]  }
 0x5ff   : > { %8588 = vpow2.f32 %v7541_v58  ;;  %v10101_v58 = vld [vmem:[#allocation11 + $0xc] ss:$16 sps:$4 sm:$0xff]   ;;  %v10105_v13 = vld [vmem:[#allocation11 + $0x8] ss:$16 sps:$4 sm:$0xff]  }
 0x600   : > { %8590 = vpow2.f32 %v7542_v29  ;;  %v10111_v29 = vld [vmem:[#allocation11 + $0x24] ss:$16 sps:$4 sm:$0xff]  }
 0x601   : > { %8592 = vpow2.f32 %v7543_v8  ;;  %v10113_v8 = vld [vmem:[#allocation11 + $0x2c] ss:$16 sps:$4 sm:$0xff]  }
 0x602   : > { %8594 = vtanh.f32 %v2682_v35 }
 0x609   : > { %v8589_v30 = vpop.eup %8588 }
 0x60a   : > { %v8591_v37 = vpop.eup %8590  ;;  %v2687_v60 = vadd.f32 1.0, %v8589_v30  ;;  %v10115_v30 = vld [vmem:[#allocation11 + $0x20] ss:$16 sps:$4 sm:$0xff]  }
 0x60b   : > { %v2693_v40 = vadd.f32 1.0, %v8591_v37  ;;  %v8593_v61 = vpop.eup %8592  ;;  %v10117_v37 = vld [vmem:[#allocation11 + $0x28] ss:$16 sps:$4 sm:$0xff]  }
 0x60c   : > { %8596 = vrcp.f32 %v2687_v60  ;;  %v8595_v62 = vpop.eup %8594  ;;  %v2700_v5 = vadd.f32 1.0, %v8593_v61  ;;  %v10123_v60 = vld [vmem:[#allocation11 + $0x44] ss:$16 sps:$4 sm:$0xff]   ;;  %v10127_v61 = vld [vmem:[#allocation11 + $0x40] ss:$16 sps:$4 sm:$0xff]  }
 0x60d   : > { %8598 = vrcp.f32 %v2693_v40  ;;  %v10125_v40 = vld [vmem:[#allocation11 + $0x4c] ss:$16 sps:$4 sm:$0xff]  }
 0x60e   : > { %8600 = vrcp.f32 %v2700_v5  ;;  %v10147_v5 = vld [vmem:[#allocation11 + $0x84] ss:$16 sps:$4 sm:$0xff]  }
 0x616   : > { %v8597_v0 = vpop.eup %8596 }
 0x617   : > { %v8599_v3 = vpop.eup %8598  ;;  %v2704_v31 = vmul.f32 %v8597_v0, %v8595_v62  ;;  %v10129_v62 = vld [vmem:[#allocation11 + $0x48] ss:$16 sps:$4 sm:$0xff]   ;;  %v10135_v0 = vld [vmem:[#allocation11 + $0x64] ss:$16 sps:$4 sm:$0xff]  }
 0x618   : > { %v2703_v6 = vmul.f32 %v8599_v3, %v9996_v27  ;;  %v8601_v59 = vpop.eup %8600  ;;  %v10139_v3 = vld [vmem:[#allocation11 + $0x60] ss:$16 sps:$4 sm:$0xff]  }
 0x61a   : > { %v2705_v7 = vadd.f32 %v2704_v31, %v2703_v6  ;;  %v10141_v31 = vld [vmem:[#allocation11 + $0x68] ss:$16 sps:$4 sm:$0xff]   ;;  %v10149_v6 = vld [vmem:[#allocation11 + $0x8c] ss:$16 sps:$4 sm:$0xff]  }
 0x61c   : > { %8602 = vtanh.f32 %v2705_v7  ;;  %v10044_v33 = vsel %vm2712_vm4, %v2705_v7, %v9996_v27  ;;  %v10151_v7 = vld [vmem:[#allocation11 + $0x80] ss:$16 sps:$4 sm:$0xff]  }
 0x626   : > { %v8603_v2 = vpop.eup %8602 }
 0x627   : > { %v2707_v39 = vmul.f32 %v8603_v2, %v8601_v59  ;;  %v10159_v59 = vld [vmem:[#allocation11 + $0xa4] ss:$16 sps:$4 sm:$0xff]   ;;  %v10161_v2 = vld [vmem:[#allocation11 + $0xac] ss:$16 sps:$4 sm:$0xff]  }
 0x629   : > { %v10047_v35 = vsel %vm2712_vm4, %v2707_v39, %v9999_v12  ;;  %v10163_v39 = vld [vmem:[#allocation11 + $0xa0] ss:$16 sps:$4 sm:$0xff]  }
 0x62a   : > { %v2717_v45 = vpack.c.bf16 %v10047_v35, %v10047_v35 }
 0x62c   : > { %2719 = vst [vmem:[#allocation5 + $0x10] sm:$0xf] %v2717_v45  ;;  %2953 = vmatmul.mubr.bf16.vlgmr.msra.gmra.mrb[52].mxu0 %v2717_v45  ;;  %2994 = vmatmul.mubr.bf16.vlgmr.msra.gmra.mrb[52].mxu1 %v2717_v45  ;;  %v10171_v45 = vld [vmem:[#allocation11 + $0xc4] ss:$16 sps:$4 sm:$0xff]  }
 0x62d   : > { %3243 = vmatpush1.bf16.msra.mxu0 %v9847_v34  ;;  %3284 = vmatpush1.bf16.msra.mxu1 %v9849_v38 }
 0x62e   : > { %3244 = vmatprep.subr.bf16.mxu0 %v9855_v10  ;;  %3285 = vmatprep.subr.bf16.mxu1 %v9857_v17  ;;  %v10970_v10 = vld [vmem:[#allocation29_spill] sm:$0xff] }
 0x62f   : > { %3274 = vmatprep.mubr.bf16.mxu0 %v10967_v24  ;;  %3315 = vmatprep.mubr.bf16.mxu1 %v10967_v24 }
 0x631   : > { %3245 = vmatpush1.bf16.msra.mxu0 %v9859_v20  ;;  %3286 = vmatpush1.bf16.msra.mxu1 %v9861_v32  ;;  %v10971_v20 = vld [vmem:[#allocation30_spill] sm:$0xff] }
 0x632   : > { %3246 = vmatprep.subr.bf16.mxu0 %v9867_v16  ;;  %3287 = vmatprep.subr.bf16.mxu1 %v9869_v18 }
 0x635   : > { %3247 = vmatpush1.bf16.msra.mxu0 %v9871_v4  ;;  %3288 = vmatpush1.bf16.msra.mxu1 %v9873_v15  ;;  %v10972_v4 = vld [vmem:[#allocation31_spill] sm:$0xff] }
 0x636   : > { %3248 = vmatprep.subr.bf16.mxu0 %v9879_v19  ;;  %3289 = vmatprep.subr.bf16.mxu1 %v9881_v22  ;;  %v10973_v19 = vld [vmem:[#allocation32_spill] sm:$0xff] }
 0x639   : > { %3249 = vmatpush1.bf16.msra.mxu0 %v9883_v25  ;;  %3290 = vmatpush1.bf16.msra.mxu1 %v9885_v21 }
 0x63a   : > { %3250 = vmatprep.subr.bf16.mxu0 %v9891_v23  ;;  %3291 = vmatprep.subr.bf16.mxu1 %v9893_v26 }
 0x63d   : > { %3251 = vmatpush1.bf16.msra.mxu0 %v9895_v28  ;;  %3292 = vmatpush1.bf16.msra.mxu1 %v9897_v41 }
 0x63e   : > { %3252 = vmatprep.subr.bf16.mxu0 %v9903_v42  ;;  %3293 = vmatprep.subr.bf16.mxu1 %v9905_v43 }
 0x641   : > { %3253 = vmatpush1.bf16.msra.mxu0 %v9907_v44  ;;  %3294 = vmatpush1.bf16.msra.mxu1 %v9909_v46 }
 0x642   : > { %3254 = vmatprep.subr.bf16.mxu0 %v9915_v47  ;;  %3295 = vmatprep.subr.bf16.mxu1 %v9917_v48 }
 0x645   : > { %3255 = vmatpush1.bf16.msra.mxu0 %v9919_v49  ;;  %3296 = vmatpush1.bf16.msra.mxu1 %v9921_v50 }
 0x646   : > { %3256 = vmatprep.subr.bf16.mxu0 %v9927_v51  ;;  %3297 = vmatprep.subr.bf16.mxu1 %v9929_v52  ;;  %v3033_v51 = vstv %s3032_s12  ;;  %s5284_s12 = sadd.s32 12, %s9788_s21 }
 0x647   : > { %vm3034_vm5 = vcmp.eq.s32.totalorder %v3033_v51, 1  ;;  %p5285_p8 = scmp.lt.s32.totalorder %s5284_s12, 20 }
 0x649   : > { %3257 = vmatpush1.bf16.msra.mxu0 %v9931_v53  ;;  %3298 = vmatpush1.bf16.msra.mxu1 %v9933_v55  ;;  %s5286_s30 = scalar_select %p5285_p8, 1, 0 }
 0x64a   : > { %3564 = vmatprep.subr.bf16.mxu0 %v10099_v11  ;;  %3605 = vmatprep.subr.bf16.mxu1 %v10101_v58 }
 0x6ff   : > { %v2954_v34 = vpop.f32.mrb[52].mxu0  ;;  %v2995_v38 = vpop.f32.mrb[52].mxu1 }
 0x700   : > { %v3002_v17 = vadd.f32 %v2954_v34, %v10970_v10  ;;  %v3004_v32 = vadd.f32 %v2995_v38, %v10971_v20  ;;  %v2956_v16 = vpop.f32.mrb[53].mxu0  ;;  %v2997_v18 = vpop.f32.mrb[53].mxu1  ;;  %v10173_v34 = vld [vmem:[#allocation11 + $0xcc] ss:$16 sps:$4 sm:$0xff]   ;;  %v10175_v38 = vld [vmem:[#allocation11 + $0xc0] ss:$16 sps:$4 sm:$0xff]  }
 0x701   : > { %v3003_v15 = vadd.f32 %v2956_v16, %v10972_v4  ;;  %v3005_v22 = vadd.f32 %v2997_v18, %v10973_v19  ;;  %v2958_v25 = vpop.f32.mrb[54].mxu0  ;;  %v2999_v21 = vpop.f32.mrb[54].mxu1  ;;  %v10177_v10 = vld [vmem:[#allocation11 + $0xc8] ss:$16 sps:$4 sm:$0xff]   ;;  %v10185_v20 = vld [vmem:[#allocation11 + $0xec] ss:$16 sps:$4 sm:$0xff]  }
 0x702   : > { %v7576_v23 = vmul.f32 -1.442695, %v3002_v17  ;;  %v2959_v26 = vpop.f32.mrb[55].mxu0  ;;  %v3000_v28 = vpop.f32.mrb[55].mxu1  ;;  %v10183_v17 = vld [vmem:[#allocation11 + $0xe4] ss:$16 sps:$4 sm:$0xff]  }
 0x703   : > { %v7577_v41 = vmul.f32 -1.442695, %v3003_v15  ;;  %v7578_v42 = vmul.f32 -1.442695, %v3005_v22  ;;  %v10189_v16 = vld [vmem:[#allocation11 + $0xe8] ss:$16 sps:$4 sm:$0xff]  }
 0x704   : > { %8604 = vpow2.f32 %v7576_v23  ;;  %v10974_v15 = vld [vmem:[#allocation33_spill] sm:$0xff]  ;;  %v10975_v22 = vld [vmem:[#allocation34_spill] sm:$0xff]  ;;  %v10976_v26 = vld [vmem:[#allocation35_spill] sm:$0xff] }
 0x705   : > { %8606 = vpow2.f32 %v7577_v41  ;;  %v10977_v41 = vld [vmem:[#allocation36_spill] sm:$0xff] }
 0x706   : > { %8608 = vpow2.f32 %v7578_v42 }
 0x707   : > { %8610 = vtanh.f32 %v3004_v32  ;;  %v10187_v32 = vld [vmem:[#allocation11 + $0xe0] ss:$16 sps:$4 sm:$0xff]  }
 0x70e   : > { %v8605_v43 = vpop.eup %8604 }
 0x70f   : > { %v8607_v44 = vpop.eup %8606  ;;  %v3009_v46 = vadd.f32 1.0, %v8605_v43 }
 0x710   : > { %v3015_v47 = vadd.f32 1.0, %v8607_v44  ;;  %v8609_v48 = vpop.eup %8608 }
 0x711   : > { %8612 = vrcp.f32 %v3009_v46  ;;  %v8611_v49 = vpop.eup %8610  ;;  %v3022_v55 = vadd.f32 1.0, %v8609_v48 }
 0x712   : > { %8614 = vrcp.f32 %v3015_v47 }
 0x713   : > { %8616 = vrcp.f32 %v3022_v55 }
 0x71b   : > { %v8613_v50 = vpop.eup %8612 }
 0x71c   : > { %v8615_v52 = vpop.eup %8614  ;;  %v3026_v53 = vmul.f32 %v8613_v50, %v8611_v49 }
 0x71d   : > { %v3025_v27 = vmul.f32 %v8615_v52, %v10044_v33  ;;  %v8617_v9 = vpop.eup %8616 }
 0x71f   : > { %v3027_v12 = vadd.f32 %v3026_v53, %v3025_v27 }
 0x721   : > { %8618 = vtanh.f32 %v3027_v12  ;;  %v10090_v63 = vsel %vm3034_vm5, %v3027_v12, %v10044_v33  ;;  %v10153_v33 = vld [vmem:[#allocation11 + $0x88] ss:$16 sps:$4 sm:$0xff]  }
 0x72b   : > { %v8619_v36 = vpop.eup %8618 }
 0x72c   : > { %v3029_v54 = vmul.f32 %v8619_v36, %v8617_v9  ;;  %v3355_v36 = vstv %s3354_s29  ;;  %s5606_s29 = sadd.s32 13, %s9788_s21 }
 0x72d   : > { %vm3356_vm6 = vcmp.eq.s32.totalorder %v3355_v36, 1  ;;  %p5607_p6 = scmp.lt.s32.totalorder %s5606_s29, 20 }
 0x72e   : > { %v10093_v56 = vsel %vm3034_vm5, %v3029_v54, %v10047_v35  ;;  %v10165_v35 = vld [vmem:[#allocation11 + $0xa8] ss:$16 sps:$4 sm:$0xff]  }
 0x72f   : > { %v3039_v57 = vpack.c.bf16 %v10093_v56, %v10093_v56  ;;  %s5608_s13 = scalar_select %p5607_p6, 1, 0 }
 0x731   : > { %3041 = vst [vmem:[#allocation5 + $0x14] sm:$0xf] %v3039_v57  ;;  %3275 = vmatmul.mubr.bf16.vlgmr.msra.gmra.mrb[56].mxu0 %v3039_v57  ;;  %3316 = vmatmul.mubr.bf16.vlgmr.msra.gmra.mrb[56].mxu1 %v3039_v57 }
 0x732   : > { %3596 = vmatprep.mubr.bf16.mxu0 %v10967_v24  ;;  %3637 = vmatprep.mubr.bf16.mxu1 %v10967_v24 }
 0x733   : > { %3565 = vmatpush1.bf16.msra.mxu0 %v10103_v14  ;;  %3606 = vmatpush1.bf16.msra.mxu1 %v10105_v13 }
 0x734   : > { %3566 = vmatprep.subr.bf16.mxu0 %v10111_v29  ;;  %3607 = vmatprep.subr.bf16.mxu1 %v10113_v8 }
 0x737   : > { %3567 = vmatpush1.bf16.msra.mxu0 %v10115_v30  ;;  %3608 = vmatpush1.bf16.msra.mxu1 %v10117_v37 }
 0x738   : > { %3568 = vmatprep.subr.bf16.mxu0 %v10123_v60  ;;  %3609 = vmatprep.subr.bf16.mxu1 %v10125_v40 }
 0x73b   : > { %3569 = vmatpush1.bf16.msra.mxu0 %v10127_v61  ;;  %3610 = vmatpush1.bf16.msra.mxu1 %v10129_v62 }
 0x73c   : > { %3570 = vmatprep.subr.bf16.mxu0 %v10135_v0  ;;  %3611 = vmatprep.subr.bf16.mxu1 %v10137_v1 }
 0x73f   : > { %3571 = vmatpush1.bf16.msra.mxu0 %v10139_v3  ;;  %3612 = vmatpush1.bf16.msra.mxu1 %v10141_v31 }
 0x740   : > { %3572 = vmatprep.subr.bf16.mxu0 %v10147_v5  ;;  %3613 = vmatprep.subr.bf16.mxu1 %v10149_v6 }
 0x743   : > { %3573 = vmatpush1.bf16.msra.mxu0 %v10151_v7  ;;  %3614 = vmatpush1.bf16.msra.mxu1 %v10153_v33 }
 0x744   : > { %3574 = vmatprep.subr.bf16.mxu0 %v10159_v59  ;;  %3615 = vmatprep.subr.bf16.mxu1 %v10161_v2 }
 0x747   : > { %3575 = vmatpush1.bf16.msra.mxu0 %v10163_v39  ;;  %3616 = vmatpush1.bf16.msra.mxu1 %v10165_v35 }
 0x748   : > { %3576 = vmatprep.subr.bf16.mxu0 %v10171_v45  ;;  %3617 = vmatprep.subr.bf16.mxu1 %v10173_v34 }
 0x74b   : > { %3577 = vmatpush1.bf16.msra.mxu0 %v10175_v38  ;;  %3618 = vmatpush1.bf16.msra.mxu1 %v10177_v10 }
 0x74c   : > { %3578 = vmatprep.subr.bf16.mxu0 %v10183_v17  ;;  %3619 = vmatprep.subr.bf16.mxu1 %v10185_v20 }
 0x74f   : > { %3579 = vmatpush1.bf16.msra.mxu0 %v10187_v32  ;;  %3620 = vmatpush1.bf16.msra.mxu1 %v10189_v16 }
 0x750   : > { %3886 = vmatprep.subr.bf16.mxu0 %v10099_v11  ;;  %3927 = vmatprep.subr.bf16.mxu1 %v10101_v58 }
 0x804   : > { %v3276_v18 = vpop.f32.mrb[56].mxu0  ;;  %v3317_v4 = vpop.f32.mrb[56].mxu1 }
 0x805   : > { %v3324_v19 = vadd.f32 %v3276_v18, %v10974_v15  ;;  %v3326_v25 = vadd.f32 %v3317_v4, %v10975_v22  ;;  %v3278_v21 = vpop.f32.mrb[57].mxu0  ;;  %v3319_v23 = vpop.f32.mrb[57].mxu1 }
 0x806   : > { %v3325_v28 = vadd.f32 %v3278_v21, %v10976_v26  ;;  %v3327_v42 = vadd.f32 %v3319_v23, %v10977_v41  ;;  %v3280_v43 = vpop.f32.mrb[58].mxu0  ;;  %v3321_v44 = vpop.f32.mrb[58].mxu1 }
 0x807   : > { %v7611_v46 = vmul.f32 -1.442695, %v3324_v19  ;;  %v3281_v47 = vpop.f32.mrb[59].mxu0  ;;  %v3322_v48 = vpop.f32.mrb[59].mxu1 }
 0x808   : > { %v7612_v49 = vmul.f32 -1.442695, %v3325_v28  ;;  %v7613_v50 = vmul.f32 -1.442695, %v3327_v42  ;;  %v10978_v28 = vld [vmem:[#allocation37_spill] sm:$0xff]  ;;  %v10979_v42 = vld [vmem:[#allocation38_spill] sm:$0xff] }
 0x809   : > { %8620 = vpow2.f32 %v7611_v46  ;;  %v10980_v47 = vld [vmem:[#allocation39_spill] sm:$0xff] }
 0x80a   : > { %8622 = vpow2.f32 %v7612_v49  ;;  %v10981_v49 = vld [vmem:[#allocation40_spill] sm:$0xff] }
 0x80b   : > { %8624 = vpow2.f32 %v7613_v50 }
 0x80c   : > { %8626 = vtanh.f32 %v3326_v25 }
 0x813   : > { %v8621_v51 = vpop.eup %8620 }
 0x814   : > { %v8623_v52 = vpop.eup %8622  ;;  %v3331_v53 = vadd.f32 1.0, %v8621_v51 }
 0x815   : > { %v3337_v55 = vadd.f32 1.0, %v8623_v52  ;;  %v8625_v27 = vpop.eup %8624 }
 0x816   : > { %8628 = vrcp.f32 %v3331_v53  ;;  %v8627_v12 = vpop.eup %8626  ;;  %v3344_v18 = vadd.f32 1.0, %v8625_v27 }
 0x817   : > { %8630 = vrcp.f32 %v3337_v55 }
 0x818   : > { %8632 = vrcp.f32 %v3344_v18 }
 0x820   : > { %v8629_v9 = vpop.eup %8628 }
 0x821   : > { %v8631_v54 = vpop.eup %8630  ;;  %v3348_v57 = vmul.f32 %v8629_v9, %v8627_v12 }
 0x822   : > { %v3347_v4 = vmul.f32 %v8631_v54, %v10090_v63  ;;  %v8633_v22 = vpop.eup %8632 }
 0x824   : > { %v3349_v15 = vadd.f32 %v3348_v57, %v3347_v4 }
 0x826   : > { %8634 = vtanh.f32 %v3349_v15  ;;  %v10204_v19 = vsel %vm3356_vm6, %v3349_v15, %v10090_v63 }
 0x830   : > { %v8635_v25 = vpop.eup %8634 }
 0x831   : > { %v3351_v21 = vmul.f32 %v8635_v25, %v8633_v22  ;;  %v3677_v25 = vstv %s3676_s28  ;;  %s5928_s28 = sadd.s32 14, %s9788_s21 }
 0x832   : > { %vm3678_vm7 = vcmp.eq.s32.totalorder %v3677_v25, 1  ;;  %p5929_p10 = scmp.lt.s32.totalorder %s5928_s28, 20 }
 0x833   : > { %v10207_v23 = vsel %vm3356_vm6, %v3351_v21, %v10093_v56 }
 0x834   : > { %v3361_v26 = vpack.c.bf16 %v10207_v23, %v10207_v23  ;;  %s5930_s5 = scalar_select %p5929_p10, 1, 0 }
 0x836   : > { %3363 = vst [vmem:[#allocation5 + $0x18] sm:$0xf] %v3361_v26  ;;  %3597 = vmatmul.mubr.bf16.vlgmr.msra.gmra.mrb[60].mxu0 %v3361_v26  ;;  %3638 = vmatmul.mubr.bf16.vlgmr.msra.gmra.mrb[60].mxu1 %v3361_v26 }
 0x837   : > { %3887 = vmatpush1.bf16.msra.mxu0 %v10103_v14  ;;  %3928 = vmatpush1.bf16.msra.mxu1 %v10105_v13 }
 0x838   : > { %3888 = vmatprep.subr.bf16.mxu0 %v10111_v29  ;;  %3929 = vmatprep.subr.bf16.mxu1 %v10113_v8 }
 0x839   : > { %3918 = vmatprep.mubr.bf16.mxu0 %v10967_v24  ;;  %3959 = vmatprep.mubr.bf16.mxu1 %v10967_v24 }
 0x83b   : > { %3889 = vmatpush1.bf16.msra.mxu0 %v10115_v30  ;;  %3930 = vmatpush1.bf16.msra.mxu1 %v10117_v37 }
 0x83c   : > { %3890 = vmatprep.subr.bf16.mxu0 %v10123_v60  ;;  %3931 = vmatprep.subr.bf16.mxu1 %v10125_v40 }
 0x83f   : > { %3891 = vmatpush1.bf16.msra.mxu0 %v10127_v61  ;;  %3932 = vmatpush1.bf16.msra.mxu1 %v10129_v62 }
 0x840   : > { %3892 = vmatprep.subr.bf16.mxu0 %v10135_v0  ;;  %3933 = vmatprep.subr.bf16.mxu1 %v10137_v1 }
 0x843   : > { %3893 = vmatpush1.bf16.msra.mxu0 %v10139_v3  ;;  %3934 = vmatpush1.bf16.msra.mxu1 %v10141_v31 }
 0x844   : > { %3894 = vmatprep.subr.bf16.mxu0 %v10147_v5  ;;  %3935 = vmatprep.subr.bf16.mxu1 %v10149_v6 }
 0x847   : > { %3895 = vmatpush1.bf16.msra.mxu0 %v10151_v7  ;;  %3936 = vmatpush1.bf16.msra.mxu1 %v10153_v33 }
 0x848   : > { %3896 = vmatprep.subr.bf16.mxu0 %v10159_v59  ;;  %3937 = vmatprep.subr.bf16.mxu1 %v10161_v2 }
 0x84b   : > { %3897 = vmatpush1.bf16.msra.mxu0 %v10163_v39  ;;  %3938 = vmatpush1.bf16.msra.mxu1 %v10165_v35 }
 0x84c   : > { %3898 = vmatprep.subr.bf16.mxu0 %v10171_v45  ;;  %3939 = vmatprep.subr.bf16.mxu1 %v10173_v34 }
 0x84f   : > { %3899 = vmatpush1.bf16.msra.mxu0 %v10175_v38  ;;  %3940 = vmatpush1.bf16.msra.mxu1 %v10177_v10 }
 0x850   : > { %3900 = vmatprep.subr.bf16.mxu0 %v10183_v17  ;;  %3941 = vmatprep.subr.bf16.mxu1 %v10185_v20 }
 0x853   : > { %3901 = vmatpush1.bf16.msra.mxu0 %v10187_v32  ;;  %3942 = vmatpush1.bf16.msra.mxu1 %v10189_v16 }
 0x854   : > { %4208 = vmatprep.subr.bf16.mxu0 %v10099_v11  ;;  %4249 = vmatprep.subr.bf16.mxu1 %v10101_v58 }
 0x909   : > { %v3598_v63 = vpop.f32.mrb[60].mxu0  ;;  %v3639_v56 = vpop.f32.mrb[60].mxu1 }
 0x90a   : > { %v3646_v41 = vadd.f32 %v3598_v63, %v10978_v28  ;;  %v3648_v43 = vadd.f32 %v3639_v56, %v10979_v42  ;;  %v3600_v44 = vpop.f32.mrb[61].mxu0  ;;  %v3641_v46 = vpop.f32.mrb[61].mxu1 }
 0x90b   : > { %v3647_v48 = vadd.f32 %v3600_v44, %v10980_v47  ;;  %v3649_v50 = vadd.f32 %v3641_v46, %v10981_v49  ;;  %v3602_v51 = vpop.f32.mrb[62].mxu0  ;;  %v3643_v52 = vpop.f32.mrb[62].mxu1 }
 0x90c   : > { %v7646_v53 = vmul.f32 -1.442695, %v3646_v41  ;;  %v3603_v55 = vpop.f32.mrb[63].mxu0  ;;  %v3644_v27 = vpop.f32.mrb[63].mxu1 }
 0x90d   : > { %v7647_v12 = vmul.f32 -1.442695, %v3647_v48  ;;  %v7648_v9 = vmul.f32 -1.442695, %v3649_v50  ;;  %v10982_v48 = vld [vmem:[#allocation41_spill] sm:$0xff]  ;;  %v10983_v50 = vld [vmem:[#allocation42_spill] sm:$0xff] }
 0x90e   : > { %8636 = vpow2.f32 %v7646_v53  ;;  %v10984_v55 = vld [vmem:[#allocation43_spill] sm:$0xff] }
 0x90f   : > { %8638 = vpow2.f32 %v7647_v12  ;;  %v10985_v12 = vld [vmem:[#allocation44_spill] sm:$0xff] }
 0x910   : > { %8640 = vpow2.f32 %v7648_v9 }
 0x911   : > { %8642 = vtanh.f32 %v3648_v43 }
 0x918   : > { %v8637_v36 = vpop.eup %8636 }
 0x919   : > { %v8639_v54 = vpop.eup %8638  ;;  %v3653_v57 = vadd.f32 1.0, %v8637_v36 }
 0x91a   : > { %v3659_v18 = vadd.f32 1.0, %v8639_v54  ;;  %v8641_v4 = vpop.eup %8640 }
 0x91b   : > { %8644 = vrcp.f32 %v3653_v57  ;;  %v8643_v15 = vpop.eup %8642  ;;  %v3666_v63 = vadd.f32 1.0, %v8641_v4 }
 0x91c   : > { %8646 = vrcp.f32 %v3659_v18 }
 0x91d   : > { %8648 = vrcp.f32 %v3666_v63 }
 0x925   : > { %v8645_v22 = vpop.eup %8644 }
 0x926   : > { %v8647_v21 = vpop.eup %8646  ;;  %v3670_v26 = vmul.f32 %v8645_v22, %v8643_v15 }
 0x927   : > { %v3669_v56 = vmul.f32 %v8647_v21, %v10204_v19  ;;  %v8649_v42 = vpop.eup %8648 }
 0x929   : > { %v3671_v28 = vadd.f32 %v3670_v26, %v3669_v56 }
 0x92b   : > { %8650 = vtanh.f32 %v3671_v28  ;;  %v10252_v41 = vsel %vm3678_vm7, %v3671_v28, %v10204_v19  ;;  %v3999_v28 = vstv %s3998_s9  ;;  %s6250_s9 = sadd.s32 15, %s9788_s21 }
 0x92c   : > { %vm4000_vm8 = vcmp.eq.s32.totalorder %v3999_v28, 1  ;;  %v10393_v28 = vld [vmem:[#allocation11 + $0x6c] ss:$16 sps:$4 sm:$0xff]   ;;  %p6251_p3 = scmp.lt.s32.totalorder %s6250_s9, 20 }
 0x92e   : > { %s6252_s19 = scalar_select %p6251_p3, 1, 0 }
 0x935   : > { %v8651_v43 = vpop.eup %8650 }
 0x936   : > { %v3673_v44 = vmul.f32 %v8651_v43, %v8649_v42 }
 0x938   : > { %v10255_v46 = vsel %vm3678_vm7, %v3673_v44, %v10207_v23 }
 0x939   : > { %v3683_v47 = vpack.c.bf16 %v10255_v46, %v10255_v46 }
 0x93b   : > { %3685 = vst [vmem:[#allocation5 + $0x1c] sm:$0xf] %v3683_v47  ;;  %3919 = vmatmul.mubr.bf16.vlgmr.msra.gmra.mrb[64].mxu0 %v3683_v47  ;;  %3960 = vmatmul.mubr.bf16.vlgmr.msra.gmra.mrb[64].mxu1 %v3683_v47 }
 0x93c   : > { %4209 = vmatpush1.bf16.msra.mxu0 %v10103_v14  ;;  %4250 = vmatpush1.bf16.msra.mxu1 %v10105_v13 }
 0x93d   : > { %4210 = vmatprep.subr.bf16.mxu0 %v10111_v29  ;;  %4251 = vmatprep.subr.bf16.mxu1 %v10113_v8 }
 0x93e   : > { %4240 = vmatprep.mubr.bf16.mxu0 %v10967_v24  ;;  %4281 = vmatprep.mubr.bf16.mxu1 %v10967_v24 }
 0x940   : > { %4211 = vmatpush1.bf16.msra.mxu0 %v10115_v30  ;;  %4252 = vmatpush1.bf16.msra.mxu1 %v10117_v37 }
 0x941   : > { %4212 = vmatprep.subr.bf16.mxu0 %v10123_v60  ;;  %4253 = vmatprep.subr.bf16.mxu1 %v10125_v40 }
 0x944   : > { %4213 = vmatpush1.bf16.msra.mxu0 %v10127_v61  ;;  %4254 = vmatpush1.bf16.msra.mxu1 %v10129_v62 }
 0x945   : > { %4214 = vmatprep.subr.bf16.mxu0 %v10135_v0  ;;  %4255 = vmatprep.subr.bf16.mxu1 %v10137_v1 }
 0x948   : > { %4215 = vmatpush1.bf16.msra.mxu0 %v10139_v3  ;;  %4256 = vmatpush1.bf16.msra.mxu1 %v10141_v31 }
 0x949   : > { %4216 = vmatprep.subr.bf16.mxu0 %v10147_v5  ;;  %4257 = vmatprep.subr.bf16.mxu1 %v10149_v6 }
 0x94c   : > { %4217 = vmatpush1.bf16.msra.mxu0 %v10151_v7  ;;  %4258 = vmatpush1.bf16.msra.mxu1 %v10153_v33 }
 0x94d   : > { %4218 = vmatprep.subr.bf16.mxu0 %v10159_v59  ;;  %4259 = vmatprep.subr.bf16.mxu1 %v10161_v2 }
 0x950   : > { %4219 = vmatpush1.bf16.msra.mxu0 %v10163_v39  ;;  %4260 = vmatpush1.bf16.msra.mxu1 %v10165_v35 }
 0x951   : > { %4220 = vmatprep.subr.bf16.mxu0 %v10171_v45  ;;  %4261 = vmatprep.subr.bf16.mxu1 %v10173_v34 }
 0x954   : > { %4221 = vmatpush1.bf16.msra.mxu0 %v10175_v38  ;;  %4262 = vmatpush1.bf16.msra.mxu1 %v10177_v10 }
 0x955   : > { %4222 = vmatprep.subr.bf16.mxu0 %v10183_v17  ;;  %4263 = vmatprep.subr.bf16.mxu1 %v10185_v20 }
 0x958   : > { %4223 = vmatpush1.bf16.msra.mxu0 %v10187_v32  ;;  %4264 = vmatpush1.bf16.msra.mxu1 %v10189_v16 }
 0x959   : > { %4530 = vmatprep.subr.bf16.mxu0 %v10099_v11  ;;  %4571 = vmatprep.subr.bf16.mxu1 %v10101_v58 }
 0xa0e   : > { %v3920_v19 = vpop.f32.mrb[64].mxu0  ;;  %v3961_v23 = vpop.f32.mrb[64].mxu1 }
 0xa0f   : > { %v3968_v49 = vadd.f32 %v3920_v19, %v10982_v48  ;;  %v3970_v51 = vadd.f32 %v3961_v23, %v10983_v50  ;;  %v3922_v52 = vpop.f32.mrb[65].mxu0  ;;  %v3963_v53 = vpop.f32.mrb[65].mxu1 }
 0xa10   : > { %v3969_v27 = vadd.f32 %v3922_v52, %v10984_v55  ;;  %v3971_v9 = vadd.f32 %v3963_v53, %v10985_v12  ;;  %v3924_v36 = vpop.f32.mrb[66].mxu0  ;;  %v3965_v54 = vpop.f32.mrb[66].mxu1 }
 0xa11   : > { %v7681_v57 = vmul.f32 -1.442695, %v3968_v49  ;;  %v3925_v18 = vpop.f32.mrb[67].mxu0  ;;  %v3966_v11 = vpop.f32.mrb[67].mxu1  ;;  %v10355_v54 = vld [vmem:[#allocation11 + $0x4] ss:$16 sps:$4 sm:$0xff]  }
 0xa12   : > { %v7682_v4 = vmul.f32 -1.442695, %v3969_v27  ;;  %v7683_v58 = vmul.f32 -1.442695, %v3971_v9  ;;  %v10359_v18 = vld [vmem:[#allocation11] ss:$16 sps:$4 sm:$0xff]  }
 0xa13   : > { %8652 = vpow2.f32 %v7681_v57  ;;  %v10357_v57 = vld [vmem:[#allocation11 + $0xc] ss:$16 sps:$4 sm:$0xff]   ;;  %v10361_v11 = vld [vmem:[#allocation11 + $0x8] ss:$16 sps:$4 sm:$0xff]  }
 0xa14   : > { %8654 = vpow2.f32 %v7682_v4  ;;  %v10367_v4 = vld [vmem:[#allocation11 + $0x24] ss:$16 sps:$4 sm:$0xff]  }
 0xa15   : > { %8656 = vpow2.f32 %v7683_v58  ;;  %v10369_v58 = vld [vmem:[#allocation11 + $0x2c] ss:$16 sps:$4 sm:$0xff]  }
 0xa16   : > { %8658 = vtanh.f32 %v3970_v51 }
 0xa1d   : > { %v8653_v15 = vpop.eup %8652 }
 0xa1e   : > { %v8655_v22 = vpop.eup %8654  ;;  %v3975_v25 = vadd.f32 1.0, %v8653_v15  ;;  %v10371_v15 = vld [vmem:[#allocation11 + $0x20] ss:$16 sps:$4 sm:$0xff]  }
 0xa1f   : > { %v3981_v21 = vadd.f32 1.0, %v8655_v22  ;;  %v8657_v26 = vpop.eup %8656  ;;  %v10373_v22 = vld [vmem:[#allocation11 + $0x28] ss:$16 sps:$4 sm:$0xff]  }
 0xa20   : > { %8660 = vrcp.f32 %v3975_v25  ;;  %v8659_v63 = vpop.eup %8658  ;;  %v3988_v44 = vadd.f32 1.0, %v8657_v26  ;;  %v10379_v25 = vld [vmem:[#allocation11 + $0x44] ss:$16 sps:$4 sm:$0xff]   ;;  %v10383_v26 = vld [vmem:[#allocation11 + $0x40] ss:$16 sps:$4 sm:$0xff]  }
 0xa21   : > { %8662 = vrcp.f32 %v3981_v21  ;;  %v10381_v21 = vld [vmem:[#allocation11 + $0x4c] ss:$16 sps:$4 sm:$0xff]  }
 0xa22   : > { %8664 = vrcp.f32 %v3988_v44  ;;  %v10403_v44 = vld [vmem:[#allocation11 + $0x84] ss:$16 sps:$4 sm:$0xff]  }
 0xa2a   : > { %v8661_v56 = vpop.eup %8660 }
 0xa2b   : > { %v8663_v42 = vpop.eup %8662  ;;  %v3992_v43 = vmul.f32 %v8661_v56, %v8659_v63  ;;  %v10385_v63 = vld [vmem:[#allocation11 + $0x48] ss:$16 sps:$4 sm:$0xff]   ;;  %v10391_v56 = vld [vmem:[#allocation11 + $0x64] ss:$16 sps:$4 sm:$0xff]  }
 0xa2c   : > { %v3991_v47 = vmul.f32 %v8663_v42, %v10252_v41  ;;  %v8665_v48 = vpop.eup %8664  ;;  %v10395_v42 = vld [vmem:[#allocation11 + $0x60] ss:$16 sps:$4 sm:$0xff]  }
 0xa2e   : > { %v3993_v19 = vadd.f32 %v3992_v43, %v3991_v47  ;;  %v10397_v43 = vld [vmem:[#allocation11 + $0x68] ss:$16 sps:$4 sm:$0xff]   ;;  %v10405_v47 = vld [vmem:[#allocation11 + $0x8c] ss:$16 sps:$4 sm:$0xff]  }
 0xa30   : > { %8666 = vtanh.f32 %v3993_v19  ;;  %v10300_v23 = vsel %vm4000_vm8, %v3993_v19, %v10252_v41  ;;  %v10407_v19 = vld [vmem:[#allocation11 + $0x80] ss:$16 sps:$4 sm:$0xff]  }
 0xa3a   : > { %v8667_v49 = vpop.eup %8666 }
 0xa3b   : > { %v3995_v50 = vmul.f32 %v8667_v49, %v8665_v48  ;;  %v10415_v48 = vld [vmem:[#allocation11 + $0xa4] ss:$16 sps:$4 sm:$0xff]   ;;  %v10417_v49 = vld [vmem:[#allocation11 + $0xac] ss:$16 sps:$4 sm:$0xff]  }
 0xa3d   : > { %v10303_v51 = vsel %vm4000_vm8, %v3995_v50, %v10255_v46  ;;  %v10419_v50 = vld [vmem:[#allocation11 + $0xa0] ss:$16 sps:$4 sm:$0xff]  }
 0xa3e   : > { %v4005_v52 = vpack.c.bf16 %v10303_v51, %v10303_v51 }
 0xa40   : > { %4007 = vst [vmem:[#allocation5 + $0x20] sm:$0xf] %v4005_v52  ;;  %4241 = vmatmul.mubr.bf16.vlgmr.msra.gmra.mrb[68].mxu0 %v4005_v52  ;;  %4282 = vmatmul.mubr.bf16.vlgmr.msra.gmra.mrb[68].mxu1 %v4005_v52  ;;  %v10427_v52 = vld [vmem:[#allocation11 + $0xc4] ss:$16 sps:$4 sm:$0xff]  }
 0xa41   : > { %4531 = vmatpush1.bf16.msra.mxu0 %v10103_v14  ;;  %4572 = vmatpush1.bf16.msra.mxu1 %v10105_v13 }
 0xa42   : > { %4532 = vmatprep.subr.bf16.mxu0 %v10111_v29  ;;  %4573 = vmatprep.subr.bf16.mxu1 %v10113_v8  ;;  %v10986_v29 = vld [vmem:[#allocation45_spill] sm:$0xff] }
 0xa43   : > { %4562 = vmatprep.mubr.bf16.mxu0 %v10967_v24  ;;  %4603 = vmatprep.mubr.bf16.mxu1 %v10967_v24 }
 0xa45   : > { %4533 = vmatpush1.bf16.msra.mxu0 %v10115_v30  ;;  %4574 = vmatpush1.bf16.msra.mxu1 %v10117_v37  ;;  %v10987_v30 = vld [vmem:[#allocation46_spill] sm:$0xff] }
 0xa46   : > { %4534 = vmatprep.subr.bf16.mxu0 %v10123_v60  ;;  %4575 = vmatprep.subr.bf16.mxu1 %v10125_v40 }
 0xa49   : > { %4535 = vmatpush1.bf16.msra.mxu0 %v10127_v61  ;;  %4576 = vmatpush1.bf16.msra.mxu1 %v10129_v62  ;;  %v10988_v61 = vld [vmem:[#allocation47_spill] sm:$0xff] }
 0xa4a   : > { %4536 = vmatprep.subr.bf16.mxu0 %v10135_v0  ;;  %4577 = vmatprep.subr.bf16.mxu1 %v10137_v1  ;;  %v10989_v0 = vld [vmem:[#allocation48_spill] sm:$0xff] }
 0xa4d   : > { %4537 = vmatpush1.bf16.msra.mxu0 %v10139_v3  ;;  %4578 = vmatpush1.bf16.msra.mxu1 %v10141_v31 }
 0xa4e   : > { %4538 = vmatprep.subr.bf16.mxu0 %v10147_v5  ;;  %4579 = vmatprep.subr.bf16.mxu1 %v10149_v6 }
 0xa51   : > { %4539 = vmatpush1.bf16.msra.mxu0 %v10151_v7  ;;  %4580 = vmatpush1.bf16.msra.mxu1 %v10153_v33 }
 0xa52   : > { %4540 = vmatprep.subr.bf16.mxu0 %v10159_v59  ;;  %4581 = vmatprep.subr.bf16.mxu1 %v10161_v2 }
 0xa55   : > { %4541 = vmatpush1.bf16.msra.mxu0 %v10163_v39  ;;  %4582 = vmatpush1.bf16.msra.mxu1 %v10165_v35 }
 0xa56   : > { %4542 = vmatprep.subr.bf16.mxu0 %v10171_v45  ;;  %4583 = vmatprep.subr.bf16.mxu1 %v10173_v34 }
 0xa59   : > { %4543 = vmatpush1.bf16.msra.mxu0 %v10175_v38  ;;  %4584 = vmatpush1.bf16.msra.mxu1 %v10177_v10 }
 0xa5a   : > { %4544 = vmatprep.subr.bf16.mxu0 %v10183_v17  ;;  %4585 = vmatprep.subr.bf16.mxu1 %v10185_v20  ;;  %v4321_v17 = vstv %s4320_s26 }
 0xa5b   : > { %vm4322_vm9 = vcmp.eq.s32.totalorder %v4321_v17, 1 }
 0xa5d   : > { %4545 = vmatpush1.bf16.msra.mxu0 %v10187_v32  ;;  %4586 = vmatpush1.bf16.msra.mxu1 %v10189_v16 }
 0xa5e   : > { %4852 = vmatprep.subr.bf16.mxu0 %v10355_v54  ;;  %4893 = vmatprep.subr.bf16.mxu1 %v10357_v57 }
 0xb13   : > { %v4242_v14 = vpop.f32.mrb[68].mxu0  ;;  %v4283_v13 = vpop.f32.mrb[68].mxu1 }
 0xb14   : > { %v4290_v8 = vadd.f32 %v4242_v14, %v10986_v29  ;;  %v4292_v37 = vadd.f32 %v4283_v13, %v10987_v30  ;;  %v4244_v60 = vpop.f32.mrb[69].mxu0  ;;  %v4285_v40 = vpop.f32.mrb[69].mxu1  ;;  %v10429_v14 = vld [vmem:[#allocation11 + $0xcc] ss:$16 sps:$4 sm:$0xff]   ;;  %v10431_v13 = vld [vmem:[#allocation11 + $0xc0] ss:$16 sps:$4 sm:$0xff]  }
 0xb15   : > { %v4291_v62 = vadd.f32 %v4244_v60, %v10988_v61  ;;  %v4293_v1 = vadd.f32 %v4285_v40, %v10989_v0  ;;  %v4246_v3 = vpop.f32.mrb[70].mxu0  ;;  %v4287_v31 = vpop.f32.mrb[70].mxu1  ;;  %v10433_v29 = vld [vmem:[#allocation11 + $0xc8] ss:$16 sps:$4 sm:$0xff]   ;;  %v10441_v30 = vld [vmem:[#allocation11 + $0xec] ss:$16 sps:$4 sm:$0xff]  }
 0xb16   : > { %v7716_v5 = vmul.f32 -1.442695, %v4290_v8  ;;  %v4247_v6 = vpop.f32.mrb[71].mxu0  ;;  %v4288_v7 = vpop.f32.mrb[71].mxu1  ;;  %v10439_v8 = vld [vmem:[#allocation11 + $0xe4] ss:$16 sps:$4 sm:$0xff]  }
 0xb17   : > { %v7717_v33 = vmul.f32 -1.442695, %v4291_v62  ;;  %v7718_v59 = vmul.f32 -1.442695, %v4293_v1  ;;  %v10445_v60 = vld [vmem:[#allocation11 + $0xe8] ss:$16 sps:$4 sm:$0xff]  }
 0xb18   : > { %8668 = vpow2.f32 %v7716_v5  ;;  %v10990_v62 = vld [vmem:[#allocation49_spill] sm:$0xff]  ;;  %v10991_v1 = vld [vmem:[#allocation50_spill] sm:$0xff]  ;;  %v10992_v6 = vld [vmem:[#allocation51_spill] sm:$0xff] }
 0xb19   : > { %8670 = vpow2.f32 %v7717_v33  ;;  %v10993_v33 = vld [vmem:[#allocation52_spill] sm:$0xff] }
 0xb1a   : > { %8672 = vpow2.f32 %v7718_v59 }
 0xb1b   : > { %8674 = vtanh.f32 %v4292_v37  ;;  %v10443_v37 = vld [vmem:[#allocation11 + $0xe0] ss:$16 sps:$4 sm:$0xff]  }
 0xb22   : > { %v8669_v2 = vpop.eup %8668 }
 0xb23   : > { %v8671_v39 = vpop.eup %8670  ;;  %v4297_v35 = vadd.f32 1.0, %v8669_v2 }
 0xb24   : > { %v4303_v45 = vadd.f32 1.0, %v8671_v39  ;;  %v8673_v34 = vpop.eup %8672 }
 0xb25   : > { %8676 = vrcp.f32 %v4297_v35  ;;  %v8675_v38 = vpop.eup %8674  ;;  %v4310_v16 = vadd.f32 1.0, %v8673_v34 }
 0xb26   : > { %8678 = vrcp.f32 %v4303_v45 }
 0xb27   : > { %8680 = vrcp.f32 %v4310_v16 }
 0xb2f   : > { %v8677_v10 = vpop.eup %8676 }
 0xb30   : > { %v8679_v20 = vpop.eup %8678  ;;  %v4314_v32 = vmul.f32 %v8677_v10, %v8675_v38 }
 0xb31   : > { %v4313_v41 = vmul.f32 %v8679_v20, %v10300_v23  ;;  %v8681_v55 = vpop.eup %8680 }
 0xb33   : > { %v4315_v46 = vadd.f32 %v4314_v32, %v4313_v41 }
 0xb35   : > { %8682 = vtanh.f32 %v4315_v46  ;;  %v10346_v53 = vsel %vm4322_vm9, %v4315_v46, %v10300_v23  ;;  %v10409_v23 = vld [vmem:[#allocation11 + $0x88] ss:$16 sps:$4 sm:$0xff]  }
 0xb3f   : > { %v8683_v27 = vpop.eup %8682 }
 0xb40   : > { %v4317_v12 = vmul.f32 %v8683_v27, %v8681_v55  ;;  %v4643_v27 = vstv %s4642_s25  ;;  %s11014_s25 = sld [smem:[#allocation74_spill]] }
 0xb41   : > { %vm4644_vm10 = vcmp.eq.s32.totalorder %v4643_v27, 1 }
 0xb42   : > { %v10349_v9 = vsel %vm4322_vm9, %v4317_v12, %v10303_v51  ;;  %v10421_v51 = vld [vmem:[#allocation11 + $0xa8] ss:$16 sps:$4 sm:$0xff]  }
 0xb43   : > { %v4327_v36 = vpack.c.bf16 %v10349_v9, %v10349_v9 }
 0xb45   : > { %4329 = vst [vmem:[#allocation5 + $0x24] sm:$0xf] %v4327_v36  ;;  %4563 = vmatmul.mubr.bf16.vlgmr.msra.gmra.mrb[72].mxu0 %v4327_v36  ;;  %4604 = vmatmul.mubr.bf16.vlgmr.msra.gmra.mrb[72].mxu1 %v4327_v36 }
 0xb46   : > { %4884 = vmatprep.mubr.bf16.mxu0 %v10967_v24  ;;  %4925 = vmatprep.mubr.bf16.mxu1 %v10967_v24 }
 0xb47   : > { %4853 = vmatpush1.bf16.msra.mxu0 %v10359_v18  ;;  %4894 = vmatpush1.bf16.msra.mxu1 %v10361_v11 }
 0xb48   : > { %4854 = vmatprep.subr.bf16.mxu0 %v10367_v4  ;;  %4895 = vmatprep.subr.bf16.mxu1 %v10369_v58 }
 0xb4b   : > { %4855 = vmatpush1.bf16.msra.mxu0 %v10371_v15  ;;  %4896 = vmatpush1.bf16.msra.mxu1 %v10373_v22 }
 0xb4c   : > { %4856 = vmatprep.subr.bf16.mxu0 %v10379_v25  ;;  %4897 = vmatprep.subr.bf16.mxu1 %v10381_v21 }
 0xb4f   : > { %4857 = vmatpush1.bf16.msra.mxu0 %v10383_v26  ;;  %4898 = vmatpush1.bf16.msra.mxu1 %v10385_v63 }
 0xb50   : > { %4858 = vmatprep.subr.bf16.mxu0 %v10391_v56  ;;  %4899 = vmatprep.subr.bf16.mxu1 %v10393_v28 }
 0xb53   : > { %4859 = vmatpush1.bf16.msra.mxu0 %v10395_v42  ;;  %4900 = vmatpush1.bf16.msra.mxu1 %v10397_v43 }
 0xb54   : > { %4860 = vmatprep.subr.bf16.mxu0 %v10403_v44  ;;  %4901 = vmatprep.subr.bf16.mxu1 %v10405_v47 }
 0xb57   : > { %4861 = vmatpush1.bf16.msra.mxu0 %v10407_v19  ;;  %4902 = vmatpush1.bf16.msra.mxu1 %v10409_v23 }
 0xb58   : > { %4862 = vmatprep.subr.bf16.mxu0 %v10415_v48  ;;  %4903 = vmatprep.subr.bf16.mxu1 %v10417_v49 }
 0xb5b   : > { %4863 = vmatpush1.bf16.msra.mxu0 %v10419_v50  ;;  %4904 = vmatpush1.bf16.msra.mxu1 %v10421_v51 }
 0xb5c   : > { %4864 = vmatprep.subr.bf16.mxu0 %v10427_v52  ;;  %4905 = vmatprep.subr.bf16.mxu1 %v10429_v14 }
 0xb5f   : > { %4865 = vmatpush1.bf16.msra.mxu0 %v10431_v13  ;;  %4906 = vmatpush1.bf16.msra.mxu1 %v10433_v29 }
 0xb60   : > { %4866 = vmatprep.subr.bf16.mxu0 %v10439_v8  ;;  %4907 = vmatprep.subr.bf16.mxu1 %v10441_v30 }
 0xb63   : > { %4867 = vmatpush1.bf16.msra.mxu0 %v10443_v37  ;;  %4908 = vmatpush1.bf16.msra.mxu1 %v10445_v60 }
 0xb64   : > { %5174 = vmatprep.subr.bf16.mxu0 %v10355_v54  ;;  %5215 = vmatprep.subr.bf16.mxu1 %v10357_v57 }
 0xc18   : > { %v4564_v40 = vpop.f32.mrb[72].mxu0  ;;  %v4605_v61 = vpop.f32.mrb[72].mxu1 }
 0xc19   : > { %v4612_v0 = vadd.f32 %v4564_v40, %v10990_v62  ;;  %v4614_v3 = vadd.f32 %v4605_v61, %v10991_v1  ;;  %v4566_v31 = vpop.f32.mrb[73].mxu0  ;;  %v4607_v5 = vpop.f32.mrb[73].mxu1 }
 0xc1a   : > { %v4613_v7 = vadd.f32 %v4566_v31, %v10992_v6  ;;  %v4615_v59 = vadd.f32 %v4607_v5, %v10993_v33  ;;  %v4568_v2 = vpop.f32.mrb[74].mxu0  ;;  %v4609_v39 = vpop.f32.mrb[74].mxu1 }
 0xc1b   : > { %v7751_v35 = vmul.f32 -1.442695, %v4612_v0  ;;  %v4569_v45 = vpop.f32.mrb[75].mxu0  ;;  %v4610_v34 = vpop.f32.mrb[75].mxu1 }
 0xc1c   : > { %v7752_v38 = vmul.f32 -1.442695, %v4613_v7  ;;  %v7753_v10 = vmul.f32 -1.442695, %v4615_v59  ;;  %v10994_v7 = vld [vmem:[#allocation53_spill] sm:$0xff]  ;;  %v10995_v59 = vld [vmem:[#allocation54_spill] sm:$0xff] }
 0xc1d   : > { %8684 = vpow2.f32 %v7751_v35  ;;  %v10996_v45 = vld [vmem:[#allocation55_spill] sm:$0xff] }
 0xc1e   : > { %8686 = vpow2.f32 %v7752_v38  ;;  %v10997_v38 = vld [vmem:[#allocation56_spill] sm:$0xff] }
 0xc1f   : > { %8688 = vpow2.f32 %v7753_v10 }
 0xc20   : > { %8690 = vtanh.f32 %v4614_v3 }
 0xc27   : > { %v8685_v17 = vpop.eup %8684 }
 0xc28   : > { %v8687_v20 = vpop.eup %8686  ;;  %v4619_v32 = vadd.f32 1.0, %v8685_v17 }
 0xc29   : > { %v4625_v16 = vadd.f32 1.0, %v8687_v20  ;;  %v8689_v41 = vpop.eup %8688 }
 0xc2a   : > { %8692 = vrcp.f32 %v4619_v32  ;;  %v8691_v46 = vpop.eup %8690  ;;  %v4632_v40 = vadd.f32 1.0, %v8689_v41 }
 0xc2b   : > { %8694 = vrcp.f32 %v4625_v16 }
 0xc2c   : > { %8696 = vrcp.f32 %v4632_v40 }
 0xc34   : > { %v8693_v55 = vpop.eup %8692 }
 0xc35   : > { %v8695_v12 = vpop.eup %8694  ;;  %v4636_v36 = vmul.f32 %v8693_v55, %v8691_v46 }
 0xc36   : > { %v4635_v61 = vmul.f32 %v8695_v12, %v10346_v53  ;;  %v8697_v1 = vpop.eup %8696 }
 0xc38   : > { %v4637_v62 = vadd.f32 %v4636_v36, %v4635_v61 }
 0xc3a   : > { %8698 = vtanh.f32 %v4637_v62  ;;  %v10460_v0 = vsel %vm4644_vm10, %v4637_v62, %v10346_v53 }
 0xc44   : > { %v8699_v3 = vpop.eup %8698 }
 0xc45   : > { %v4639_v31 = vmul.f32 %v8699_v3, %v8697_v1  ;;  %v4965_v3 = vstv %s4964_s27 }
 0xc46   : > { %vm4966_vm11 = vcmp.eq.s32.totalorder %v4965_v3, 1 }
 0xc47   : > { %v10463_v5 = vsel %vm4644_vm10, %v4639_v31, %v10349_v9 }
 0xc48   : > { %v4649_v6 = vpack.c.bf16 %v10463_v5, %v10463_v5 }
 0xc4a   : > { %4651 = vst [vmem:[#allocation5 + $0x28] sm:$0xf] %v4649_v6  ;;  %4885 = vmatmul.mubr.bf16.vlgmr.msra.gmra.mrb[76].mxu0 %v4649_v6  ;;  %4926 = vmatmul.mubr.bf16.vlgmr.msra.gmra.mrb[76].mxu1 %v4649_v6 }
 0xc4b   : > { %5175 = vmatpush1.bf16.msra.mxu0 %v10359_v18  ;;  %5216 = vmatpush1.bf16.msra.mxu1 %v10361_v11 }
 0xc4c   : > { %5176 = vmatprep.subr.bf16.mxu0 %v10367_v4  ;;  %5217 = vmatprep.subr.bf16.mxu1 %v10369_v58 }
 0xc4d   : > { %5206 = vmatprep.mubr.bf16.mxu0 %v10967_v24  ;;  %5247 = vmatprep.mubr.bf16.mxu1 %v10967_v24 }
 0xc4f   : > { %5177 = vmatpush1.bf16.msra.mxu0 %v10371_v15  ;;  %5218 = vmatpush1.bf16.msra.mxu1 %v10373_v22 }
 0xc50   : > { %5178 = vmatprep.subr.bf16.mxu0 %v10379_v25  ;;  %5219 = vmatprep.subr.bf16.mxu1 %v10381_v21 }
 0xc53   : > { %5179 = vmatpush1.bf16.msra.mxu0 %v10383_v26  ;;  %5220 = vmatpush1.bf16.msra.mxu1 %v10385_v63 }
 0xc54   : > { %5180 = vmatprep.subr.bf16.mxu0 %v10391_v56  ;;  %5221 = vmatprep.subr.bf16.mxu1 %v10393_v28 }
 0xc57   : > { %5181 = vmatpush1.bf16.msra.mxu0 %v10395_v42  ;;  %5222 = vmatpush1.bf16.msra.mxu1 %v10397_v43 }
 0xc58   : > { %5182 = vmatprep.subr.bf16.mxu0 %v10403_v44  ;;  %5223 = vmatprep.subr.bf16.mxu1 %v10405_v47 }
 0xc5b   : > { %5183 = vmatpush1.bf16.msra.mxu0 %v10407_v19  ;;  %5224 = vmatpush1.bf16.msra.mxu1 %v10409_v23 }
 0xc5c   : > { %5184 = vmatprep.subr.bf16.mxu0 %v10415_v48  ;;  %5225 = vmatprep.subr.bf16.mxu1 %v10417_v49 }
 0xc5f   : > { %5185 = vmatpush1.bf16.msra.mxu0 %v10419_v50  ;;  %5226 = vmatpush1.bf16.msra.mxu1 %v10421_v51 }
 0xc60   : > { %5186 = vmatprep.subr.bf16.mxu0 %v10427_v52  ;;  %5227 = vmatprep.subr.bf16.mxu1 %v10429_v14 }
 0xc63   : > { %5187 = vmatpush1.bf16.msra.mxu0 %v10431_v13  ;;  %5228 = vmatpush1.bf16.msra.mxu1 %v10433_v29 }
 0xc64   : > { %5188 = vmatprep.subr.bf16.mxu0 %v10439_v8  ;;  %5229 = vmatprep.subr.bf16.mxu1 %v10441_v30 }
 0xc67   : > { %5189 = vmatpush1.bf16.msra.mxu0 %v10443_v37  ;;  %5230 = vmatpush1.bf16.msra.mxu1 %v10445_v60 }
 0xc68   : > { %5496 = vmatprep.subr.bf16.mxu0 %v10355_v54  ;;  %5537 = vmatprep.subr.bf16.mxu1 %v10357_v57 }
 0xd1d   : > { %v4886_v53 = vpop.f32.mrb[76].mxu0  ;;  %v4927_v9 = vpop.f32.mrb[76].mxu1 }
 0xd1e   : > { %v4934_v33 = vadd.f32 %v4886_v53, %v10994_v7  ;;  %v4936_v2 = vadd.f32 %v4927_v9, %v10995_v59  ;;  %v4888_v39 = vpop.f32.mrb[77].mxu0  ;;  %v4929_v35 = vpop.f32.mrb[77].mxu1 }
 0xd1f   : > { %v4935_v34 = vadd.f32 %v4888_v39, %v10996_v45  ;;  %v4937_v10 = vadd.f32 %v4929_v35, %v10997_v38  ;;  %v4890_v17 = vpop.f32.mrb[78].mxu0  ;;  %v4931_v20 = vpop.f32.mrb[78].mxu1 }
 0xd20   : > { %v7786_v32 = vmul.f32 -1.442695, %v4934_v33  ;;  %v4891_v16 = vpop.f32.mrb[79].mxu0  ;;  %v4932_v41 = vpop.f32.mrb[79].mxu1 }
 0xd21   : > { %v7787_v46 = vmul.f32 -1.442695, %v4935_v34  ;;  %v7788_v55 = vmul.f32 -1.442695, %v4937_v10  ;;  %v10998_v34 = vld [vmem:[#allocation57_spill] sm:$0xff]  ;;  %v10999_v10 = vld [vmem:[#allocation58_spill] sm:$0xff] }
 0xd22   : > { %8700 = vpow2.f32 %v7786_v32  ;;  %v11000_v16 = vld [vmem:[#allocation59_spill] sm:$0xff] }
 0xd23   : > { %8702 = vpow2.f32 %v7787_v46  ;;  %v11001_v46 = vld [vmem:[#allocation60_spill] sm:$0xff] }
 0xd24   : > { %8704 = vpow2.f32 %v7788_v55 }
 0xd25   : > { %8706 = vtanh.f32 %v4936_v2 }
 0xd2c   : > { %v8701_v27 = vpop.eup %8700 }
 0xd2d   : > { %v8703_v12 = vpop.eup %8702  ;;  %v4941_v36 = vadd.f32 1.0, %v8701_v27 }
 0xd2e   : > { %v4947_v40 = vadd.f32 1.0, %v8703_v12  ;;  %v8705_v61 = vpop.eup %8704 }
 0xd2f   : > { %8708 = vrcp.f32 %v4941_v36  ;;  %v8707_v62 = vpop.eup %8706  ;;  %v4954_v53 = vadd.f32 1.0, %v8705_v61 }
 0xd30   : > { %8710 = vrcp.f32 %v4947_v40 }
 0xd31   : > { %8712 = vrcp.f32 %v4954_v53 }
 0xd39   : > { %v8709_v1 = vpop.eup %8708 }
 0xd3a   : > { %v8711_v31 = vpop.eup %8710  ;;  %v4958_v6 = vmul.f32 %v8709_v1, %v8707_v62 }
 0xd3b   : > { %v4957_v9 = vmul.f32 %v8711_v31, %v10460_v0  ;;  %v8713_v59 = vpop.eup %8712 }
 0xd3d   : > { %v4959_v7 = vadd.f32 %v4958_v6, %v4957_v9 }
 0xd3f   : > { %8714 = vtanh.f32 %v4959_v7  ;;  %v10508_v33 = vsel %vm4966_vm11, %v4959_v7, %v10460_v0  ;;  %v5287_v7 = vstv %s5286_s30 }
 0xd40   : > { %vm5288_vm12 = vcmp.eq.s32.totalorder %v5287_v7, 1  ;;  %v8443_v7 = vld [vmem:[#allocation11 + $0x6c] ss:$16 sps:$4 sm:$0xff]  }
 0xd49   : > { %v8715_v2 = vpop.eup %8714 }
 0xd4a   : > { %v4961_v39 = vmul.f32 %v8715_v2, %v8713_v59 }
 0xd4c   : > { %v10511_v35 = vsel %vm4966_vm11, %v4961_v39, %v10463_v5 }
 0xd4d   : > { %v4971_v45 = vpack.c.bf16 %v10511_v35, %v10511_v35 }
 0xd4f   : > { %4973 = vst [vmem:[#allocation5 + $0x2c] sm:$0xf] %v4971_v45  ;;  %5207 = vmatmul.mubr.bf16.vlgmr.msra.gmra.mrb[80].mxu0 %v4971_v45  ;;  %5248 = vmatmul.mubr.bf16.vlgmr.msra.gmra.mrb[80].mxu1 %v4971_v45 }
 0xd50   : > { %5497 = vmatpush1.bf16.msra.mxu0 %v10359_v18  ;;  %5538 = vmatpush1.bf16.msra.mxu1 %v10361_v11 }
 0xd51   : > { %5498 = vmatprep.subr.bf16.mxu0 %v10367_v4  ;;  %5539 = vmatprep.subr.bf16.mxu1 %v10369_v58 }
 0xd52   : > { %5528 = vmatprep.mubr.bf16.mxu0 %v10967_v24  ;;  %5569 = vmatprep.mubr.bf16.mxu1 %v10967_v24 }
 0xd54   : > { %5499 = vmatpush1.bf16.msra.mxu0 %v10371_v15  ;;  %5540 = vmatpush1.bf16.msra.mxu1 %v10373_v22 }
 0xd55   : > { %5500 = vmatprep.subr.bf16.mxu0 %v10379_v25  ;;  %5541 = vmatprep.subr.bf16.mxu1 %v10381_v21 }
 0xd58   : > { %5501 = vmatpush1.bf16.msra.mxu0 %v10383_v26  ;;  %5542 = vmatpush1.bf16.msra.mxu1 %v10385_v63 }
 0xd59   : > { %5502 = vmatprep.subr.bf16.mxu0 %v10391_v56  ;;  %5543 = vmatprep.subr.bf16.mxu1 %v10393_v28 }
 0xd5c   : > { %5503 = vmatpush1.bf16.msra.mxu0 %v10395_v42  ;;  %5544 = vmatpush1.bf16.msra.mxu1 %v10397_v43 }
 0xd5d   : > { %5504 = vmatprep.subr.bf16.mxu0 %v10403_v44  ;;  %5545 = vmatprep.subr.bf16.mxu1 %v10405_v47 }
 0xd60   : > { %5505 = vmatpush1.bf16.msra.mxu0 %v10407_v19  ;;  %5546 = vmatpush1.bf16.msra.mxu1 %v10409_v23 }
 0xd61   : > { %5506 = vmatprep.subr.bf16.mxu0 %v10415_v48  ;;  %5547 = vmatprep.subr.bf16.mxu1 %v10417_v49 }
 0xd64   : > { %5507 = vmatpush1.bf16.msra.mxu0 %v10419_v50  ;;  %5548 = vmatpush1.bf16.msra.mxu1 %v10421_v51 }
 0xd65   : > { %5508 = vmatprep.subr.bf16.mxu0 %v10427_v52  ;;  %5549 = vmatprep.subr.bf16.mxu1 %v10429_v14 }
 0xd68   : > { %5509 = vmatpush1.bf16.msra.mxu0 %v10431_v13  ;;  %5550 = vmatpush1.bf16.msra.mxu1 %v10433_v29 }
 0xd69   : > { %5510 = vmatprep.subr.bf16.mxu0 %v10439_v8  ;;  %5551 = vmatprep.subr.bf16.mxu1 %v10441_v30 }
 0xd6c   : > { %5511 = vmatpush1.bf16.msra.mxu0 %v10443_v37  ;;  %5552 = vmatpush1.bf16.msra.mxu1 %v10445_v60 }
 0xd6d   : > { %5818 = vmatprep.subr.bf16.mxu0 %v10355_v54  ;;  %5859 = vmatprep.subr.bf16.mxu1 %v10357_v57 }
 0xe22   : > { %v5208_v0 = vpop.f32.mrb[80].mxu0  ;;  %v5249_v5 = vpop.f32.mrb[80].mxu1 }
 0xe23   : > { %v5256_v38 = vadd.f32 %v5208_v0, %v10998_v34  ;;  %v5258_v17 = vadd.f32 %v5249_v5, %v10999_v10  ;;  %v5210_v20 = vpop.f32.mrb[81].mxu0  ;;  %v5251_v32 = vpop.f32.mrb[81].mxu1 }
 0xe24   : > { %v5257_v41 = vadd.f32 %v5210_v20, %v11000_v16  ;;  %v5259_v55 = vadd.f32 %v5251_v32, %v11001_v46  ;;  %v5212_v27 = vpop.f32.mrb[82].mxu0  ;;  %v5253_v12 = vpop.f32.mrb[82].mxu1 }
 0xe25   : > { %v7821_v36 = vmul.f32 -1.442695, %v5256_v38  ;;  %v5213_v40 = vpop.f32.mrb[83].mxu0  ;;  %v5254_v54 = vpop.f32.mrb[83].mxu1  ;;  %v8422_v12 = vld [vmem:[#allocation11 + $0x4] ss:$16 sps:$4 sm:$0xff]  }
 0xe26   : > { %v7822_v61 = vmul.f32 -1.442695, %v5257_v41  ;;  %v7823_v57 = vmul.f32 -1.442695, %v5259_v55  ;;  %v8420_v40 = vld [vmem:[#allocation11] ss:$16 sps:$4 sm:$0xff]  }
 0xe27   : > { %8716 = vpow2.f32 %v7821_v36  ;;  %v8425_v36 = vld [vmem:[#allocation11 + $0xc] ss:$16 sps:$4 sm:$0xff]   ;;  %v8423_v54 = vld [vmem:[#allocation11 + $0x8] ss:$16 sps:$4 sm:$0xff]  }
 0xe28   : > { %8718 = vpow2.f32 %v7822_v61  ;;  %v8428_v61 = vld [vmem:[#allocation11 + $0x24] ss:$16 sps:$4 sm:$0xff]  }
 0xe29   : > { %8720 = vpow2.f32 %v7823_v57  ;;  %v8431_v57 = vld [vmem:[#allocation11 + $0x2c] ss:$16 sps:$4 sm:$0xff]  }
 0xe2a   : > { %8722 = vtanh.f32 %v5258_v17 }
 0xe31   : > { %v8717_v62 = vpop.eup %8716 }
 0xe32   : > { %v8719_v1 = vpop.eup %8718  ;;  %v5263_v3 = vadd.f32 1.0, %v8717_v62  ;;  %v8426_v62 = vld [vmem:[#allocation11 + $0x20] ss:$16 sps:$4 sm:$0xff]  }
 0xe33   : > { %v5269_v31 = vadd.f32 1.0, %v8719_v1  ;;  %v8721_v6 = vpop.eup %8720  ;;  %v8429_v1 = vld [vmem:[#allocation11 + $0x28] ss:$16 sps:$4 sm:$0xff]  }
 0xe34   : > { %8724 = vrcp.f32 %v5263_v3  ;;  %v8723_v53 = vpop.eup %8722  ;;  %v5276_v39 = vadd.f32 1.0, %v8721_v6  ;;  %v8434_v3 = vld [vmem:[#allocation11 + $0x44] ss:$16 sps:$4 sm:$0xff]   ;;  %v8432_v6 = vld [vmem:[#allocation11 + $0x40] ss:$16 sps:$4 sm:$0xff]  }
 0xe35   : > { %8726 = vrcp.f32 %v5269_v31  ;;  %v8437_v31 = vld [vmem:[#allocation11 + $0x4c] ss:$16 sps:$4 sm:$0xff]  }
 0xe36   : > { %8728 = vrcp.f32 %v5276_v39  ;;  %v8446_v39 = vld [vmem:[#allocation11 + $0x84] ss:$16 sps:$4 sm:$0xff]  }
 0xe3e   : > { %v8725_v9 = vpop.eup %8724 }
 0xe3f   : > { %v8727_v59 = vpop.eup %8726  ;;  %v5280_v2 = vmul.f32 %v8725_v9, %v8723_v53  ;;  %v8435_v53 = vld [vmem:[#allocation11 + $0x48] ss:$16 sps:$4 sm:$0xff]   ;;  %v8440_v9 = vld [vmem:[#allocation11 + $0x64] ss:$16 sps:$4 sm:$0xff]  }
 0xe40   : > { %v5279_v45 = vmul.f32 %v8727_v59, %v10508_v33  ;;  %v8729_v34 = vpop.eup %8728  ;;  %v8438_v59 = vld [vmem:[#allocation11 + $0x60] ss:$16 sps:$4 sm:$0xff]  }
 0xe42   : > { %v5281_v0 = vadd.f32 %v5280_v2, %v5279_v45  ;;  %v8441_v2 = vld [vmem:[#allocation11 + $0x68] ss:$16 sps:$4 sm:$0xff]   ;;  %v8449_v45 = vld [vmem:[#allocation11 + $0x8c] ss:$16 sps:$4 sm:$0xff]  }
 0xe44   : > { %8730 = vtanh.f32 %v5281_v0  ;;  %v10556_v5 = vsel %vm5288_vm12, %v5281_v0, %v10508_v33  ;;  %v8444_v0 = vld [vmem:[#allocation11 + $0x80] ss:$16 sps:$4 sm:$0xff]  }
 0xe4e   : > { %v8731_v38 = vpop.eup %8730 }
 0xe4f   : > { %v5283_v10 = vmul.f32 %v8731_v38, %v8729_v34  ;;  %v8452_v34 = vld [vmem:[#allocation11 + $0xa4] ss:$16 sps:$4 sm:$0xff]   ;;  %v8455_v38 = vld [vmem:[#allocation11 + $0xac] ss:$16 sps:$4 sm:$0xff]  }
 0xe51   : > { %v10559_v17 = vsel %vm5288_vm12, %v5283_v10, %v10511_v35  ;;  %v8450_v10 = vld [vmem:[#allocation11 + $0xa0] ss:$16 sps:$4 sm:$0xff]  }
 0xe52   : > { %v5293_v20 = vpack.c.bf16 %v10559_v17, %v10559_v17 }
 0xe54   : > { %5295 = vst [vmem:[#allocation5 + $0x30] sm:$0xf] %v5293_v20  ;;  %5529 = vmatmul.mubr.bf16.vlgmr.msra.gmra.mrb[84].mxu0 %v5293_v20  ;;  %5570 = vmatmul.mubr.bf16.vlgmr.msra.gmra.mrb[84].mxu1 %v5293_v20  ;;  %v8458_v20 = vld [vmem:[#allocation11 + $0xc4] ss:$16 sps:$4 sm:$0xff]  }
 0xe55   : > { %5819 = vmatpush1.bf16.msra.mxu0 %v10359_v18  ;;  %5860 = vmatpush1.bf16.msra.mxu1 %v10361_v11 }
 0xe56   : > { %5820 = vmatprep.subr.bf16.mxu0 %v10367_v4  ;;  %5861 = vmatprep.subr.bf16.mxu1 %v10369_v58  ;;  %v11002_v4 = vld [vmem:[#allocation61_spill] sm:$0xff] }
 0xe57   : > { %5850 = vmatprep.mubr.bf16.mxu0 %v10967_v24  ;;  %5891 = vmatprep.mubr.bf16.mxu1 %v10967_v24 }
 0xe59   : > { %5821 = vmatpush1.bf16.msra.mxu0 %v10371_v15  ;;  %5862 = vmatpush1.bf16.msra.mxu1 %v10373_v22  ;;  %v11003_v15 = vld [vmem:[#allocation62_spill] sm:$0xff] }
 0xe5a   : > { %5822 = vmatprep.subr.bf16.mxu0 %v10379_v25  ;;  %5863 = vmatprep.subr.bf16.mxu1 %v10381_v21 }
 0xe5d   : > { %5823 = vmatpush1.bf16.msra.mxu0 %v10383_v26  ;;  %5864 = vmatpush1.bf16.msra.mxu1 %v10385_v63  ;;  %v11004_v26 = vld [vmem:[#allocation63_spill] sm:$0xff] }
 0xe5e   : > { %5824 = vmatprep.subr.bf16.mxu0 %v10391_v56  ;;  %5865 = vmatprep.subr.bf16.mxu1 %v10393_v28  ;;  %v11005_v56 = vld [vmem:[#allocation64_spill] sm:$0xff] }
 0xe61   : > { %5825 = vmatpush1.bf16.msra.mxu0 %v10395_v42  ;;  %5866 = vmatpush1.bf16.msra.mxu1 %v10397_v43 }
 0xe62   : > { %5826 = vmatprep.subr.bf16.mxu0 %v10403_v44  ;;  %5867 = vmatprep.subr.bf16.mxu1 %v10405_v47 }
 0xe65   : > { %5827 = vmatpush1.bf16.msra.mxu0 %v10407_v19  ;;  %5868 = vmatpush1.bf16.msra.mxu1 %v10409_v23 }
 0xe66   : > { %5828 = vmatprep.subr.bf16.mxu0 %v10415_v48  ;;  %5869 = vmatprep.subr.bf16.mxu1 %v10417_v49 }
 0xe69   : > { %5829 = vmatpush1.bf16.msra.mxu0 %v10419_v50  ;;  %5870 = vmatpush1.bf16.msra.mxu1 %v10421_v51 }
 0xe6a   : > { %5830 = vmatprep.subr.bf16.mxu0 %v10427_v52  ;;  %5871 = vmatprep.subr.bf16.mxu1 %v10429_v14 }
 0xe6d   : > { %5831 = vmatpush1.bf16.msra.mxu0 %v10431_v13  ;;  %5872 = vmatpush1.bf16.msra.mxu1 %v10433_v29 }
 0xe6e   : > { %5832 = vmatprep.subr.bf16.mxu0 %v10439_v8  ;;  %5873 = vmatprep.subr.bf16.mxu1 %v10441_v30  ;;  %v5609_v8 = vstv %s5608_s13 }
 0xe6f   : > { %vm5610_vm13 = vcmp.eq.s32.totalorder %v5609_v8, 1 }
 0xe71   : > { %5833 = vmatpush1.bf16.msra.mxu0 %v10443_v37  ;;  %5874 = vmatpush1.bf16.msra.mxu1 %v10445_v60 }
 0xe72   : > { %6140 = vmatprep.subr.bf16.mxu0 %v8422_v12  ;;  %6181 = vmatprep.subr.bf16.mxu1 %v8425_v36 }
 0xf27   : > { %v5530_v18 = vpop.f32.mrb[84].mxu0  ;;  %v5571_v11 = vpop.f32.mrb[84].mxu1 }
 0xf28   : > { %v5578_v58 = vadd.f32 %v5530_v18, %v11002_v4  ;;  %v5580_v22 = vadd.f32 %v5571_v11, %v11003_v15  ;;  %v5532_v25 = vpop.f32.mrb[85].mxu0  ;;  %v5573_v21 = vpop.f32.mrb[85].mxu1  ;;  %v8461_v18 = vld [vmem:[#allocation11 + $0xcc] ss:$16 sps:$4 sm:$0xff]   ;;  %v8456_v11 = vld [vmem:[#allocation11 + $0xc0] ss:$16 sps:$4 sm:$0xff]  }
 0xf29   : > { %v5579_v63 = vadd.f32 %v5532_v25, %v11004_v26  ;;  %v5581_v28 = vadd.f32 %v5573_v21, %v11005_v56  ;;  %v5534_v42 = vpop.f32.mrb[86].mxu0  ;;  %v5575_v43 = vpop.f32.mrb[86].mxu1  ;;  %v8459_v4 = vld [vmem:[#allocation11 + $0xc8] ss:$16 sps:$4 sm:$0xff]   ;;  %v8467_v15 = vld [vmem:[#allocation11 + $0xec] ss:$16 sps:$4 sm:$0xff]  }
 0xf2a   : > { %v7856_v44 = vmul.f32 -1.442695, %v5578_v58  ;;  %v5535_v47 = vpop.f32.mrb[87].mxu0  ;;  %v5576_v19 = vpop.f32.mrb[87].mxu1  ;;  %v8464_v58 = vld [vmem:[#allocation11 + $0xe4] ss:$16 sps:$4 sm:$0xff]  }
 0xf2b   : > { %v7857_v23 = vmul.f32 -1.442695, %v5579_v63  ;;  %v7858_v48 = vmul.f32 -1.442695, %v5581_v28  ;;  %v8465_v25 = vld [vmem:[#allocation11 + $0xe8] ss:$16 sps:$4 sm:$0xff]  }
 0xf2c   : > { %8732 = vpow2.f32 %v7856_v44  ;;  %v8470_v21 = vld [vmem:[#allocation14 + $0x4] ss:$16 sps:$4 sm:$0xff]   ;;  %v8473_v26 = vld [vmem:[#allocation14 + $0xc] ss:$16 sps:$4 sm:$0xff]  }
 0xf2d   : > { %8734 = vpow2.f32 %v7857_v23  ;;  %v11006_v28 = vld [vmem:[#allocation65_spill] sm:$0xff]  ;;  %v11007_v43 = vld [vmem:[#allocation66_spill] sm:$0xff]  ;;  %v11008_v23 = vld [vmem:[#allocation67_spill] sm:$0xff] }
 0xf2e   : > { %8736 = vpow2.f32 %v7858_v48 }
 0xf2f   : > { %8738 = vtanh.f32 %v5580_v22  ;;  %v8462_v22 = vld [vmem:[#allocation11 + $0xe0] ss:$16 sps:$4 sm:$0xff]  }
 0xf36   : > { %v8733_v49 = vpop.eup %8732 }
 0xf37   : > { %v8735_v50 = vpop.eup %8734  ;;  %v5585_v51 = vadd.f32 1.0, %v8733_v49  ;;  %v11009_v49 = vld [vmem:[#allocation68_spill] sm:$0xff] }
 0xf38   : > { %v5591_v52 = vadd.f32 1.0, %v8735_v50  ;;  %v8737_v14 = vpop.eup %8736 }
 0xf39   : > { %8740 = vrcp.f32 %v5585_v51  ;;  %v8739_v13 = vpop.eup %8738  ;;  %v5598_v60 = vadd.f32 1.0, %v8737_v14 }
 0xf3a   : > { %8742 = vrcp.f32 %v5591_v52 }
 0xf3b   : > { %8744 = vrcp.f32 %v5598_v60 }
 0xf43   : > { %v8741_v29 = vpop.eup %8740 }
 0xf44   : > { %v8743_v30 = vpop.eup %8742  ;;  %v5602_v37 = vmul.f32 %v8741_v29, %v8739_v13 }
 0xf45   : > { %v5601_v33 = vmul.f32 %v8743_v30, %v10556_v5  ;;  %v8745_v16 = vpop.eup %8744 }
 0xf47   : > { %v5603_v35 = vadd.f32 %v5602_v37, %v5601_v33 }
 0xf49   : > { %8746 = vtanh.f32 %v5603_v35  ;;  %v10602_v32 = vsel %vm5610_vm13, %v5603_v35, %v10556_v5  ;;  %v8447_v5 = vld [vmem:[#allocation11 + $0x88] ss:$16 sps:$4 sm:$0xff]  }
 0xf53   : > { %v8747_v41 = vpop.eup %8746 }
 0xf54   : > { %v5605_v46 = vmul.f32 %v8747_v41, %v8745_v16 }
 0xf56   : > { %v10605_v55 = vsel %vm5610_vm13, %v5605_v46, %v10559_v17  ;;  %v8453_v17 = vld [vmem:[#allocation11 + $0xa8] ss:$16 sps:$4 sm:$0xff]  }
 0xf57   : > { %v5615_v27 = vpack.c.bf16 %v10605_v55, %v10605_v55 }
 0xf59   : > { %5617 = vst [vmem:[#allocation5 + $0x34] sm:$0xf] %v5615_v27  ;;  %5851 = vmatmul.mubr.bf16.vlgmr.msra.gmra.mrb[88].mxu0 %v5615_v27  ;;  %5892 = vmatmul.mubr.bf16.vlgmr.msra.gmra.mrb[88].mxu1 %v5615_v27  ;;  %v5931_v27 = vstv %s5930_s5 }
 0xf5a   : > { %6172 = vmatprep.mubr.bf16.mxu0 %v10967_v24  ;;  %6213 = vmatprep.mubr.bf16.mxu1 %v10967_v24  ;;  %vm5932_vm14 = vcmp.eq.s32.totalorder %v5931_v27, 1 }
 0xf5b   : > { %6141 = vmatpush1.bf16.msra.mxu0 %v8420_v40  ;;  %6182 = vmatpush1.bf16.msra.mxu1 %v8423_v54 }
 0xf5c   : > { %6142 = vmatprep.subr.bf16.mxu0 %v8428_v61  ;;  %6183 = vmatprep.subr.bf16.mxu1 %v8431_v57 }
 0xf5f   : > { %6143 = vmatpush1.bf16.msra.mxu0 %v8426_v62  ;;  %6184 = vmatpush1.bf16.msra.mxu1 %v8429_v1 }
 0xf60   : > { %6144 = vmatprep.subr.bf16.mxu0 %v8434_v3  ;;  %6185 = vmatprep.subr.bf16.mxu1 %v8437_v31 }
 0xf63   : > { %6145 = vmatpush1.bf16.msra.mxu0 %v8432_v6  ;;  %6186 = vmatpush1.bf16.msra.mxu1 %v8435_v53  ;;  %v8468_v6 = vld [vmem:[#allocation14] ss:$16 sps:$4 sm:$0xff]   ;;  %v8471_v53 = vld [vmem:[#allocation14 + $0x8] ss:$16 sps:$4 sm:$0xff]  }
 0xf64   : > { %6146 = vmatprep.subr.bf16.mxu0 %v8440_v9  ;;  %6187 = vmatprep.subr.bf16.mxu1 %v8443_v7  ;;  %v8476_v7 = vld [vmem:[#allocation14 + $0x24] ss:$16 sps:$4 sm:$0xff]  }
 0xf67   : > { %6147 = vmatpush1.bf16.msra.mxu0 %v8438_v59  ;;  %6188 = vmatpush1.bf16.msra.mxu1 %v8441_v2  ;;  %v8479_v59 = vld [vmem:[#allocation14 + $0x2c] ss:$16 sps:$4 sm:$0xff]   ;;  %v8477_v2 = vld [vmem:[#allocation14 + $0x28] ss:$16 sps:$4 sm:$0xff]  }
 0xf68   : > { %6148 = vmatprep.subr.bf16.mxu0 %v8446_v39  ;;  %6189 = vmatprep.subr.bf16.mxu1 %v8449_v45  ;;  %v8482_v39 = vld [vmem:[#allocation14 + $0x44] ss:$16 sps:$4 sm:$0xff]   ;;  %v8485_v45 = vld [vmem:[#allocation14 + $0x4c] ss:$16 sps:$4 sm:$0xff]  }
 0xf6b   : > { %6149 = vmatpush1.bf16.msra.mxu0 %v8444_v0  ;;  %6190 = vmatpush1.bf16.msra.mxu1 %v8447_v5  ;;  %v8483_v0 = vld [vmem:[#allocation14 + $0x48] ss:$16 sps:$4 sm:$0xff]   ;;  %v8488_v5 = vld [vmem:[#allocation14 + $0x64] ss:$16 sps:$4 sm:$0xff]  }
 0xf6c   : > { %6150 = vmatprep.subr.bf16.mxu0 %v8452_v34  ;;  %6191 = vmatprep.subr.bf16.mxu1 %v8455_v38  ;;  %v8491_v34 = vld [vmem:[#allocation14 + $0x6c] ss:$16 sps:$4 sm:$0xff]   ;;  %v8486_v38 = vld [vmem:[#allocation14 + $0x60] ss:$16 sps:$4 sm:$0xff]  }
 0xf6f   : > { %6151 = vmatpush1.bf16.msra.mxu0 %v8450_v10  ;;  %6192 = vmatpush1.bf16.msra.mxu1 %v8453_v17  ;;  %v8489_v10 = vld [vmem:[#allocation14 + $0x68] ss:$16 sps:$4 sm:$0xff]   ;;  %v8494_v17 = vld [vmem:[#allocation14 + $0x84] ss:$16 sps:$4 sm:$0xff]  }
 0xf70   : > { %6152 = vmatprep.subr.bf16.mxu0 %v8458_v20  ;;  %6193 = vmatprep.subr.bf16.mxu1 %v8461_v18  ;;  %v8497_v20 = vld [vmem:[#allocation14 + $0x8c] ss:$16 sps:$4 sm:$0xff]   ;;  %v8492_v18 = vld [vmem:[#allocation14 + $0x80] ss:$16 sps:$4 sm:$0xff]  }
 0xf73   : > { %6153 = vmatpush1.bf16.msra.mxu0 %v8456_v11  ;;  %6194 = vmatpush1.bf16.msra.mxu1 %v8459_v4  ;;  %v8495_v11 = vld [vmem:[#allocation14 + $0x88] ss:$16 sps:$4 sm:$0xff]   ;;  %v8500_v4 = vld [vmem:[#allocation14 + $0xa4] ss:$16 sps:$4 sm:$0xff]  }
 0xf74   : > { %6154 = vmatprep.subr.bf16.mxu0 %v8464_v58  ;;  %6195 = vmatprep.subr.bf16.mxu1 %v8467_v15  ;;  %v8503_v58 = vld [vmem:[#allocation14 + $0xac] ss:$16 sps:$4 sm:$0xff]   ;;  %v8498_v15 = vld [vmem:[#allocation14 + $0xa0] ss:$16 sps:$4 sm:$0xff]  }
 0xf77   : > { %6155 = vmatpush1.bf16.msra.mxu0 %v8462_v22  ;;  %6196 = vmatpush1.bf16.msra.mxu1 %v8465_v25  ;;  %v8501_v22 = vld [vmem:[#allocation14 + $0xa8] ss:$16 sps:$4 sm:$0xff]   ;;  %v8506_v25 = vld [vmem:[#allocation14 + $0xc4] ss:$16 sps:$4 sm:$0xff]  }
 0xf78   : > { %6540 = vmatprep.subr.bf16.mxu0 %v8470_v21  ;;  %6653 = vmatprep.subr.bf16.mxu1 %v8473_v26  ;;  %v8509_v21 = vld [vmem:[#allocation14 + $0xcc] ss:$16 sps:$4 sm:$0xff]   ;;  %v8504_v26 = vld [vmem:[#allocation14 + $0xc0] ss:$16 sps:$4 sm:$0xff]  }
0x102c   : > { %v5852_v63 = vpop.f32.mrb[88].mxu0  ;;  %v5893_v56 = vpop.f32.mrb[88].mxu1 }
0x102d   : > { %v5900_v42 = vadd.f32 %v5852_v63, %v11006_v28  ;;  %v5902_v44 = vadd.f32 %v5893_v56, %v11007_v43  ;;  %v5854_v47 = vpop.f32.mrb[89].mxu0  ;;  %v5895_v19 = vpop.f32.mrb[89].mxu1  ;;  %v8507_v63 = vld [vmem:[#allocation14 + $0xc8] ss:$16 sps:$4 sm:$0xff]   ;;  %v8512_v56 = vld [vmem:[#allocation14 + $0xe4] ss:$16 sps:$4 sm:$0xff]  }
0x102e   : > { %v5901_v48 = vadd.f32 %v5854_v47, %v11008_v23  ;;  %v5903_v50 = vadd.f32 %v5895_v19, %v11009_v49  ;;  %v5856_v51 = vpop.f32.mrb[90].mxu0  ;;  %v5897_v52 = vpop.f32.mrb[90].mxu1  ;;  %v8515_v28 = vld [vmem:[#allocation14 + $0xec] ss:$16 sps:$4 sm:$0xff]   ;;  %v8513_v43 = vld [vmem:[#allocation14 + $0xe8] ss:$16 sps:$4 sm:$0xff]  }
0x102f   : > { %v7891_v14 = vmul.f32 -1.442695, %v5900_v42  ;;  %v5857_v13 = vpop.f32.mrb[91].mxu0  ;;  %v5898_v29 = vpop.f32.mrb[91].mxu1  ;;  %v8510_v42 = vld [vmem:[#allocation14 + $0xe0] ss:$16 sps:$4 sm:$0xff]  }
0x1030   : > { %v7892_v8 = vmul.f32 -1.442695, %v5901_v48  ;;  %v7893_v30 = vmul.f32 -1.442695, %v5903_v50  ;;  %v8517_v47 = vld [vmem:[#allocation5 + $0x8] sm:$0xff]   ;;  %v8518_v19 = vld [vmem:[#allocation5 + $0x10] sm:$0xff]  }
0x1031   : > { %8748 = vpow2.f32 %v7891_v14  ;;  %v8519_v23 = vld [vmem:[#allocation5 + $0x18] sm:$0xff]   ;;  %v8520_v48 = vld [vmem:[#allocation5 + $0x20] sm:$0xff]   ;;  %v8521_v49 = vld [vmem:[#allocation5 + $0x28] sm:$0xff]  }
0x1032   : > { %8750 = vpow2.f32 %v7892_v8  ;;  %v8522_v50 = vld [vmem:[#allocation5 + $0x30] sm:$0xff]  }
0x1033   : > { %8752 = vpow2.f32 %v7893_v30  ;;  %v11010_v14 = vld [vmem:[#allocation69_spill] sm:$0xff]  ;;  %v11011_v29 = vld [vmem:[#allocation70_spill] sm:$0xff] }
0x1034   : > { %8754 = vtanh.f32 %v5902_v44  ;;  %v8516_v44 = vld [vmem:[#allocation5] sm:$0xff]  }
0x103b   : > { %v8749_v37 = vpop.eup %8748 }
0x103c   : > { %v8751_v60 = vpop.eup %8750  ;;  %v5907_v33 = vadd.f32 1.0, %v8749_v37 }
0x103d   : > { %v5913_v35 = vadd.f32 1.0, %v8751_v60  ;;  %v8753_v16 = vpop.eup %8752  ;;  %v11012_v60 = vld [vmem:[#allocation71_spill] sm:$0xff] }
0x103e   : > { %8756 = vrcp.f32 %v5907_v33  ;;  %v8755_v41 = vpop.eup %8754  ;;  %v5920_v40 = vadd.f32 1.0, %v8753_v16 }
0x103f   : > { %8758 = vrcp.f32 %v5913_v35  ;;  %v11013_v35 = vld [vmem:[#allocation72_spill] sm:$0xff] }
0x1040   : > { %8760 = vrcp.f32 %v5920_v40 }
0x1048   : > { %v8757_v46 = vpop.eup %8756 }
0x1049   : > { %v8759_v12 = vpop.eup %8758  ;;  %v5924_v36 = vmul.f32 %v8757_v46, %v8755_v41 }
0x104a   : > { %v5923_v54 = vmul.f32 %v8759_v12, %v10602_v32  ;;  %v8761_v62 = vpop.eup %8760 }
0x104c   : > { %v5925_v61 = vadd.f32 %v5924_v36, %v5923_v54 }
0x104e   : > { %8762 = vtanh.f32 %v5925_v61  ;;  %v10618_v57 = vsel %vm5932_vm14, %v5925_v61, %v10602_v32  ;;  %v8474_v32 = vld [vmem:[#allocation14 + $0x20] ss:$16 sps:$4 sm:$0xff]  }
0x1058   : > { %v8763_v1 = vpop.eup %8762 }
0x1059   : > { %v5927_v3 = vmul.f32 %v8763_v1, %v8761_v62 }
0x105b   : > { %v10621_v31 = vsel %vm5932_vm14, %v5927_v3, %v10605_v55  ;;  %v8480_v55 = vld [vmem:[#allocation14 + $0x40] ss:$16 sps:$4 sm:$0xff]  }
0x105c   : > { %v5937_v9 = vpack.c.bf16 %v10621_v31, %v10621_v31 }
0x105e   : > { %5939 = vst [vmem:[#allocation5 + $0x38] sm:$0xf] %v5937_v9  ;;  %6173 = vmatmul.mubr.bf16.vlgmr.msra.gmra.mrb[92].mxu0 %v5937_v9  ;;  %6214 = vmatmul.mubr.bf16.vlgmr.msra.gmra.mrb[92].mxu1 %v5937_v9 }
0x105f   : > { %6541 = vmatpush1.bf16.msra.mxu0 %v8468_v6  ;;  %6654 = vmatpush1.bf16.msra.mxu1 %v8471_v53  ;;  %v6310_v6 = vld [vmem:[%s11014_s25] sm:$0xf] }
0x1060   : > { %6542 = vmatprep.subr.bf16.mxu0 %v8476_v7  ;;  %6655 = vmatprep.subr.bf16.mxu1 %v8479_v59  ;;  %v10649_v7 = vstv %s6252_s19 }
0x1061   : > { %6572 = vmatprep.mubr.bf16.mxu0 %v10967_v24  ;;  %6685 = vmatprep.mubr.bf16.mxu1 %v10967_v24  ;;  %vm6254_vm15 = vcmp.eq.s32.totalorder %v10649_v7, 1 }
0x1063   : > { %6543 = vmatpush1.bf16.msra.mxu0 %v8474_v32  ;;  %6656 = vmatpush1.bf16.msra.mxu1 %v8477_v2 }
0x1064   : > { %6544 = vmatprep.subr.bf16.mxu0 %v8482_v39  ;;  %6657 = vmatprep.subr.bf16.mxu1 %v8485_v45  ;;  %v11015_v39 = vld [vmem:[#allocation26_spill] sm:$0xff] }
0x1065   : > { %v11016_v45 = vsub.s32 0, %v11015_v39 }
0x1067   : > { %6545 = vmatpush1.bf16.msra.mxu0 %v8480_v55  ;;  %6658 = vmatpush1.bf16.msra.mxu1 %v8483_v0  ;;  %v10653_v55 = vrot.slane %v6310_v6, %v11016_v45  ;;  %v11017_v0 = vsub.s32 2, %v11015_v39 }
0x1068   : > { %6546 = vmatprep.subr.bf16.mxu0 %v8488_v5  ;;  %6659 = vmatprep.subr.bf16.mxu1 %v8491_v34 }
0x1069   : > { %v10657_v5 = vrot.slane %v6310_v6, %v11017_v0 }
0x106b   : > { %6547 = vmatpush1.bf16.msra.mxu0 %v8486_v38  ;;  %6660 = vmatpush1.bf16.msra.mxu1 %v8489_v10  ;;  %v11018_v38 = vsub.s32 1, %v11015_v39 }
0x106c   : > { %6548 = vmatprep.subr.bf16.mxu0 %v8494_v17  ;;  %6661 = vmatprep.subr.bf16.mxu1 %v8497_v20  ;;  %v11019_v17 = vsub.s32 3, %v11015_v39 }
0x106d   : > { %v10662_v10 = vrot.slane %v6310_v6, %v11018_v38 }
0x106e   : > { %v10666_v20 = vrot.slane %v6310_v6, %v11019_v17 }
0x106f   : > { %6549 = vmatpush1.bf16.msra.mxu0 %v8492_v18  ;;  %6662 = vmatpush1.bf16.msra.mxu1 %v8495_v11 }
0x1070   : > { %6550 = vmatprep.subr.bf16.mxu0 %v8500_v4  ;;  %6663 = vmatprep.subr.bf16.mxu1 %v8503_v58 }
0x1073   : > { %6551 = vmatpush1.bf16.msra.mxu0 %v8498_v15  ;;  %6664 = vmatpush1.bf16.msra.mxu1 %v8501_v22 }
0x1074   : > { %6552 = vmatprep.subr.bf16.mxu0 %v8506_v25  ;;  %6665 = vmatprep.subr.bf16.mxu1 %v8509_v21 }
0x1077   : > { %6553 = vmatpush1.bf16.msra.mxu0 %v8504_v26  ;;  %6666 = vmatpush1.bf16.msra.mxu1 %v8507_v63 }
0x1078   : > { %6554 = vmatprep.subr.bf16.mxu0 %v8512_v56  ;;  %6667 = vmatprep.subr.bf16.mxu1 %v8515_v28 }
0x107b   : > { %6555 = vmatpush1.bf16.msra.mxu0 %v8510_v42  ;;  %6668 = vmatpush1.bf16.msra.mxu1 %v8513_v43 }
0x107e   : > { %6573 = vmatmul.mubr.bf16.vlgmr.msra.gmra.mrb[96].mxu0 %v8516_v44  ;;  %6686 = vmatmul.mubr.bf16.vlgmr.msra.gmra.mrb[96].mxu1 %v8516_v44 }
0x107f   : > { %6582 = vmatprep.mubr.bf16.mxu0 %v10967_v24  ;;  %6695 = vmatprep.mubr.bf16.mxu1 %v10967_v24 }
0x1086   : > { %6583 = vmatmul.mubr.bf16.gmra.mrb[100].mxu0 %v8517_v47  ;;  %6696 = vmatmul.mubr.bf16.gmra.mrb[100].mxu1 %v8517_v47 }
0x1087   : > { %6592 = vmatprep.mubr.bf16.mxu0 %v10967_v24  ;;  %6705 = vmatprep.mubr.bf16.mxu1 %v10967_v24 }
0x108e   : > { %6593 = vmatmul.mubr.bf16.gmra.mrb[104].mxu0 %v8518_v19  ;;  %6706 = vmatmul.mubr.bf16.gmra.mrb[104].mxu1 %v8518_v19 }
0x108f   : > { %6602 = vmatprep.mubr.bf16.mxu0 %v10967_v24  ;;  %6715 = vmatprep.mubr.bf16.mxu1 %v10967_v24 }
0x1096   : > { %6603 = vmatmul.mubr.bf16.gmra.mrb[108].mxu0 %v8519_v23  ;;  %6716 = vmatmul.mubr.bf16.gmra.mrb[108].mxu1 %v8519_v23 }
0x1097   : > { %6612 = vmatprep.mubr.bf16.mxu0 %v10967_v24  ;;  %6725 = vmatprep.mubr.bf16.mxu1 %v10967_v24 }
0x109e   : > { %6613 = vmatmul.mubr.bf16.gmra.mrb[112].mxu0 %v8520_v48  ;;  %6726 = vmatmul.mubr.bf16.gmra.mrb[112].mxu1 %v8520_v48 }
0x109f   : > { %6622 = vmatprep.mubr.bf16.mxu0 %v10967_v24  ;;  %6735 = vmatprep.mubr.bf16.mxu1 %v10967_v24 }
0x10a6   : > { %6623 = vmatmul.mubr.bf16.gmra.mrb[116].mxu0 %v8521_v49  ;;  %6736 = vmatmul.mubr.bf16.gmra.mrb[116].mxu1 %v8521_v49 }
0x10a7   : > { %6632 = vmatprep.mubr.bf16.mxu0 %v10967_v24  ;;  %6745 = vmatprep.mubr.bf16.mxu1 %v10967_v24 }
0x10ae   : > { %6633 = vmatmul.mubr.bf16.gmra.mrb[120].mxu0 %v8522_v50  ;;  %6746 = vmatmul.mubr.bf16.gmra.mrb[120].mxu1 %v8522_v50 }
0x10af   : > { %6642 = vmatprep.mubr.bf16.mxu0 %v10967_v24  ;;  %6755 = vmatprep.mubr.bf16.mxu1 %v10967_v24 }
0x1131   : > { %v6174_v51 = vpop.f32.mrb[92].mxu0  ;;  %v6215_v52 = vpop.f32.mrb[92].mxu1 }
0x1132   : > { %v6222_v13 = vadd.f32 %v6174_v51, %v11010_v14  ;;  %v6224_v8 = vadd.f32 %v6215_v52, %v11011_v29  ;;  %v6176_v30 = vpop.f32.mrb[93].mxu0  ;;  %v6217_v37 = vpop.f32.mrb[93].mxu1 }
0x1133   : > { %v6223_v33 = vadd.f32 %v6176_v30, %v11012_v60  ;;  %v6225_v16 = vadd.f32 %v6217_v37, %v11013_v35  ;;  %v6178_v41 = vpop.f32.mrb[94].mxu0  ;;  %v6219_v46 = vpop.f32.mrb[94].mxu1 }
0x1134   : > { %v7926_v27 = vmul.f32 -1.442695, %v6222_v13  ;;  %v6179_v12 = vpop.f32.mrb[95].mxu0  ;;  %v6220_v36 = vpop.f32.mrb[95].mxu1 }
0x1135   : > { %v7927_v40 = vmul.f32 -1.442695, %v6223_v33  ;;  %v7928_v24 = vmul.f32 -1.442695, %v6225_v16 }
0x1136   : > { %8764 = vpow2.f32 %v7926_v27 }
0x1137   : > { %8766 = vpow2.f32 %v7927_v40 }
0x1138   : > { %8768 = vpow2.f32 %v7928_v24 }
0x1139   : > { %8770 = vtanh.f32 %v6224_v8 }
0x1140   : > { %v8765_v54 = vpop.eup %8764 }
0x1141   : > { %v8767_v61 = vpop.eup %8766  ;;  %v6229_v62 = vadd.f32 1.0, %v8765_v54 }
0x1142   : > { %v6235_v1 = vadd.f32 1.0, %v8767_v61  ;;  %v8769_v3 = vpop.eup %8768 }
0x1143   : > { %8772 = vrcp.f32 %v6229_v62  ;;  %v8771_v53 = vpop.eup %8770  ;;  %v6242_v2 = vadd.f32 1.0, %v8769_v3 }
0x1144   : > { %8774 = vrcp.f32 %v6235_v1 }
0x1145   : > { %8776 = vrcp.f32 %v6242_v2 }
0x114d   : > { %v8773_v9 = vpop.eup %8772 }
0x114e   : > { %v8775_v59 = vpop.eup %8774  ;;  %v6246_v32 = vmul.f32 %v8773_v9, %v8771_v53 }
0x114f   : > { %v6245_v34 = vmul.f32 %v8775_v59, %v10618_v57  ;;  %v8777_v35 = vpop.eup %8776 }
0x1151   : > { %v6247_v18 = vadd.f32 %v6246_v32, %v6245_v34  ;;  %v6574_v11 = vpop.f32.mrb[96].mxu0  ;;  %v6687_v4 = vpop.f32.mrb[96].mxu1 }
0x1152   : > { %v6575_v58 = vadd.f32 %v6574_v11, %v10653_v55  ;;  %v6688_v15 = vadd.f32 %v6687_v4, %v10657_v5  ;;  %v6576_v22 = vpop.f32.mrb[97].mxu0  ;;  %v6689_v25 = vpop.f32.mrb[97].mxu1 }
0x1153   : > { %8778 = vtanh.f32 %v6247_v18  ;;  %v6255_v21 = vsel %vm6254_vm15, %v6247_v18, %v10618_v57  ;;  %v6577_v26 = vadd.f32 %v6576_v22, %v10662_v10  ;;  %v6690_v63 = vadd.f32 %v6689_v25, %v10666_v20  ;;  %v6578_v56 = vpop.f32.mrb[98].mxu0  ;;  %v6691_v28 = vpop.f32.mrb[98].mxu1 }
0x1154   : > { %6257 = vst [vmem:[#allocation3] sm:$0xff] %v6255_v21  ;;  %v6579_v42 = vadd.f32 %v6578_v56, %v10653_v55  ;;  %v6692_v43 = vadd.f32 %v6691_v28, %v10657_v5  ;;  %v6580_v44 = vpop.f32.mrb[99].mxu0  ;;  %v6693_v47 = vpop.f32.mrb[99].mxu1 }
0x1155   : > { %v8013_v19 = vpack.c.bf16 %v6577_v26, %v6575_v58  ;;  %v8014_v23 = vpack.c.bf16 %v6690_v63, %v6688_v15  ;;  %v6581_v48 = vadd.f32 %v6580_v44, %v10662_v10  ;;  %v6694_v57 = vadd.f32 %v6693_v47, %v10666_v20 }
0x1157   : > { %7022 = vst [vmem:[%s9398_s11] sm:$0xff] %v8013_v19  ;;  %7023 = vst [vmem:[%s9398_s11 + $0x8] sm:$0xff] %v8014_v23  ;;  %v8015_v49 = vpack.c.bf16 %v6581_v48, %v6579_v42  ;;  %v8016_v50 = vpack.c.bf16 %v6694_v57, %v6692_v43 }
0x1159   : > { %7024 = vst [vmem:[%s9398_s11 + $0x10] sm:$0xff] %v8015_v49  ;;  %7025 = vst [vmem:[%s9398_s11 + $0x18] sm:$0xff] %v8016_v50  ;;  %v6584_v51 = vpop.f32.mrb[100].mxu0  ;;  %v6697_v52 = vpop.f32.mrb[100].mxu1 }
0x115a   : > { %v6585_v14 = vadd.f32 %v6584_v51, %v10653_v55  ;;  %v6698_v13 = vadd.f32 %v6697_v52, %v10657_v5  ;;  %v6586_v29 = vpop.f32.mrb[101].mxu0  ;;  %v6699_v8 = vpop.f32.mrb[101].mxu1 }
0x115b   : > { %v6587_v30 = vadd.f32 %v6586_v29, %v10662_v10  ;;  %v6700_v37 = vadd.f32 %v6699_v8, %v10666_v20  ;;  %v6588_v60 = vpop.f32.mrb[102].mxu0  ;;  %v6701_v33 = vpop.f32.mrb[102].mxu1 }
0x115c   : > { %v6589_v16 = vadd.f32 %v6588_v60, %v10653_v55  ;;  %v6702_v41 = vadd.f32 %v6701_v33, %v10657_v5  ;;  %v6590_v46 = vpop.f32.mrb[103].mxu0  ;;  %v6703_v27 = vpop.f32.mrb[103].mxu1 }
0x115d   : > { %v8779_v12 = vpop.eup %8778  ;;  %v8017_v36 = vpack.c.bf16 %v6587_v30, %v6585_v14  ;;  %v8018_v40 = vpack.c.bf16 %v6700_v37, %v6698_v13  ;;  %v6591_v24 = vadd.f32 %v6590_v46, %v10662_v10  ;;  %v6704_v54 = vadd.f32 %v6703_v27, %v10666_v20 }
0x115e   : > { %v6249_v61 = vmul.f32 %v8779_v12, %v8777_v35 }
0x115f   : > { %7026 = vst [vmem:[%s9398_s11 + $0x20] sm:$0xff] %v8017_v36  ;;  %7027 = vst [vmem:[%s9398_s11 + $0x28] sm:$0xff] %v8018_v40  ;;  %v8019_v62 = vpack.c.bf16 %v6591_v24, %v6589_v16  ;;  %v8020_v1 = vpack.c.bf16 %v6704_v54, %v6702_v41 }
0x1160   : > { %v6256_v3 = vsel %vm6254_vm15, %v6249_v61, %v10621_v31 }
0x1161   : > { %6258 = vst [vmem:[#allocation2] sm:$0xff] %v6256_v3  ;;  %v6259_v6 = vpack.c.bf16 %v6256_v3, %v6256_v3  ;;  %7028 = vst [vmem:[%s9398_s11 + $0x30] sm:$0xff] %v8019_v62  ;;  %v6594_v53 = vpop.f32.mrb[104].mxu0  ;;  %v6707_v9 = vpop.f32.mrb[104].mxu1 }
0x1162   : > { %7029 = vst [vmem:[%s9398_s11 + $0x38] sm:$0xff] %v8020_v1  ;;  %v6595_v59 = vadd.f32 %v6594_v53, %v10653_v55  ;;  %v6708_v32 = vadd.f32 %v6707_v9, %v10657_v5  ;;  %v6596_v2 = vpop.f32.mrb[105].mxu0  ;;  %v6709_v39 = vpop.f32.mrb[105].mxu1 }
0x1163   : > { %6261 = vst [vmem:[#allocation5 + $0x3c] sm:$0xf] %v6259_v6  ;;  %v6597_v45 = vadd.f32 %v6596_v2, %v10662_v10  ;;  %v6710_v31 = vadd.f32 %v6709_v39, %v10666_v20  ;;  %v6598_v7 = vpop.f32.mrb[106].mxu0  ;;  %v6711_v0 = vpop.f32.mrb[106].mxu1 }
0x1164   : > { %v6599_v34 = vadd.f32 %v6598_v7, %v10653_v55  ;;  %v6712_v38 = vadd.f32 %v6711_v0, %v10657_v5  ;;  %v6600_v17 = vpop.f32.mrb[107].mxu0  ;;  %v6713_v18 = vpop.f32.mrb[107].mxu1 }
0x1165   : > { %v8021_v11 = vpack.c.bf16 %v6597_v45, %v6595_v59  ;;  %v8022_v4 = vpack.c.bf16 %v6710_v31, %v6708_v32  ;;  %v6601_v58 = vadd.f32 %v6600_v17, %v10662_v10  ;;  %v6714_v15 = vadd.f32 %v6713_v18, %v10666_v20 }
0x1167   : > { %7030 = vst [vmem:[%s9398_s11 + $0x40] sm:$0xff] %v8021_v11  ;;  %7031 = vst [vmem:[%s9398_s11 + $0x48] sm:$0xff] %v8022_v4  ;;  %v8023_v22 = vpack.c.bf16 %v6601_v58, %v6599_v34  ;;  %v8024_v25 = vpack.c.bf16 %v6714_v15, %v6712_v38 }
0x1169   : > { %7032 = vst [vmem:[%s9398_s11 + $0x50] sm:$0xff] %v8023_v22  ;;  %7033 = vst [vmem:[%s9398_s11 + $0x58] sm:$0xff] %v8024_v25  ;;  %v6604_v21 = vpop.f32.mrb[108].mxu0  ;;  %v6717_v26 = vpop.f32.mrb[108].mxu1 }
0x116a   : > { %v6605_v63 = vadd.f32 %v6604_v21, %v10653_v55  ;;  %v6718_v56 = vadd.f32 %v6717_v26, %v10657_v5  ;;  %v6606_v28 = vpop.f32.mrb[109].mxu0  ;;  %v6719_v42 = vpop.f32.mrb[109].mxu1  ;;  %v8523_v43 = vld [vmem:[#allocation5 + $0x38] sm:$0xff]  }
0x116b   : > { %v6607_v44 = vadd.f32 %v6606_v28, %v10662_v10  ;;  %v6720_v47 = vadd.f32 %v6719_v42, %v10666_v20  ;;  %v6608_v19 = vpop.f32.mrb[110].mxu0  ;;  %v6721_v23 = vpop.f32.mrb[110].mxu1  ;;  %6643 = vmatmul.mubr.bf16.gmra.mrb[124].mxu0 %v8523_v43  ;;  %6756 = vmatmul.mubr.bf16.gmra.mrb[124].mxu1 %v8523_v43 }
0x116c   : > { %v6609_v48 = vadd.f32 %v6608_v19, %v10653_v55  ;;  %v6722_v57 = vadd.f32 %v6721_v23, %v10657_v5  ;;  %v6610_v49 = vpop.f32.mrb[111].mxu0  ;;  %v6723_v50 = vpop.f32.mrb[111].mxu1 }
0x116d   : > { %v8025_v51 = vpack.c.bf16 %v6607_v44, %v6605_v63  ;;  %v8026_v52 = vpack.c.bf16 %v6720_v47, %v6718_v56  ;;  %v6611_v14 = vadd.f32 %v6610_v49, %v10662_v10  ;;  %v6724_v13 = vadd.f32 %v6723_v50, %v10666_v20 }
0x116f   : > { %7034 = vst [vmem:[%s9398_s11 + $0x60] sm:$0xff] %v8025_v51  ;;  %7035 = vst [vmem:[%s9398_s11 + $0x68] sm:$0xff] %v8026_v52  ;;  %v8027_v29 = vpack.c.bf16 %v6611_v14, %v6609_v48  ;;  %v8028_v8 = vpack.c.bf16 %v6724_v13, %v6722_v57 }
0x1171   : > { %7036 = vst [vmem:[%s9398_s11 + $0x70] sm:$0xff] %v8027_v29  ;;  %7037 = vst [vmem:[%s9398_s11 + $0x78] sm:$0xff] %v8028_v8  ;;  %v6614_v30 = vpop.f32.mrb[112].mxu0  ;;  %v6727_v37 = vpop.f32.mrb[112].mxu1 }
0x1172   : > { %v6615_v60 = vadd.f32 %v6614_v30, %v10653_v55  ;;  %v6728_v33 = vadd.f32 %v6727_v37, %v10657_v5  ;;  %v6616_v35 = vpop.f32.mrb[113].mxu0  ;;  %v6729_v16 = vpop.f32.mrb[113].mxu1 }
0x1173   : > { %v6617_v41 = vadd.f32 %v6616_v35, %v10662_v10  ;;  %v6730_v46 = vadd.f32 %v6729_v16, %v10666_v20  ;;  %v6618_v27 = vpop.f32.mrb[114].mxu0  ;;  %v6731_v12 = vpop.f32.mrb[114].mxu1 }
0x1174   : > { %v6619_v36 = vadd.f32 %v6618_v27, %v10653_v55  ;;  %v6732_v40 = vadd.f32 %v6731_v12, %v10657_v5  ;;  %v6620_v24 = vpop.f32.mrb[115].mxu0  ;;  %v6733_v54 = vpop.f32.mrb[115].mxu1 }
0x1175   : > { %v8029_v61 = vpack.c.bf16 %v6617_v41, %v6615_v60  ;;  %v8030_v62 = vpack.c.bf16 %v6730_v46, %v6728_v33  ;;  %v6621_v1 = vadd.f32 %v6620_v24, %v10662_v10  ;;  %v6734_v3 = vadd.f32 %v6733_v54, %v10666_v20 }
0x1177   : > { %7038 = vst [vmem:[%s9398_s11 + $0x80] sm:$0xff] %v8029_v61  ;;  %7039 = vst [vmem:[%s9398_s11 + $0x88] sm:$0xff] %v8030_v62  ;;  %v8031_v6 = vpack.c.bf16 %v6621_v1, %v6619_v36  ;;  %v8032_v53 = vpack.c.bf16 %v6734_v3, %v6732_v40 }
0x1179   : > { %7040 = vst [vmem:[%s9398_s11 + $0x90] sm:$0xff] %v8031_v6  ;;  %7041 = vst [vmem:[%s9398_s11 + $0x98] sm:$0xff] %v8032_v53  ;;  %v6624_v9 = vpop.f32.mrb[116].mxu0  ;;  %v6737_v59 = vpop.f32.mrb[116].mxu1 }
0x117a   : > { %v6625_v32 = vadd.f32 %v6624_v9, %v10653_v55  ;;  %v6738_v2 = vadd.f32 %v6737_v59, %v10657_v5  ;;  %v6626_v39 = vpop.f32.mrb[117].mxu0  ;;  %v6739_v45 = vpop.f32.mrb[117].mxu1  ;;  %v7061_v9 = vld [vmem:[#allocation3] sm:$0xff] (%p7054_p7) }
0x117b   : > { %v6627_v31 = vadd.f32 %v6626_v39, %v10662_v10  ;;  %v6740_v7 = vadd.f32 %v6739_v45, %v10666_v20  ;;  %v6628_v0 = vpop.f32.mrb[118].mxu0  ;;  %v6741_v34 = vpop.f32.mrb[118].mxu1  ;;  %7062 = vst [vmem:[#allocation18] sm:$0xff] (%p7054_p7), %v7061_v9 }
0x117c   : > { %v6629_v38 = vadd.f32 %v6628_v0, %v10653_v55  ;;  %v6742_v17 = vadd.f32 %v6741_v34, %v10657_v5  ;;  %v6630_v18 = vpop.f32.mrb[119].mxu0  ;;  %v6743_v11 = vpop.f32.mrb[119].mxu1 }
0x117d   : > { %v8033_v4 = vpack.c.bf16 %v6627_v31, %v6625_v32  ;;  %v8034_v58 = vpack.c.bf16 %v6740_v7, %v6738_v2  ;;  %v6631_v15 = vadd.f32 %v6630_v18, %v10662_v10  ;;  %v6744_v22 = vadd.f32 %v6743_v11, %v10666_v20 }
0x117f   : > { %7042 = vst [vmem:[%s9398_s11 + $0xa0] sm:$0xff] %v8033_v4  ;;  %7043 = vst [vmem:[%s9398_s11 + $0xa8] sm:$0xff] %v8034_v58  ;;  %v8035_v25 = vpack.c.bf16 %v6631_v15, %v6629_v38  ;;  %v8036_v21 = vpack.c.bf16 %v6744_v22, %v6742_v17 }
0x1181   : > { %7044 = vst [vmem:[%s9398_s11 + $0xb0] sm:$0xff] %v8035_v25  ;;  %7045 = vst [vmem:[%s9398_s11 + $0xb8] sm:$0xff] %v8036_v21  ;;  %v6634_v26 = vpop.f32.mrb[120].mxu0  ;;  %v6747_v63 = vpop.f32.mrb[120].mxu1 }
0x1182   : > { %v6635_v56 = vadd.f32 %v6634_v26, %v10653_v55  ;;  %v6748_v28 = vadd.f32 %v6747_v63, %v10657_v5  ;;  %v6636_v42 = vpop.f32.mrb[121].mxu0  ;;  %v6749_v43 = vpop.f32.mrb[121].mxu1 }
0x1183   : > { %v6637_v44 = vadd.f32 %v6636_v42, %v10662_v10  ;;  %v6750_v47 = vadd.f32 %v6749_v43, %v10666_v20  ;;  %v6638_v19 = vpop.f32.mrb[122].mxu0  ;;  %v6751_v23 = vpop.f32.mrb[122].mxu1 }
0x1184   : > { %v6639_v48 = vadd.f32 %v6638_v19, %v10653_v55  ;;  %v6752_v57 = vadd.f32 %v6751_v23, %v10657_v5  ;;  %v6640_v49 = vpop.f32.mrb[123].mxu0  ;;  %v6753_v50 = vpop.f32.mrb[123].mxu1 }
0x1185   : > { %v8037_v51 = vpack.c.bf16 %v6637_v44, %v6635_v56  ;;  %v8038_v52 = vpack.c.bf16 %v6750_v47, %v6748_v28  ;;  %v6641_v14 = vadd.f32 %v6640_v49, %v10662_v10  ;;  %v6754_v13 = vadd.f32 %v6753_v50, %v10666_v20 }
0x1187   : > { %7046 = vst [vmem:[%s9398_s11 + $0xc0] sm:$0xff] %v8037_v51  ;;  %7047 = vst [vmem:[%s9398_s11 + $0xc8] sm:$0xff] %v8038_v52  ;;  %v8039_v29 = vpack.c.bf16 %v6641_v14, %v6639_v48  ;;  %v8040_v8 = vpack.c.bf16 %v6754_v13, %v6752_v57 }
0x1189   : > { %7048 = vst [vmem:[%s9398_s11 + $0xd0] sm:$0xff] %v8039_v29  ;;  %7049 = vst [vmem:[%s9398_s11 + $0xd8] sm:$0xff] %v8040_v8 }
0x123e   : > { %v6644_v30 = vpop.f32.mrb[124].mxu0  ;;  %v6757_v37 = vpop.f32.mrb[124].mxu1 }
0x123f   : > { %v6645_v60 = vadd.f32 %v6644_v30, %v10653_v55  ;;  %v6758_v33 = vadd.f32 %v6757_v37, %v10657_v5  ;;  %v6646_v35 = vpop.f32.mrb[125].mxu0  ;;  %v6759_v16 = vpop.f32.mrb[125].mxu1 }
0x1240   : > { %v6647_v41 = vadd.f32 %v6646_v35, %v10662_v10  ;;  %v6760_v46 = vadd.f32 %v6759_v16, %v10666_v20  ;;  %v6648_v27 = vpop.f32.mrb[126].mxu0  ;;  %v6761_v12 = vpop.f32.mrb[126].mxu1  ;;  %7058 = sbr.rel (!%p7054_p7) target bundleno = 4679 (0x1247), region = 84 }
0x1241   : > { %v6649_v36 = vadd.f32 %v6648_v27, %v10653_v55  ;;  %v6762_v40 = vadd.f32 %v6761_v12, %v10657_v5  ;;  %v6650_v24 = vpop.f32.mrb[127].mxu0  ;;  %v6763_v54 = vpop.f32.mrb[127].mxu1  ;;  %v7059_v55 = vld [vmem:[#allocation2] sm:$0xff] (%p7054_p7) }
0x1242   : > { %v8041_v61 = vpack.c.bf16 %v6647_v41, %v6645_v60  ;;  %v8042_v62 = vpack.c.bf16 %v6760_v46, %v6758_v33  ;;  %v6651_v1 = vadd.f32 %v6650_v24, %v10662_v10  ;;  %v6764_v3 = vadd.f32 %v6763_v54, %v10666_v20  ;;  %7060 = vst [vmem:[#allocation16] sm:$0xff] (%p7054_p7), %v7059_v55 }
0x1244   : > { %7050 = vst [vmem:[%s9398_s11 + $0xe0] sm:$0xff] %v8041_v61  ;;  %7051 = vst [vmem:[%s9398_s11 + $0xe8] sm:$0xff] %v8042_v62  ;;  %v8043_v6 = vpack.c.bf16 %v6651_v1, %v6649_v36  ;;  %v8044_v53 = vpack.c.bf16 %v6764_v3, %v6762_v40 }
0x1246   : > { %7052 = vst [vmem:[%s9398_s11 + $0xf0] sm:$0xff] %v8043_v6  ;;  %7053 = vst [vmem:[%s9398_s11 + $0xf8] sm:$0xff] %v8044_v53 }
0x1247 PF: > { %s9083_s21 = smov [#allocation16]   ;;  %s8047_s27 = sshll.u32 %s9063_s16, 12 }
0x1248   : > { %s7098_s23 = sshll.u32 %s9083_s21, 4  ;;  %p11020_p0 = scmp.ne.s32.totalorder %s10906_s22, 0  ;;  %s7099_s23 = int_to_ptr.vmem [resolvable:$true] %s7098_s23 }
0x1249   : > { %s8925_s12 = scalar_lea.vmem %s7099_s23, 128  ;;  %p8932_p2 = scmp.lt.s32.totalorder %s7099_s23, %s7099_s23 }
0x124a   : > { %p8926_p9 = scmp.ne.s32.totalorder %s7099_s23, %s8925_s12  ;;  %p8933_p12 = scmp.lt.s32.totalorder %s8925_s12, %s8925_s12 }
0x124c   : > { %p8927_p4 = pnand %p8926_p9, %p11020_p0  ;;  %p8934_p1 = por %p8933_p12, %p8932_p2 }
0x124e   : > { %p8928_p13 = pneg %p8927_p4 }
0x1250   : > { %p8935_p11 = pnand %p8934_p1, %p8928_p13 }
0x1252   : > { %8938 = shalt.err (!%p8935_p11)
}
0x1253   : > { %s11021_s13 = sld [smem:[#allocation76_spill]] }
0x1259   : > { %s11022_s28 = smov %s11021_s13  ;;  %s8939_s5 = scalar_lea.hbm %s11021_s13, 128 }
0x125a   : > { %p8940_p8 = scmp.ne.s32.totalorder %s11022_s28, %s8939_s5  ;;  %p8945_p3 = scmp.lt.u32.totalorder %s8939_s5, %s11022_s28 }
0x125c   : > { %p8941_p6 = pnand %p8940_p8, %p11020_p0 }
0x125e   : > { %p8942_p10 = pneg %p8941_p6 }
0x1260   : > { %p8947_p7 = pnand %p8945_p3, %p8942_p10 }
0x1262   : > { %8950 = shalt.err (!%p8947_p7)
}
0x1263   : > { %8068 = dma.vmem_to_hbm [thread:$0]  (%p11020_p0), %s7099_s23, 128, %s11022_s28, [#allocation17]  }
0x1264   : > { %s11023_s30 = sld [smem:[#allocation75_spill]]  ;;  %s7082_s13 = sshll.u32 %s9398_s11, 4  ;;  %s10799_s13 = int_to_ptr.vmem [resolvable:$true] %s7082_s13 }
0x1265   : > { %s7064_s5 = scalar_lea.sflag [#allocation8], %s9379_s24  ;;  %s8951_s9 = scalar_lea.vmem %s10799_s13, 4096 }
0x1266   : > { %p8952_p9 = scmp.ne.s32.totalorder %s10799_s13, %s8951_s9  ;;  %s9084_s19 = smov [#allocation15]  }
0x1267   : > { %s8955_s16 = sshll.u32 %s9084_s19, 4  ;;  %s8956_s16 = int_to_ptr.vmem [resolvable:$false] %s8955_s16 }
0x1268   : > { %p8953_p4 = pnand %p8952_p9, %p9324_p5  ;;  %s8957_s23 = scalar_lea.vmem %s8956_s16, 8192 }
0x1269   : > { %p8958_p2 = scmp.lt.s32.totalorder %s10799_s13, %s8956_s16  ;;  %p8959_p12 = scmp.lt.s32.totalorder %s8957_s23, %s8951_s9 }
0x126a   : > { %s10796_s29 = scalar_lea.hbm %s11023_s30, %s8047_s27  ;;  %p8954_p13 = pneg %p8953_p4 }
0x126b   : > { %p8960_p1 = por %p8959_p12, %p8958_p2 }
0x126d   : > { %p8961_p11 = pnand %p8960_p1, %p8954_p13 }
0x126f   : > { %8964 = shalt.err (!%p8961_p11)
}
0x1270   : > { %s8965_s11 = scalar_lea.hbm %s10796_s29, 4096  ;;  %s8969_s20 = scalar_lea.hbm %s11023_s30, 8192 }
0x1271   : > { %p8966_p8 = scmp.ne.s32.totalorder %s10796_s29, %s8965_s11  ;;  %p8970_p3 = scmp.lt.u32.totalorder %s10796_s29, %s11023_s30 }
0x1272   : > { %p8971_p7 = scmp.lt.u32.totalorder %s8969_s20, %s8965_s11  ;;  %p8973_p4 = scmp.lt.u32.totalorder %s8965_s11, %s10796_s29 }
0x1273   : > { %p8967_p6 = pnand %p8966_p8, %p9324_p5 }
0x1274   : > { %p8972_p9 = por %p8971_p7, %p8970_p3 }
0x1275   : > { %p8968_p10 = pneg %p8967_p6 }
0x1276   : > { %p8974_p13 = por %p8973_p4, %p8972_p9 }
0x1278   : > { %p8975_p2 = pnand %p8974_p13, %p8968_p10 }
0x127a   : > { %8978 = shalt.err (!%p8975_p2)
}
0x127b   : > { %s9085_s12 = smov 256   ;;  %s9086_s9 = smov 16  }
0x127c   : > { %8066 = dma.vmem_to_hbm [thread:$0]  (%p9324_p5), %s10799_s13, 4096, %s10796_s29, %s7064_s5, %s9085_s12, %s9085_s12, %s9086_s9  }
0x127d   : > { %s9087_s19 = smov [#allocation18]  }
0x127e   : > { %s7111_s16 = sshll.u32 %s9087_s19, 4  ;;  %s7112_s16 = int_to_ptr.vmem [resolvable:$true] %s7111_s16 }
0x127f   : > { %s8979_s23 = scalar_lea.vmem %s7112_s16, 128  ;;  %p8986_p8 = scmp.lt.s32.totalorder %s7112_s16, %s7112_s16 }
0x1280   : > { %p8980_p12 = scmp.ne.s32.totalorder %s7112_s16, %s8979_s23  ;;  %p8987_p6 = scmp.lt.s32.totalorder %s8979_s23, %s8979_s23 }
0x1282   : > { %p8981_p1 = pnand %p8980_p12, %p11020_p0  ;;  %p8988_p10 = por %p8987_p6, %p8986_p8 }
0x1284   : > { %p8982_p11 = pneg %p8981_p1 }
0x1286   : > { %p8989_p3 = pnand %p8988_p10, %p8982_p11 }
0x1288   : > { %8992 = shalt.err (!%p8989_p3)
}
0x1289   : > { %s11024_s26 = sld [smem:[#allocation77_spill]] }
0x128f   : > { %s8993_s7 = scalar_lea.hbm %s11024_s26, 128 }
0x1290   : > { %p8994_p5 = scmp.ne.s32.totalorder %s11024_s26, %s8993_s7  ;;  %p8999_p4 = scmp.lt.u32.totalorder %s8993_s7, %s11024_s26 }
0x1292   : > { %p8995_p7 = pnand %p8994_p5, %p11020_p0 }
0x1294   : > { %p8996_p9 = pneg %p8995_p7 }
0x1296   : > { %p9001_p13 = pnand %p8999_p4, %p8996_p9 }
0x1298   : > { %9004 = shalt.err (!%p9001_p13)
}
0x1299   : > { %8070 = dma.vmem_to_hbm [thread:$0]  (%p11020_p0), %s7112_s16, 128, %s11024_s26, [#allocation17]  }
0x129a   : > { %9042 = dma.done.wait (%p11020_p0), [#allocation17], 256  }
0x129b   : > { %9044 = vsyncadd (%p11020_p0), [#allocation17], 4294967040 }
0x129c PF: > { %s11025_s21 = sld [smem:[#allocation24_spill]]  ;;  %s11026_s12 = sld [smem:[#allocation25_spill]] }
0x129d   : > { %p11028_p12 = scmp.ge.s32.totalorder %s9071_s18, 2 }
0x12a2   : > { %s7131_s9 = sand.u32 1, %s11025_s21   ;;  %p11027_p2 = scmp.ne.s32.totalorder %s11026_s12, 0 }
0x12a3   : > { %s7132_s19 = scalar_lea.sflag [#allocation8], %s7131_s9 }
0x12a4   : > { %p8094_p1 = pnand %p11028_p12, %p11027_p2 }
0x12a6   : > { %9046 = dma.done.wait (!%p8094_p1), %s7132_s19, 4096  }
0x12a7   : > { %9048 = vsyncadd (!%p8094_p1), %s7132_s19, 4294963200  ;;  %s30_s18 = sadd.s32 1, %s9071_s18   ;;  %s11029_s13 = smov %s9055_s14 }
0x12a8   : > { %p27_p11 = scmp.ge.s32.totalorder %s30_s18, 4   ;;  %s11030_s14 = smov %s9059_s15 }
0x12a9   : > { %s11031_s15 = smov %s9333_s8  ;;  %s11032_s16 = smov %s9067_s17 }
0x12aa   : > { %s11033_s17 = smov %s11035_s10  ;;  %29 = sbr.rel (!%p27_p11) target bundleno = 15 (0xf), region = 183 }
0x12b1   :  { %7137 = vsyncpa [#allocation7], 1 }
0x12b2   :  { %7139 = vsyncpa [#allocation7 + $0x1], 1 }
0x12b3   :  { %7140 = vsyncpa [#allocation10], 1 }
0x12b4   :  { %7141 = vsyncpa [#allocation13], 1 }
0x12b5   :  { %7142 = vsyncpa [#allocation8], 1 }
0x12b6   :  { %7144 = vsyncpa [#allocation8 + $0x1], 1 }
0x12b7   :  { %7145 = vsyncpa [#allocation17], 1 }

</bundles_post_ra>
